<compile_context>
chip_gen: v6e
topology: v6e:2x2x1
jax: 0.10.0
libtpu: 0.0.40
codegen_flags: <defaults>
</compile_context>

<pallas_src>
import math
from functools import partial

import jax
import jax.numpy as jnp
from jax import lax
from jax.experimental import pallas as pl
from jax.experimental.pallas import tpu as pltpu

_EPS = 1e-5


# ----------------------------------------------------------------------------
# Hardware-aware static helpers (tile / chunk selection, compiler params)
# ----------------------------------------------------------------------------
def _vmem_cap_bytes():
    """Physical VMEM per TensorCore (v5e/v6e: 128 MiB, v7x: 64 MiB)."""
    try:
        return int(pltpu.get_tpu_info().vmem_capacity_bytes)
    except Exception:            # interpret mode / older runtimes
        return 64 << 20


def _mosaic_params(block_bytes, extra_bytes, semantics):
    """Scoped-VMEM limit sized to the tile footprint, never above ~90% physical."""
    cap = int(_vmem_cap_bytes() * 0.9)
    est = 2 * block_bytes + extra_bytes + (4 << 20)      # x2: double-buffered blocks
    limit = int(min(max(2 * est, 32 << 20), cap))
    return pltpu.CompilerParams(dimension_semantics=semantics,
                                vmem_limit_bytes=limit)


def _pick_f_tile(f_total):
    """Projection feature tile: stream >= ~1 MiB of (z_dim, F) weight per step."""
    for tf in (4096, 2048, 1024, 512, 256, 128):
        if f_total % tf == 0 and f_total // tf >= 2:
            return tf
    return f_total


def _pick_cout_tile(c_out):
    """Up-block Cout tile. InstanceNorm stats are per (sample, channel) so channel
    tiles are fully independent -> extra 'parallel' grid axis (feeds 2 TCs on v7x)."""
    for tc in (256, 128):
        if c_out % tc == 0 and c_out // tc >= 2:
            return tc
    return c_out


def _pick_row_chunk(h_out, w_out, c_in, c_out):
    """Output rows per im2col chunk: fit a generation-aware VMEM budget, reach
    M = rows*w_out >= 256 (one MXU tile) when possible, and divide h_out."""
    budget = (4 << 20) if _vmem_cap_bytes() >= (96 << 20) else (2 << 20)
    per_row = (w_out * (9 * c_in * 2 + c_out * 6)       # bf16 patches + f32/bf16 chunk
               + (w_out + 2) * c_in * 4)                 # f32 slicing slab
    budget_rows = max(1, budget // per_row)
    mxu_rows = -(-256 // w_out)                          # ceil(256 / w_out)
    target = min(h_out, max(budget_rows, mxu_rows))
    divs = [d for d in range(1, h_out + 1) if h_out % d == 0 and d <= target]
    aligned = [d for d in divs if (d * w_out) % 16 == 0]  # bf16 sublane packing
    return max(aligned) if aligned else max(divs)


# ----------------------------------------------------------------------------
# Kernels
# ----------------------------------------------------------------------------
def _project_kernel(z_ref, w_ref, gamma_ref, beta_ref, o_ref):
    """Linear(z_dim -> F-tile, no bias) + BatchNorm1d (batch stats) + ReLU.

    Gridded along the output-feature axis; BatchNorm1d statistics are per-feature
    over the batch, so each feature tile is independent.
    """
    y = jnp.dot(z_ref[...], w_ref[...], preferred_element_type=jnp.float32)  # (B, TF)
    n = y.shape[0]
    s = jnp.sum(y, axis=0, keepdims=True)                 # one-pass stats (f32)
    ss = jnp.sum(y * y, axis=0, keepdims=True)
    mean = s / n
    var = jnp.maximum(ss / n - mean * mean, 0.0)          # biased variance
    scale = gamma_ref[...] * lax.rsqrt(var + _EPS)
    shift = beta_ref[...] - mean * scale
    o_ref[...] = jnp.maximum(y * scale + shift, 0.0).astype(o_ref.dtype)


def _im2col_rows(xp_ref, r0, rows, w_out, c_in):
    """(rows*w_out, 9*c_in) bf16 im2col patches for output rows [r0, r0+rows).

    The small padded slab is widened to f32 only for the +-1 tap slicing (robust
    odd sublane offsets); each tap is narrowed back to bf16 immediately, so the
    patch matrix feeding the MXU -- the dominant footprint -- stays bf16.
    """
    xpc = xp_ref[0, pl.ds(r0, rows + 2), :, :].astype(jnp.float32)   # (rows+2, Wp, Cin)
    taps = [xpc[dy:dy + rows, dx:dx + w_out, :].astype(jnp.bfloat16)
            for dy in range(3) for dx in range(3)]                   # tap-major order
    patches = jnp.concatenate(taps, axis=-1)                         # (rows, w_out, 9*Cin)
    return patches.reshape(rows * w_out, 9 * c_in)


def _upblock_kernel(xp_ref, w_ref, gamma_ref, beta_ref, o_ref, *, th):
    """Conv3x3(no bias) + InstanceNorm2d(affine) + LeakyReLU(0.2).

    One (sample, Cout-tile) grid step:
      xp_ref: (1, H+2, W+2, Cin)  upsampled + zero-padded input, bf16
      w_ref:  (9*Cin, Ct)         3x3 taps flattened tap-major, bf16
      o_ref:  (1, H*W, Ct)        bf16

    Pass 1 writes raw conv chunks straight into o_ref while carrying f32
    sum / sum-of-squares; pass 2 applies the InstanceNorm affine + LeakyReLU in
    place, chunk by chunk (no full-image f32 scratch).
    """
    _, hp, wp, c_in = xp_ref.shape
    h_out, w_out = hp - 2, wp - 2
    c_t = o_ref.shape[-1]
    m = th * w_out
    n_chunks = h_out // th
    w = w_ref[...]

    def conv_chunk(ci, carry):
        s, ss = carry
        r0 = pl.multiple_of(ci * th, th)
        patches = _im2col_rows(xp_ref, r0, th, w_out, c_in)
        chunk = jnp.dot(patches, w, preferred_element_type=jnp.float32)   # (m, Ct) f32
        o_ref[0, pl.ds(pl.multiple_of(ci * m, m), m), :] = chunk.astype(o_ref.dtype)
        return (s + jnp.sum(chunk, axis=0, keepdims=True),
                ss + jnp.sum(chunk * chunk, axis=0, keepdims=True))

    init = (jnp.zeros((1, c_t), jnp.float32), jnp.zeros((1, c_t), jnp.float32))
    s, ss = lax.fori_loop(0, n_chunks, conv_chunk, init)

    n = float(h_out * w_out)
    mean = s / n
    var = jnp.maximum(ss / n - mean * mean, 0.0)      # biased variance (InstanceNorm2d)
    scale = gamma_ref[...] * lax.rsqrt(var + _EPS)
    shift = beta_ref[...] - mean * scale

    def norm_chunk(ci, _):
        m0 = pl.multiple_of(ci * m, m)
        y = o_ref[0, pl.ds(m0, m), :].astype(jnp.float32) * scale + shift
        o_ref[0, pl.ds(m0, m), :] = jnp.where(y >= 0.0, y, 0.2 * y).astype(o_ref.dtype)
        return 0

    lax.fori_loop(0, n_chunks, norm_chunk, 0)


def _final_conv_kernel(xp_ref, w_ref, bias_ref, o_ref, *, th):
    """Conv3x3(bias) + Tanh, one sample.  o_ref: (1, H*W, C) f32."""
    _, hp, wp, c_in = xp_ref.shape
    h_out, w_out = hp - 2, wp - 2
    m = th * w_out
    w = w_ref[...]
    bias = bias_ref[...]

    def chunk_body(ci, _):
        r0 = pl.multiple_of(ci * th, th)
        patches = _im2col_rows(xp_ref, r0, th, w_out, c_in)
        chunk = jnp.dot(patches, w, preferred_element_type=jnp.float32) + bias
        # TODO(synk): store is only C (1-3) lanes wide (masked vst); a transposed,
        # lane-dense (C, m) store would remove the remaining store-slot waste but
        # needs an in-kernel (m, C)->(C, m) transpose of an awkward shape.
        o_ref[0, pl.ds(pl.multiple_of(ci * m, m), m), :] = (
            jnp.tanh(chunk).astype(o_ref.dtype))
        return 0

    lax.fori_loop(0, h_out // th, chunk_body, 0)


# ----------------------------------------------------------------------------
# pallas_call wrappers
# ----------------------------------------------------------------------------
def _project(z, w, gamma, beta):
    b, zd = z.shape
    f_total = w.shape[1]
    tf = _pick_f_tile(f_total)
    block_bytes = b * zd * 2 + zd * tf * 2 + 2 * tf * 4 + b * tf * 2
    extra = 4 * b * tf * 4
    return pl.pallas_call(
        _project_kernel,
        out_shape=jax.ShapeDtypeStruct((b, f_total), jnp.bfloat16),
        grid=(f_total // tf,),
        in_specs=[
            pl.BlockSpec((b, zd), lambda i: (0, 0)),
            pl.BlockSpec((zd, tf), lambda i: (0, i)),
            pl.BlockSpec((1, tf), lambda i: (0, i)),
            pl.BlockSpec((1, tf), lambda i: (0, i)),
        ],
        out_specs=pl.BlockSpec((b, tf), lambda i: (0, i)),
        compiler_params=_mosaic_params(block_bytes, extra, ("parallel",)),
    )(z, w, gamma, beta)


def _upblock(x, w, gamma, beta):
    b, h, wd, c_in = x.shape
    c_out = w.shape[1]
    h2, w2 = 2 * h, 2 * wd
    # Nearest 2x upsample + zero pad: layout glue kept in XLA for now.
    # TODO(synk): fuse the upsample/pad into the kernel (halved-offset row/col
    # indexing of the low-res input) to drop the extra HBM round trip per block.
    xu = jnp.repeat(jnp.repeat(x, 2, axis=1), 2, axis=2)
    xp = jnp.pad(xu, ((0, 0), (1, 1), (1, 1), (0, 0)))

    tc = _pick_cout_tile(c_out)
    th = _pick_row_chunk(h2, w2, c_in, tc)
    block_bytes = ((h2 + 2) * (w2 + 2) * c_in * 2 + 9 * c_in * tc * 2
                   + 2 * tc * 4 + h2 * w2 * tc * 2)
    extra = ((th + 2) * (w2 + 2) * c_in * 6          # f32 slicing slab + bf16 view
             + th * w2 * 9 * c_in * 2                # bf16 patch matrix
             + 3 * th * w2 * tc * 4)                 # f32 conv chunk + norm chunk
    out = pl.pallas_call(
        partial(_upblock_kernel, th=th),
        out_shape=jax.ShapeDtypeStruct((b, h2 * w2, c_out), jnp.bfloat16),
        grid=(b, c_out // tc),
        in_specs=[
            pl.BlockSpec((1, h2 + 2, w2 + 2, c_in), lambda i, j: (i, 0, 0, 0)),
            pl.BlockSpec((9 * c_in, tc), lambda i, j: (0, j)),
            pl.BlockSpec((1, tc), lambda i, j: (0, j)),
            pl.BlockSpec((1, tc), lambda i, j: (0, j)),
        ],
        out_specs=pl.BlockSpec((1, h2 * w2, tc), lambda i, j: (i, 0, j)),
        compiler_params=_mosaic_params(block_bytes, extra, ("parallel", "parallel")),
    )(xp, w, gamma, beta)
    return out.reshape(b, h2, w2, c_out)


def _final_conv(x, w, bias):
    b, h, wd, c_in = x.shape
    c_out = w.shape[1]
    xp = jnp.pad(x, ((0, 0), (1, 1), (1, 1), (0, 0)))
    th = _pick_row_chunk(h, wd, c_in, c_out)
    block_bytes = ((h + 2) * (wd + 2) * c_in * 2 + 9 * c_in * c_out * 2
                   + c_out * 4 + h * wd * c_out * 4)
    extra = ((th + 2) * (wd + 2) * c_in * 6 + th * wd * 9 * c_in * 2
             + 2 * th * wd * c_out * 4)
    out = pl.pallas_call(
        partial(_final_conv_kernel, th=th),
        out_shape=jax.ShapeDtypeStruct((b, h * wd, c_out), jnp.float32),
        grid=(b,),
        in_specs=[
            pl.BlockSpec((1, h + 2, wd + 2, c_in), lambda i: (i, 0, 0, 0)),
            pl.BlockSpec((9 * c_in, c_out), lambda i: (0, 0)),
            pl.BlockSpec((1, c_out), lambda i: (0, 0)),
        ],
        out_specs=pl.BlockSpec((1, h * wd, c_out), lambda i: (i, 0, 0)),
        compiler_params=_mosaic_params(block_bytes, extra, ("parallel",)),
    )(xp, w, bias)
    return out.reshape(b, h, wd, c_out)


# ----------------------------------------------------------------------------
# Parameter construction (deterministic, mirrors the module's __init__ shapes)
# ----------------------------------------------------------------------------
def make_generator_params(key, image_size, z_dim=100, filter_dim=64, n_blocks=3):
    C, H, W = image_size
    max_blocks = max(int(math.log2(min(H, W))) - 2, 1)
    nb = min(n_blocks, max_blocks)
    init_h, init_w = H // 2 ** nb, W // 2 ** nb
    init_ch = filter_dim * 2 ** nb
    f_out = init_ch * init_h * init_w

    keys = jax.random.split(key, nb + 3)
    gain = math.sqrt(2.0 / (1.0 + 0.2 ** 2))     # kaiming gain for leaky_relu(0.2)

    params = {
        # nn.Linear weight stored transposed (in, out); bias=False.  Carried in bf16.
        "proj_w": (jax.random.normal(keys[0], (z_dim, f_out), jnp.float32)
                   * (1.0 / math.sqrt(z_dim))).astype(jnp.bfloat16),
        # BatchNorm1d: weights_init -> weight ~ N(1, 0.02), bias = 0.  Kept f32.
        "bn_gamma": 1.0 + 0.02 * jax.random.normal(keys[1], (1, f_out), jnp.float32),
        "bn_beta": jnp.zeros((1, f_out), jnp.float32),
        "blocks": [],
    }

    for i in range(nb):
        in_ch = filter_dim * 2 ** (nb - i)
        out_ch = filter_dim * 2 ** (nb - i - 1)
        std = gain / math.sqrt(in_ch * 9)        # kaiming_normal_(a=0.2)
        wk = jax.random.normal(keys[2 + i], (3, 3, in_ch, out_ch), jnp.float32) * std
        params["blocks"].append(
            {
                "w": wk.reshape(9 * in_ch, out_ch).astype(jnp.bfloat16),
                # InstanceNorm2d affine params (default init: ones / zeros).
                "gamma": jnp.ones((1, out_ch), jnp.float32),
                "beta": jnp.zeros((1, out_ch), jnp.float32),
            }
        )

    std = gain / math.sqrt(filter_dim * 9)
    fw = jax.random.normal(keys[-1], (3, 3, filter_dim, C), jnp.float32) * std
    params["final_w"] = fw.reshape(9 * filter_dim, C).astype(jnp.bfloat16)
    params["final_b"] = jnp.zeros((1, C), jnp.float32)

    meta = dict(C=C, H=H, W=W, n_blocks=nb, init_h=init_h, init_w=init_w,
                init_ch=init_ch, filter_dim=filter_dim, z_dim=z_dim)
    return params, meta


# ----------------------------------------------------------------------------
# Full forward pass
# ----------------------------------------------------------------------------
def generator_forward(params, meta, z):
    b = z.shape[0]
    z = z.astype(jnp.bfloat16)
    # project: Linear + BatchNorm1d + ReLU  (feature-tiled Pallas kernel)
    x = _project(z, params["proj_w"], params["bn_gamma"], params["bn_beta"])   # (B, F)
    # view(-1, init_ch, init_h, init_w) in NCHW, then NHWC for the conv kernels.
    x = x.reshape(b, meta["init_ch"], meta["init_h"], meta["init_w"])
    x = jnp.transpose(x, (0, 2, 3, 1))                                         # -> NHWC
    for blk in params["blocks"]:
        x = _upblock(x, blk["w"], blk["gamma"], blk["beta"])
    x = _final_conv(x, params["final_w"], params["final_b"])                   # (B,H,W,C)
    # TODO(synk): keep the tiny-channel output lane-dense inside the final kernel
    # ((C, H*W) store) and drop this XLA transpose.
    return jnp.transpose(x, (0, 3, 1, 2))                                      # -> NCHW


if __name__ == "__main__":
    # Small, module-consistent config: image (1, 16, 16), z_dim=16, filter_dim=8,
    # n_blocks=2 -> init grid 4x4 with 32 channels, two up blocks to 16x16.
    image_size = (1, 16, 16)
    z_dim, filter_dim, n_blocks, batch = 16, 8, 2, 2

    key = jax.random.PRNGKey(0)
    pkey, zkey = jax.random.split(key)
    params, meta = make_generator_params(pkey, image_size, z_dim, filter_dim, n_blocks)

    z = jax.random.normal(zkey, (batch, z_dim), jnp.float32)
    fwd = jax.jit(lambda latent: generator_forward(params, meta, latent))
    out = jax.block_until_ready(fwd(z))

    assert out.shape == (batch,) + image_size, out.shape
    assert bool(jnp.all(jnp.isfinite(out)))
    assert bool(jnp.all(jnp.abs(out) <= 1.0 + 1e-5))   # tanh range
    print("KERNEL_OK")
</pallas_src>

<mosaic_0001>
module attributes {stable_mosaic.version = 11 : i64} {
  func.func @_project_kernel(%arg0: i32, %arg1: memref<2x16xbf16, #tpu.memory_space<vmem>>, %arg2: memref<16x256xbf16, #tpu.memory_space<vmem>>, %arg3: memref<1x256xf32, #tpu.memory_space<vmem>>, %arg4: memref<1x256xf32, #tpu.memory_space<vmem>>, %arg5: memref<2x256xbf16, #tpu.memory_space<vmem>>) attributes {dimension_semantics = [#tpu.dimension_semantics<parallel>], iteration_bounds = array<i64: 2>, scalar_prefetch = 0 : i64, scratch_operands = 0 : i64, tpu.core_type = #tpu.core_type<tc>, window_params = [{pipeline_mode = #tpu.pipeline_mode<synchronous>, transform_indices = @transform_0, window_bounds = array<i64: 2, 16>}, {transform_indices = @transform_1, window_bounds = array<i64: 16, 256>}, {transform_indices = @transform_2, window_bounds = array<i64: 1, 256>}, {transform_indices = @transform_3, window_bounds = array<i64: 1, 256>}, {transform_indices = @transform_4, window_bounds = array<i64: 2, 256>}]} {
    %c0 = arith.constant 0 : index
    %c0_0 = arith.constant 0 : index
    %0 = vector.load %arg1[%c0, %c0_0] : memref<2x16xbf16, #tpu.memory_space<vmem>>, vector<2x16xbf16>
    %c0_1 = arith.constant 0 : index
    %c0_2 = arith.constant 0 : index
    %1 = vector.load %arg2[%c0_1, %c0_2] : memref<16x256xbf16, #tpu.memory_space<vmem>>, vector<16x256xbf16>
    %cst = arith.constant dense<0.000000e+00> : vector<2x256xf32>
    %2 = tpu.matmul %0, %1, %cst {dimension_numbers = #tpu.dot_dimension_numbers<[1], [0], [0], [1], [0, 0, 1, 1], [], []>} : vector<2x16xbf16>, vector<16x256xbf16>, vector<2x256xf32> -> vector<2x256xf32>
    %cst_3 = arith.constant dense<0.000000e+00> : vector<256xf32>
    %3 = vector.multi_reduction <add>, %2, %cst_3 [0] : vector<2x256xf32> to vector<256xf32>
    %4 = vector.shape_cast %3 : vector<256xf32> to vector<1x256xf32>
    %5 = arith.mulf %2, %2 : vector<2x256xf32>
    %cst_4 = arith.constant dense<0.000000e+00> : vector<256xf32>
    %6 = vector.multi_reduction <add>, %5, %cst_4 [0] : vector<2x256xf32> to vector<256xf32>
    %7 = vector.shape_cast %6 : vector<256xf32> to vector<1x256xf32>
    %cst_5 = arith.constant 2.000000e+00 : f32
    %8 = vector.broadcast %cst_5 : f32 to vector<1x256xf32>
    %9 = arith.divf %4, %8 : vector<1x256xf32>
    %cst_6 = arith.constant 2.000000e+00 : f32
    %10 = vector.broadcast %cst_6 : f32 to vector<1x256xf32>
    %11 = arith.divf %7, %10 : vector<1x256xf32>
    %12 = arith.mulf %9, %9 : vector<1x256xf32>
    %13 = arith.subf %11, %12 : vector<1x256xf32>
    %cst_7 = arith.constant 0.000000e+00 : f32
    %14 = vector.broadcast %cst_7 : f32 to vector<1x256xf32>
    %15 = arith.maximumf %13, %14 : vector<1x256xf32>
    %c0_8 = arith.constant 0 : index
    %c0_9 = arith.constant 0 : index
    %16 = vector.load %arg3[%c0_8, %c0_9] : memref<1x256xf32, #tpu.memory_space<vmem>>, vector<1x256xf32>
    %cst_10 = arith.constant 9.99999974E-6 : f32
    %17 = vector.broadcast %cst_10 : f32 to vector<1x256xf32>
    %18 = arith.addf %15, %17 : vector<1x256xf32>
    %19 = math.rsqrt %18 : vector<1x256xf32>
    %20 = arith.mulf %16, %19 : vector<1x256xf32>
    %c0_11 = arith.constant 0 : index
    %c0_12 = arith.constant 0 : index
    %21 = vector.load %arg4[%c0_11, %c0_12] : memref<1x256xf32, #tpu.memory_space<vmem>>, vector<1x256xf32>
    %22 = arith.mulf %9, %20 : vector<1x256xf32>
    %23 = arith.subf %21, %22 : vector<1x256xf32>
    %24 = vector.broadcast %20 : vector<1x256xf32> to vector<2x256xf32>
    %25 = arith.mulf %2, %24 : vector<2x256xf32>
    %26 = vector.broadcast %23 : vector<1x256xf32> to vector<2x256xf32>
    %27 = arith.addf %25, %26 : vector<2x256xf32>
    %cst_13 = arith.constant 0.000000e+00 : f32
    %28 = vector.broadcast %cst_13 : f32 to vector<2x256xf32>
    %29 = arith.maximumf %27, %28 : vector<2x256xf32>
    %30 = arith.truncf %29 : vector<2x256xf32> to vector<2x256xbf16>
    %c0_14 = arith.constant 0 : index
    %c0_15 = arith.constant 0 : index
    %31 = vector.load %arg5[%c0_14, %c0_15] : memref<2x256xbf16, #tpu.memory_space<vmem>>, vector<2x256xbf16>
    tpu.vector_store %arg5[%c0_14, %c0_15], %30 {strides = array<i32>} : memref<2x256xbf16, #tpu.memory_space<vmem>>, vector<2x256xbf16>,
    return
  }
  func.func @transform_0(%arg0: i32) -> (i32, i32) {
    %c0_i32 = arith.constant 0 : i32
    %c0_i32_0 = arith.constant 0 : i32
    %c0_i32_1 = arith.constant 0 : i32
    return %c0_i32, %c0_i32_0 : i32, i32
  }
  func.func @transform_1(%arg0: i32) -> (i32, i32) {
    %c0_i32 = arith.constant 0 : i32
    %c0_i32_0 = arith.constant 0 : i32
    return %c0_i32, %arg0 : i32, i32
  }
  func.func @transform_2(%arg0: i32) -> (i32, i32) {
    %c0_i32 = arith.constant 0 : i32
    %c0_i32_0 = arith.constant 0 : i32
    return %c0_i32, %arg0 : i32, i32
  }
  func.func @transform_3(%arg0: i32) -> (i32, i32) {
    %c0_i32 = arith.constant 0 : i32
    %c0_i32_0 = arith.constant 0 : i32
    return %c0_i32, %arg0 : i32, i32
  }
  func.func @transform_4(%arg0: i32) -> (i32, i32) {
    %c0_i32 = arith.constant 0 : i32
    %c0_i32_0 = arith.constant 0 : i32
    return %c0_i32, %arg0 : i32, i32
  }
}

module attributes {stable_mosaic.version = 11 : i64} {
  func.func @_upblock_kernel(%arg0: i32, %arg1: i32, %arg2: memref<1x10x10x32xbf16, #tpu.memory_space<vmem>>, %arg3: memref<288x16xbf16, #tpu.memory_space<vmem>>, %arg4: memref<1x16xf32, #tpu.memory_space<vmem>>, %arg5: memref<1x16xf32, #tpu.memory_space<vmem>>, %arg6: memref<1x64x16xbf16, #tpu.memory_space<vmem>>) attributes {dimension_semantics = [#tpu.dimension_semantics<parallel>, #tpu.dimension_semantics<parallel>], iteration_bounds = array<i64: 2, 1>, scalar_prefetch = 0 : i64, scratch_operands = 0 : i64, tpu.core_type = #tpu.core_type<tc>, window_params = [{transform_indices = @transform_0, window_bounds = array<i64: 1, 10, 10, 32>}, {transform_indices = @transform_1, window_bounds = array<i64: 288, 16>}, {transform_indices = @transform_2, window_bounds = array<i64: 1, 16>}, {transform_indices = @transform_3, window_bounds = array<i64: 1, 16>}, {transform_indices = @transform_4, window_bounds = array<i64: 1, 64, 16>}]} {
    %c0 = arith.constant 0 : index
    %c0_0 = arith.constant 0 : index
    %0 = vector.load %arg3[%c0, %c0_0] : memref<288x16xbf16, #tpu.memory_space<vmem>>, vector<288x16xbf16>
    %cst = arith.constant 0.000000e+00 : f32
    %1 = vector.broadcast %cst : f32 to vector<1x16xf32>
    %cst_1 = arith.constant 0.000000e+00 : f32
    %2 = vector.broadcast %cst_1 : f32 to vector<1x16xf32>
    %c0_i32 = arith.constant 0 : i32
    %c8_i32 = arith.constant 8 : i32
    %3 = arith.muli %c0_i32, %c8_i32 : i32
    %4 = tpu.assume_multiple %3, 8 : i32
    %c0_2 = arith.constant 0 : index
    %5 = arith.index_cast %4 : i32 to index
    %c0_3 = arith.constant 0 : index
    %c0_4 = arith.constant 0 : index
    %6 = vector.load %arg2[%c0_2, %5, %c0_3, %c0_4] : memref<1x10x10x32xbf16, #tpu.memory_space<vmem>>, vector<1x10x10x32xbf16>
    %7 = vector.shape_cast %6 : vector<1x10x10x32xbf16> to vector<10x10x32xbf16>
    %8 = arith.extf %7 : vector<10x10x32xbf16> to vector<10x10x32xf32>
    %9 = vector.extract_strided_slice %8 {offsets = [0, 0, 0], sizes = [8, 8, 32], strides = [1, 1, 1]} : vector<10x10x32xf32> to vector<8x8x32xf32>
    %10 = arith.truncf %9 : vector<8x8x32xf32> to vector<8x8x32xbf16>
    %11 = vector.extract_strided_slice %8 {offsets = [0, 1, 0], sizes = [8, 8, 32], strides = [1, 1, 1]} : vector<10x10x32xf32> to vector<8x8x32xf32>
    %12 = arith.truncf %11 : vector<8x8x32xf32> to vector<8x8x32xbf16>
    %13 = vector.extract_strided_slice %8 {offsets = [0, 2, 0], sizes = [8, 8, 32], strides = [1, 1, 1]} : vector<10x10x32xf32> to vector<8x8x32xf32>
    %14 = arith.truncf %13 : vector<8x8x32xf32> to vector<8x8x32xbf16>
    %15 = vector.extract_strided_slice %8 {offsets = [1, 0, 0], sizes = [8, 8, 32], strides = [1, 1, 1]} : vector<10x10x32xf32> to vector<8x8x32xf32>
    %16 = arith.truncf %15 : vector<8x8x32xf32> to vector<8x8x32xbf16>
    %17 = vector.extract_strided_slice %8 {offsets = [1, 1, 0], sizes = [8, 8, 32], strides = [1, 1, 1]} : vector<10x10x32xf32> to vector<8x8x32xf32>
    %18 = arith.truncf %17 : vector<8x8x32xf32> to vector<8x8x32xbf16>
    %19 = vector.extract_strided_slice %8 {offsets = [1, 2, 0], sizes = [8, 8, 32], strides = [1, 1, 1]} : vector<10x10x32xf32> to vector<8x8x32xf32>
    %20 = arith.truncf %19 : vector<8x8x32xf32> to vector<8x8x32xbf16>
    %21 = vector.extract_strided_slice %8 {offsets = [2, 0, 0], sizes = [8, 8, 32], strides = [1, 1, 1]} : vector<10x10x32xf32> to vector<8x8x32xf32>
    %22 = arith.truncf %21 : vector<8x8x32xf32> to vector<8x8x32xbf16>
    %23 = vector.extract_strided_slice %8 {offsets = [2, 1, 0], sizes = [8, 8, 32], strides = [1, 1, 1]} : vector<10x10x32xf32> to vector<8x8x32xf32>
    %24 = arith.truncf %23 : vector<8x8x32xf32> to vector<8x8x32xbf16>
    %25 = vector.extract_strided_slice %8 {offsets = [2, 2, 0], sizes = [8, 8, 32], strides = [1, 1, 1]} : vector<10x10x32xf32> to vector<8x8x32xf32>
    %26 = arith.truncf %25 : vector<8x8x32xf32> to vector<8x8x32xbf16>
    %27 = tpu.concatenate %10, %12, %14, %16, %18, %20, %22, %24, %26 in 2 : vector<8x8x32xbf16>, vector<8x8x32xbf16>, vector<8x8x32xbf16>, vector<8x8x32xbf16>, vector<8x8x32xbf16>, vector<8x8x32xbf16>, vector<8x8x32xbf16>, vector<8x8x32xbf16>, vector<8x8x32xbf16> -> vector<8x8x288xbf16>
    %28 = vector.shape_cast %27 : vector<8x8x288xbf16> to vector<64x288xbf16>
    %cst_5 = arith.constant dense<0.000000e+00> : vector<64x16xf32>
    %29 = tpu.matmul %28, %0, %cst_5 {dimension_numbers = #tpu.dot_dimension_numbers<[1], [0], [0], [1], [0, 0, 1, 1], [], []>} : vector<64x288xbf16>, vector<288x16xbf16>, vector<64x16xf32> -> vector<64x16xf32>
    %30 = arith.truncf %29 : vector<64x16xf32> to vector<64x16xbf16>
    %c64_i32 = arith.constant 64 : i32
    %31 = arith.muli %c0_i32, %c64_i32 : i32
    %32 = tpu.assume_multiple %31, 64 : i32
    %c0_6 = arith.constant 0 : index
    %33 = arith.index_cast %32 : i32 to index
    %c0_7 = arith.constant 0 : index
    %34 = vector.load %arg6[%c0_6, %33, %c0_7] : memref<1x64x16xbf16, #tpu.memory_space<vmem>>, vector<1x64x16xbf16>
    %35 = vector.shape_cast %34 : vector<1x64x16xbf16> to vector<64x16xbf16>
    %36 = vector.shape_cast %30 : vector<64x16xbf16> to vector<1x64x16xbf16>
    tpu.vector_store %arg6[%c0_6, %33, %c0_7], %36 {strides = array<i32>} : memref<1x64x16xbf16, #tpu.memory_space<vmem>>, vector<1x64x16xbf16>,
    %cst_8 = arith.constant dense<0.000000e+00> : vector<16xf32>
    %37 = vector.multi_reduction <add>, %29, %cst_8 [0] : vector<64x16xf32> to vector<16xf32>
    %38 = vector.shape_cast %37 : vector<16xf32> to vector<1x16xf32>
    %39 = arith.addf %1, %38 : vector<1x16xf32>
    %40 = arith.mulf %29, %29 : vector<64x16xf32>
    %cst_9 = arith.constant dense<0.000000e+00> : vector<16xf32>
    %41 = vector.multi_reduction <add>, %40, %cst_9 [0] : vector<64x16xf32> to vector<16xf32>
    %42 = vector.shape_cast %41 : vector<16xf32> to vector<1x16xf32>
    %43 = arith.addf %2, %42 : vector<1x16xf32>
    %c1_i32 = arith.constant 1 : i32
    %cst_10 = arith.constant 6.400000e+01 : f32
    %44 = vector.broadcast %cst_10 : f32 to vector<1x16xf32>
    %45 = arith.divf %39, %44 : vector<1x16xf32>
    %cst_11 = arith.constant 6.400000e+01 : f32
    %46 = vector.broadcast %cst_11 : f32 to vector<1x16xf32>
    %47 = arith.divf %43, %46 : vector<1x16xf32>
    %48 = arith.mulf %45, %45 : vector<1x16xf32>
    %49 = arith.subf %47, %48 : vector<1x16xf32>
    %cst_12 = arith.constant 0.000000e+00 : f32
    %50 = vector.broadcast %cst_12 : f32 to vector<1x16xf32>
    %51 = arith.maximumf %49, %50 : vector<1x16xf32>
    %c0_13 = arith.constant 0 : index
    %c0_14 = arith.constant 0 : index
    %52 = vector.load %arg4[%c0_13, %c0_14] : memref<1x16xf32, #tpu.memory_space<vmem>>, vector<1x16xf32>
    %cst_15 = arith.constant 9.99999974E-6 : f32
    %53 = vector.broadcast %cst_15 : f32 to vector<1x16xf32>
    %54 = arith.addf %51, %53 : vector<1x16xf32>
    %55 = math.rsqrt %54 : vector<1x16xf32>
    %56 = arith.mulf %52, %55 : vector<1x16xf32>
    %c0_16 = arith.constant 0 : index
    %c0_17 = arith.constant 0 : index
    %57 = vector.load %arg5[%c0_16, %c0_17] : memref<1x16xf32, #tpu.memory_space<vmem>>, vector<1x16xf32>
    %58 = arith.mulf %45, %56 : vector<1x16xf32>
    %59 = arith.subf %57, %58 : vector<1x16xf32>
    %c0_i32_18 = arith.constant 0 : i32
    %c64_i32_19 = arith.constant 64 : i32
    %60 = arith.muli %c0_i32_18, %c64_i32_19 : i32
    %61 = tpu.assume_multiple %60, 64 : i32
    %c0_20 = arith.constant 0 : index
    %62 = arith.index_cast %61 : i32 to index
    %c0_21 = arith.constant 0 : index
    %63 = vector.load %arg6[%c0_20, %62, %c0_21] : memref<1x64x16xbf16, #tpu.memory_space<vmem>>, vector<1x64x16xbf16>
    %64 = vector.shape_cast %63 : vector<1x64x16xbf16> to vector<64x16xbf16>
    %65 = arith.extf %64 : vector<64x16xbf16> to vector<64x16xf32>
    %66 = vector.broadcast %56 : vector<1x16xf32> to vector<64x16xf32>
    %67 = arith.mulf %65, %66 : vector<64x16xf32>
    %68 = vector.broadcast %59 : vector<1x16xf32> to vector<64x16xf32>
    %69 = arith.addf %67, %68 : vector<64x16xf32>
    %cst_22 = arith.constant 0.000000e+00 : f32
    %70 = vector.broadcast %cst_22 : f32 to vector<64x16xf32>
    %71 = arith.cmpf oge, %69, %70 : vector<64x16xf32>
    %cst_23 = arith.constant 2.000000e-01 : f32
    %72 = vector.broadcast %cst_23 : f32 to vector<64x16xf32>
    %73 = arith.mulf %72, %69 : vector<64x16xf32>
    %74 = arith.select %71, %69, %73 : vector<64x16xi1>, vector<64x16xf32>
    %75 = arith.truncf %74 : vector<64x16xf32> to vector<64x16xbf16>
    %c0_24 = arith.constant 0 : index
    %76 = arith.index_cast %61 : i32 to index
    %c0_25 = arith.constant 0 : index
    %77 = vector.load %arg6[%c0_24, %76, %c0_25] : memref<1x64x16xbf16, #tpu.memory_space<vmem>>, vector<1x64x16xbf16>
    %78 = vector.shape_cast %77 : vector<1x64x16xbf16> to vector<64x16xbf16>
    %79 = vector.shape_cast %75 : vector<64x16xbf16> to vector<1x64x16xbf16>
    tpu.vector_store %arg6[%c0_24, %76, %c0_25], %79 {strides = array<i32>} : memref<1x64x16xbf16, #tpu.memory_space<vmem>>, vector<1x64x16xbf16>,
    %c1_i32_26 = arith.constant 1 : i32
    return
  }
  func.func @transform_0(%arg0: i32, %arg1: i32) -> (i32, i32, i32, i32) {
    %c0_i32 = arith.constant 0 : i32
    %c0_i32_0 = arith.constant 0 : i32
    %c0_i32_1 = arith.constant 0 : i32
    %c0_i32_2 = arith.constant 0 : i32
    return %arg0, %c0_i32, %c0_i32_0, %c0_i32_1 : i32, i32, i32, i32
  }
  func.func @transform_1(%arg0: i32, %arg1: i32) -> (i32, i32) {
    %c0_i32 = arith.constant 0 : i32
    %c0_i32_0 = arith.constant 0 : i32
    return %c0_i32, %arg1 : i32, i32
  }
  func.func @transform_2(%arg0: i32, %arg1: i32) -> (i32, i32) {
    %c0_i32 = arith.constant 0 : i32
    %c0_i32_0 = arith.constant 0 : i32
    return %c0_i32, %arg1 : i32, i32
  }
  func.func @transform_3(%arg0: i32, %arg1: i32) -> (i32, i32) {
    %c0_i32 = arith.constant 0 : i32
    %c0_i32_0 = arith.constant 0 : i32
    return %c0_i32, %arg1 : i32, i32
  }
  func.func @transform_4(%arg0: i32, %arg1: i32) -> (i32, i32, i32) {
    %c0_i32 = arith.constant 0 : i32
    %c0_i32_0 = arith.constant 0 : i32
    return %arg0, %c0_i32, %arg1 : i32, i32, i32
  }
}

module attributes {stable_mosaic.version = 11 : i64} {
  func.func @_upblock_kernel(%arg0: i32, %arg1: i32, %arg2: memref<1x18x18x16xbf16, #tpu.memory_space<vmem>>, %arg3: memref<144x8xbf16, #tpu.memory_space<vmem>>, %arg4: memref<1x8xf32, #tpu.memory_space<vmem>>, %arg5: memref<1x8xf32, #tpu.memory_space<vmem>>, %arg6: memref<1x256x8xbf16, #tpu.memory_space<vmem>>) attributes {dimension_semantics = [#tpu.dimension_semantics<parallel>, #tpu.dimension_semantics<parallel>], iteration_bounds = array<i64: 2, 1>, scalar_prefetch = 0 : i64, scratch_operands = 0 : i64, tpu.core_type = #tpu.core_type<tc>, window_params = [{transform_indices = @transform_0, window_bounds = array<i64: 1, 18, 18, 16>}, {transform_indices = @transform_1, window_bounds = array<i64: 144, 8>}, {transform_indices = @transform_2, window_bounds = array<i64: 1, 8>}, {transform_indices = @transform_3, window_bounds = array<i64: 1, 8>}, {transform_indices = @transform_4, window_bounds = array<i64: 1, 256, 8>}]} {
    %c0 = arith.constant 0 : index
    %c0_0 = arith.constant 0 : index
    %0 = vector.load %arg3[%c0, %c0_0] : memref<144x8xbf16, #tpu.memory_space<vmem>>, vector<144x8xbf16>
    %cst = arith.constant 0.000000e+00 : f32
    %1 = vector.broadcast %cst : f32 to vector<1x8xf32>
    %cst_1 = arith.constant 0.000000e+00 : f32
    %2 = vector.broadcast %cst_1 : f32 to vector<1x8xf32>
    %c0_i32 = arith.constant 0 : i32
    %c16_i32 = arith.constant 16 : i32
    %3 = arith.muli %c0_i32, %c16_i32 : i32
    %4 = tpu.assume_multiple %3, 16 : i32
    %c0_2 = arith.constant 0 : index
    %5 = arith.index_cast %4 : i32 to index
    %c0_3 = arith.constant 0 : index
    %c0_4 = arith.constant 0 : index
    %6 = vector.load %arg2[%c0_2, %5, %c0_3, %c0_4] : memref<1x18x18x16xbf16, #tpu.memory_space<vmem>>, vector<1x18x18x16xbf16>
    %7 = vector.shape_cast %6 : vector<1x18x18x16xbf16> to vector<18x18x16xbf16>
    %8 = arith.extf %7 : vector<18x18x16xbf16> to vector<18x18x16xf32>
    %9 = vector.extract_strided_slice %8 {offsets = [0, 0, 0], sizes = [16, 16, 16], strides = [1, 1, 1]} : vector<18x18x16xf32> to vector<16x16x16xf32>
    %10 = arith.truncf %9 : vector<16x16x16xf32> to vector<16x16x16xbf16>
    %11 = vector.extract_strided_slice %8 {offsets = [0, 1, 0], sizes = [16, 16, 16], strides = [1, 1, 1]} : vector<18x18x16xf32> to vector<16x16x16xf32>
    %12 = arith.truncf %11 : vector<16x16x16xf32> to vector<16x16x16xbf16>
    %13 = vector.extract_strided_slice %8 {offsets = [0, 2, 0], sizes = [16, 16, 16], strides = [1, 1, 1]} : vector<18x18x16xf32> to vector<16x16x16xf32>
    %14 = arith.truncf %13 : vector<16x16x16xf32> to vector<16x16x16xbf16>
    %15 = vector.extract_strided_slice %8 {offsets = [1, 0, 0], sizes = [16, 16, 16], strides = [1, 1, 1]} : vector<18x18x16xf32> to vector<16x16x16xf32>
    %16 = arith.truncf %15 : vector<16x16x16xf32> to vector<16x16x16xbf16>
    %17 = vector.extract_strided_slice %8 {offsets = [1, 1, 0], sizes = [16, 16, 16], strides = [1, 1, 1]} : vector<18x18x16xf32> to vector<16x16x16xf32>
    %18 = arith.truncf %17 : vector<16x16x16xf32> to vector<16x16x16xbf16>
    %19 = vector.extract_strided_slice %8 {offsets = [1, 2, 0], sizes = [16, 16, 16], strides = [1, 1, 1]} : vector<18x18x16xf32> to vector<16x16x16xf32>
    %20 = arith.truncf %19 : vector<16x16x16xf32> to vector<16x16x16xbf16>
    %21 = vector.extract_strided_slice %8 {offsets = [2, 0, 0], sizes = [16, 16, 16], strides = [1, 1, 1]} : vector<18x18x16xf32> to vector<16x16x16xf32>
    %22 = arith.truncf %21 : vector<16x16x16xf32> to vector<16x16x16xbf16>
    %23 = vector.extract_strided_slice %8 {offsets = [2, 1, 0], sizes = [16, 16, 16], strides = [1, 1, 1]} : vector<18x18x16xf32> to vector<16x16x16xf32>
    %24 = arith.truncf %23 : vector<16x16x16xf32> to vector<16x16x16xbf16>
    %25 = vector.extract_strided_slice %8 {offsets = [2, 2, 0], sizes = [16, 16, 16], strides = [1, 1, 1]} : vector<18x18x16xf32> to vector<16x16x16xf32>
    %26 = arith.truncf %25 : vector<16x16x16xf32> to vector<16x16x16xbf16>
    %27 = tpu.concatenate %10, %12, %14, %16, %18, %20, %22, %24, %26 in 2 : vector<16x16x16xbf16>, vector<16x16x16xbf16>, vector<16x16x16xbf16>, vector<16x16x16xbf16>, vector<16x16x16xbf16>, vector<16x16x16xbf16>, vector<16x16x16xbf16>, vector<16x16x16xbf16>, vector<16x16x16xbf16> -> vector<16x16x144xbf16>
    %28 = vector.shape_cast %27 : vector<16x16x144xbf16> to vector<256x144xbf16>
    %cst_5 = arith.constant dense<0.000000e+00> : vector<256x8xf32>
    %29 = tpu.matmul %28, %0, %cst_5 {dimension_numbers = #tpu.dot_dimension_numbers<[1], [0], [0], [1], [0, 0, 1, 1], [], []>} : vector<256x144xbf16>, vector<144x8xbf16>, vector<256x8xf32> -> vector<256x8xf32>
    %30 = arith.truncf %29 : vector<256x8xf32> to vector<256x8xbf16>
    %c256_i32 = arith.constant 256 : i32
    %31 = arith.muli %c0_i32, %c256_i32 : i32
    %32 = tpu.assume_multiple %31, 256 : i32
    %c0_6 = arith.constant 0 : index
    %33 = arith.index_cast %32 : i32 to index
    %c0_7 = arith.constant 0 : index
    %34 = vector.load %arg6[%c0_6, %33, %c0_7] : memref<1x256x8xbf16, #tpu.memory_space<vmem>>, vector<1x256x8xbf16>
    %35 = vector.shape_cast %34 : vector<1x256x8xbf16> to vector<256x8xbf16>
    %36 = vector.shape_cast %30 : vector<256x8xbf16> to vector<1x256x8xbf16>
    tpu.vector_store %arg6[%c0_6, %33, %c0_7], %36 {strides = array<i32>} : memref<1x256x8xbf16, #tpu.memory_space<vmem>>, vector<1x256x8xbf16>,
    %cst_8 = arith.constant dense<0.000000e+00> : vector<8xf32>
    %37 = vector.multi_reduction <add>, %29, %cst_8 [0] : vector<256x8xf32> to vector<8xf32>
    %38 = vector.shape_cast %37 : vector<8xf32> to vector<1x8xf32>
    %39 = arith.addf %1, %38 : vector<1x8xf32>
    %40 = arith.mulf %29, %29 : vector<256x8xf32>
    %cst_9 = arith.constant dense<0.000000e+00> : vector<8xf32>
    %41 = vector.multi_reduction <add>, %40, %cst_9 [0] : vector<256x8xf32> to vector<8xf32>
    %42 = vector.shape_cast %41 : vector<8xf32> to vector<1x8xf32>
    %43 = arith.addf %2, %42 : vector<1x8xf32>
    %c1_i32 = arith.constant 1 : i32
    %cst_10 = arith.constant 2.560000e+02 : f32
    %44 = vector.broadcast %cst_10 : f32 to vector<1x8xf32>
    %45 = arith.divf %39, %44 : vector<1x8xf32>
    %cst_11 = arith.constant 2.560000e+02 : f32
    %46 = vector.broadcast %cst_11 : f32 to vector<1x8xf32>
    %47 = arith.divf %43, %46 : vector<1x8xf32>
    %48 = arith.mulf %45, %45 : vector<1x8xf32>
    %49 = arith.subf %47, %48 : vector<1x8xf32>
    %cst_12 = arith.constant 0.000000e+00 : f32
    %50 = vector.broadcast %cst_12 : f32 to vector<1x8xf32>
    %51 = arith.maximumf %49, %50 : vector<1x8xf32>
    %c0_13 = arith.constant 0 : index
    %c0_14 = arith.constant 0 : index
    %52 = vector.load %arg4[%c0_13, %c0_14] : memref<1x8xf32, #tpu.memory_space<vmem>>, vector<1x8xf32>
    %cst_15 = arith.constant 9.99999974E-6 : f32
    %53 = vector.broadcast %cst_15 : f32 to vector<1x8xf32>
    %54 = arith.addf %51, %53 : vector<1x8xf32>
    %55 = math.rsqrt %54 : vector<1x8xf32>
    %56 = arith.mulf %52, %55 : vector<1x8xf32>
    %c0_16 = arith.constant 0 : index
    %c0_17 = arith.constant 0 : index
    %57 = vector.load %arg5[%c0_16, %c0_17] : memref<1x8xf32, #tpu.memory_space<vmem>>, vector<1x8xf32>
    %58 = arith.mulf %45, %56 : vector<1x8xf32>
    %59 = arith.subf %57, %58 : vector<1x8xf32>
    %c0_i32_18 = arith.constant 0 : i32
    %c256_i32_19 = arith.constant 256 : i32
    %60 = arith.muli %c0_i32_18, %c256_i32_19 : i32
    %61 = tpu.assume_multiple %60, 256 : i32
    %c0_20 = arith.constant 0 : index
    %62 = arith.index_cast %61 : i32 to index
    %c0_21 = arith.constant 0 : index
    %63 = vector.load %arg6[%c0_20, %62, %c0_21] : memref<1x256x8xbf16, #tpu.memory_space<vmem>>, vector<1x256x8xbf16>
    %64 = vector.shape_cast %63 : vector<1x256x8xbf16> to vector<256x8xbf16>
    %65 = arith.extf %64 : vector<256x8xbf16> to vector<256x8xf32>
    %66 = vector.broadcast %56 : vector<1x8xf32> to vector<256x8xf32>
    %67 = arith.mulf %65, %66 : vector<256x8xf32>
    %68 = vector.broadcast %59 : vector<1x8xf32> to vector<256x8xf32>
    %69 = arith.addf %67, %68 : vector<256x8xf32>
    %cst_22 = arith.constant 0.000000e+00 : f32
    %70 = vector.broadcast %cst_22 : f32 to vector<256x8xf32>
    %71 = arith.cmpf oge, %69, %70 : vector<256x8xf32>
    %cst_23 = arith.constant 2.000000e-01 : f32
    %72 = vector.broadcast %cst_23 : f32 to vector<256x8xf32>
    %73 = arith.mulf %72, %69 : vector<256x8xf32>
    %74 = arith.select %71, %69, %73 : vector<256x8xi1>, vector<256x8xf32>
    %75 = arith.truncf %74 : vector<256x8xf32> to vector<256x8xbf16>
    %c0_24 = arith.constant 0 : index
    %76 = arith.index_cast %61 : i32 to index
    %c0_25 = arith.constant 0 : index
    %77 = vector.load %arg6[%c0_24, %76, %c0_25] : memref<1x256x8xbf16, #tpu.memory_space<vmem>>, vector<1x256x8xbf16>
    %78 = vector.shape_cast %77 : vector<1x256x8xbf16> to vector<256x8xbf16>
    %79 = vector.shape_cast %75 : vector<256x8xbf16> to vector<1x256x8xbf16>
    tpu.vector_store %arg6[%c0_24, %76, %c0_25], %79 {strides = array<i32>} : memref<1x256x8xbf16, #tpu.memory_space<vmem>>, vector<1x256x8xbf16>,
    %c1_i32_26 = arith.constant 1 : i32
    return
  }
  func.func @transform_0(%arg0: i32, %arg1: i32) -> (i32, i32, i32, i32) {
    %c0_i32 = arith.constant 0 : i32
    %c0_i32_0 = arith.constant 0 : i32
    %c0_i32_1 = arith.constant 0 : i32
    %c0_i32_2 = arith.constant 0 : i32
    return %arg0, %c0_i32, %c0_i32_0, %c0_i32_1 : i32, i32, i32, i32
  }
  func.func @transform_1(%arg0: i32, %arg1: i32) -> (i32, i32) {
    %c0_i32 = arith.constant 0 : i32
    %c0_i32_0 = arith.constant 0 : i32
    return %c0_i32, %arg1 : i32, i32
  }
  func.func @transform_2(%arg0: i32, %arg1: i32) -> (i32, i32) {
    %c0_i32 = arith.constant 0 : i32
    %c0_i32_0 = arith.constant 0 : i32
    return %c0_i32, %arg1 : i32, i32
  }
  func.func @transform_3(%arg0: i32, %arg1: i32) -> (i32, i32) {
    %c0_i32 = arith.constant 0 : i32
    %c0_i32_0 = arith.constant 0 : i32
    return %c0_i32, %arg1 : i32, i32
  }
  func.func @transform_4(%arg0: i32, %arg1: i32) -> (i32, i32, i32) {
    %c0_i32 = arith.constant 0 : i32
    %c0_i32_0 = arith.constant 0 : i32
    return %arg0, %c0_i32, %arg1 : i32, i32, i32
  }
}

module attributes {stable_mosaic.version = 11 : i64} {
  func.func @_final_conv_kernel(%arg0: i32, %arg1: memref<1x18x18x8xbf16, #tpu.memory_space<vmem>>, %arg2: memref<72x1xbf16, #tpu.memory_space<vmem>>, %arg3: memref<1x1xf32, #tpu.memory_space<vmem>>, %arg4: memref<1x256x1xf32, #tpu.memory_space<vmem>>) attributes {dimension_semantics = [#tpu.dimension_semantics<parallel>], iteration_bounds = array<i64: 2>, scalar_prefetch = 0 : i64, scratch_operands = 0 : i64, tpu.core_type = #tpu.core_type<tc>, window_params = [{transform_indices = @transform_0, window_bounds = array<i64: 1, 18, 18, 8>}, {pipeline_mode = #tpu.pipeline_mode<synchronous>, transform_indices = @transform_1, window_bounds = array<i64: 72, 1>}, {pipeline_mode = #tpu.pipeline_mode<synchronous>, transform_indices = @transform_2, window_bounds = array<i64: 1, 1>}, {transform_indices = @transform_3, window_bounds = array<i64: 1, 256, 1>}]} {
    %c0 = arith.constant 0 : index
    %c0_0 = arith.constant 0 : index
    %0 = vector.load %arg2[%c0, %c0_0] : memref<72x1xbf16, #tpu.memory_space<vmem>>, vector<72x1xbf16>
    %c0_1 = arith.constant 0 : index
    %c0_2 = arith.constant 0 : index
    %1 = vector.load %arg3[%c0_1, %c0_2] : memref<1x1xf32, #tpu.memory_space<vmem>>, vector<1x1xf32>
    %c0_i32 = arith.constant 0 : i32
    %c16_i32 = arith.constant 16 : i32
    %2 = arith.muli %c0_i32, %c16_i32 : i32
    %3 = tpu.assume_multiple %2, 16 : i32
    %c0_3 = arith.constant 0 : index
    %4 = arith.index_cast %3 : i32 to index
    %c0_4 = arith.constant 0 : index
    %c0_5 = arith.constant 0 : index
    %5 = vector.load %arg1[%c0_3, %4, %c0_4, %c0_5] : memref<1x18x18x8xbf16, #tpu.memory_space<vmem>>, vector<1x18x18x8xbf16>
    %6 = vector.shape_cast %5 : vector<1x18x18x8xbf16> to vector<18x18x8xbf16>
    %7 = arith.extf %6 : vector<18x18x8xbf16> to vector<18x18x8xf32>
    %8 = vector.extract_strided_slice %7 {offsets = [0, 0, 0], sizes = [16, 16, 8], strides = [1, 1, 1]} : vector<18x18x8xf32> to vector<16x16x8xf32>
    %9 = arith.truncf %8 : vector<16x16x8xf32> to vector<16x16x8xbf16>
    %10 = vector.extract_strided_slice %7 {offsets = [0, 1, 0], sizes = [16, 16, 8], strides = [1, 1, 1]} : vector<18x18x8xf32> to vector<16x16x8xf32>
    %11 = arith.truncf %10 : vector<16x16x8xf32> to vector<16x16x8xbf16>
    %12 = vector.extract_strided_slice %7 {offsets = [0, 2, 0], sizes = [16, 16, 8], strides = [1, 1, 1]} : vector<18x18x8xf32> to vector<16x16x8xf32>
    %13 = arith.truncf %12 : vector<16x16x8xf32> to vector<16x16x8xbf16>
    %14 = vector.extract_strided_slice %7 {offsets = [1, 0, 0], sizes = [16, 16, 8], strides = [1, 1, 1]} : vector<18x18x8xf32> to vector<16x16x8xf32>
    %15 = arith.truncf %14 : vector<16x16x8xf32> to vector<16x16x8xbf16>
    %16 = vector.extract_strided_slice %7 {offsets = [1, 1, 0], sizes = [16, 16, 8], strides = [1, 1, 1]} : vector<18x18x8xf32> to vector<16x16x8xf32>
    %17 = arith.truncf %16 : vector<16x16x8xf32> to vector<16x16x8xbf16>
    %18 = vector.extract_strided_slice %7 {offsets = [1, 2, 0], sizes = [16, 16, 8], strides = [1, 1, 1]} : vector<18x18x8xf32> to vector<16x16x8xf32>
    %19 = arith.truncf %18 : vector<16x16x8xf32> to vector<16x16x8xbf16>
    %20 = vector.extract_strided_slice %7 {offsets = [2, 0, 0], sizes = [16, 16, 8], strides = [1, 1, 1]} : vector<18x18x8xf32> to vector<16x16x8xf32>
    %21 = arith.truncf %20 : vector<16x16x8xf32> to vector<16x16x8xbf16>
    %22 = vector.extract_strided_slice %7 {offsets = [2, 1, 0], sizes = [16, 16, 8], strides = [1, 1, 1]} : vector<18x18x8xf32> to vector<16x16x8xf32>
    %23 = arith.truncf %22 : vector<16x16x8xf32> to vector<16x16x8xbf16>
    %24 = vector.extract_strided_slice %7 {offsets = [2, 2, 0], sizes = [16, 16, 8], strides = [1, 1, 1]} : vector<18x18x8xf32> to vector<16x16x8xf32>
    %25 = arith.truncf %24 : vector<16x16x8xf32> to vector<16x16x8xbf16>
    %26 = tpu.concatenate %9, %11, %13, %15, %17, %19, %21, %23, %25 in 2 : vector<16x16x8xbf16>, vector<16x16x8xbf16>, vector<16x16x8xbf16>, vector<16x16x8xbf16>, vector<16x16x8xbf16>, vector<16x16x8xbf16>, vector<16x16x8xbf16>, vector<16x16x8xbf16>, vector<16x16x8xbf16> -> vector<16x16x72xbf16>
    %27 = vector.shape_cast %26 : vector<16x16x72xbf16> to vector<256x72xbf16>
    %cst = arith.constant dense<0.000000e+00> : vector<256x1xf32>
    %28 = tpu.matmul %27, %0, %cst {dimension_numbers = #tpu.dot_dimension_numbers<[1], [0], [0], [1], [0, 0, 1, 1], [], []>} : vector<256x72xbf16>, vector<72x1xbf16>, vector<256x1xf32> -> vector<256x1xf32>
    %29 = vector.broadcast %1 : vector<1x1xf32> to vector<256x1xf32>
    %30 = arith.addf %28, %29 : vector<256x1xf32>
    %31 = math.tanh %30 : vector<256x1xf32>
    %c256_i32 = arith.constant 256 : i32
    %32 = arith.muli %c0_i32, %c256_i32 : i32
    %33 = tpu.assume_multiple %32, 256 : i32
    %c0_6 = arith.constant 0 : index
    %34 = arith.index_cast %33 : i32 to index
    %c0_7 = arith.constant 0 : index
    %35 = vector.load %arg4[%c0_6, %34, %c0_7] : memref<1x256x1xf32, #tpu.memory_space<vmem>>, vector<1x256x1xf32>
    %36 = vector.shape_cast %35 : vector<1x256x1xf32> to vector<256x1xf32>
    %37 = vector.shape_cast %31 : vector<256x1xf32> to vector<1x256x1xf32>
    tpu.vector_store %arg4[%c0_6, %34, %c0_7], %37 {strides = array<i32>} : memref<1x256x1xf32, #tpu.memory_space<vmem>>, vector<1x256x1xf32>,
    %c1_i32 = arith.constant 1 : i32
    return
  }
  func.func @transform_0(%arg0: i32) -> (i32, i32, i32, i32) {
    %c0_i32 = arith.constant 0 : i32
    %c0_i32_0 = arith.constant 0 : i32
    %c0_i32_1 = arith.constant 0 : i32
    %c0_i32_2 = arith.constant 0 : i32
    return %arg0, %c0_i32, %c0_i32_0, %c0_i32_1 : i32, i32, i32, i32
  }
  func.func @transform_1(%arg0: i32) -> (i32, i32) {
    %c0_i32 = arith.constant 0 : i32
    %c0_i32_0 = arith.constant 0 : i32
    %c0_i32_1 = arith.constant 0 : i32
    return %c0_i32, %c0_i32_0 : i32, i32
  }
  func.func @transform_2(%arg0: i32) -> (i32, i32) {
    %c0_i32 = arith.constant 0 : i32
    %c0_i32_0 = arith.constant 0 : i32
    %c0_i32_1 = arith.constant 0 : i32
    return %c0_i32, %c0_i32_0 : i32, i32
  }
  func.func @transform_3(%arg0: i32) -> (i32, i32, i32) {
    %c0_i32 = arith.constant 0 : i32
    %c0_i32_0 = arith.constant 0 : i32
    %c0_i32_1 = arith.constant 0 : i32
    return %arg0, %c0_i32, %c0_i32_0 : i32, i32, i32
  }
}

</mosaic_0001>

<bundles_post_ra>
// kernel: _lambda_.4
= control target key start
LH: loop header
LB: loop body
LE: loop exit
PB: predicated region body
PF: predicated region fallthrough
CT: control target
= control target key end

     0   :  { %9 = vsyncpa [#allocation3], 0  ;;  %s821_s0 = inlined_call_operand.vmem [shape: bf16[2,16], index: 0, kind: input, shape index: {}]   ;;  %s822_s1 = inlined_call_operand.hbm [shape: bf16[16,512], index: 1, kind: input, shape index: {}]   ;;  %s823_s2 = inlined_call_operand.vmem [shape: f32[1,512], index: 2, kind: input, shape index: {}]   ;;  %s824_s3 = inlined_call_operand.vmem [shape: f32[1,512], index: 3, kind: input, shape index: {}]   ;;  %s825_s4 = inlined_call_operand.vmem [shape: bf16[2,512], index: 4, kind: output, shape index: {}]  }
   0x1   :  { %11 = vsyncpa [#allocation3 + $0x1], 0  ;;  %s697_s15 = smov 0   ;;  %s699_s16 = smov 0  }
   0x2   :  { %s701_s17 = smov 0   ;;  %s703_s18 = smov 0  }
   0x3 LB: > { %s531_s19 = sadd.s32 4294967295, %s664_s18   ;;  %s717_s20 = sadd.s32 1, %s664_s18   ;;  %s664_s18 = sphi %s703_s18, %s833_s18   ;;  %s660_s17 = sphi %s701_s17, %s832_s17   ;;  %s656_s16 = sphi %s699_s16, %s831_s16   ;;  %s652_s15 = sphi %s697_s15, %s830_s15  }
   0x4   : > { %s42_s21 = ssub.s32 %s664_s18, %s717_s20  ;;  %s45_s22 = sadd.s32 1, %s660_s17 }
   0x5   : > { %p43_p0 = scmp.eq.s32.totalorder %s42_s21, 0  ;;  %p52_p1 = scmp.ne.s32.totalorder %s660_s17, %s656_s16 }
   0x6   : > { %p53_p2 = scmp.eq.s32.totalorder %s664_s18, 0  ;;  %p58_p3 = scmp.ne.s32.totalorder %s656_s16, %s652_s15 }
   0x7   : > { %s727_s23 = scalar_select %p43_p0, %s660_s17, %s45_s22  }
   0x8   : > { %p54_p4 = por %p53_p2, %p52_p1  ;;  %p59_p5 = scmp.eq.s32.totalorder %s531_s19, 0 }
   0x9   : > { %p557_p6 = scmp.lt.s32.totalorder %s664_s18, 2  ;;  %s163_s25 = sand.u32 1, %s660_s17  }
   0xa   : > { %p732_p7 = por %p59_p5, %p58_p3  ;;  %s535_s26 = sshll.u32 %s163_s25, 4 }
   0xb   : > { %s550_s27 = sshll.u32 %s664_s18, 7  ;;  %s167_s5 = scalar_lea.vmem [#allocation2], %s535_s26 }
   0xc   : > { %s827_s24 = scalar_select %p732_p7, 1, 0 }
   0xd   : > { %s741_s30 = scalar_lea.hbm %s822_s1, %s550_s27  ;;  %s174_s6 = sshll.u32 %s167_s5, 4  ;;  %s743_s6 = int_to_ptr.vmem [resolvable:$true] %s174_s6 }
   0xe   : > { %p745_p8 = pnand %p557_p6, %p54_p4  ;;  %s749_s8 = scalar_lea.sflag [#allocation3], %s163_s25 }
   0xf   : > { %s602_s9 = scalar_lea.hbm %s741_s30, 256  ;;  %s607_s12 = scalar_lea.hbm %s822_s1, 512 }
  0x10   : > { %p603_p9 = scmp.ne.s32.totalorder %s741_s30, %s602_s9  ;;  %p604_p10 = pneg %p745_p8 }
  0x11   : > { %p608_p13 = scmp.lt.s32.totalorder %s741_s30, %s822_s1  ;;  %p609_p0 = scmp.lt.s32.totalorder %s607_s12, %s602_s9 }
  0x12   : > { %p605_p11 = pnand %p604_p10, %p603_p9 }
  0x13   : > { %p610_p1 = por %p609_p0, %p608_p13 }
  0x14   : > { %p606_p12 = pneg %p605_p11 }
  0x16   : > { %p611_p2 = pnand %p610_p1, %p606_p12 }
  0x18   : > { %614 = shalt.err (!%p611_p2)
}
  0x19   : > { %s615_s15 = scalar_lea.vmem %s743_s6, 256  ;;  %s666_s21 = smov [#allocation2]  }
  0x1a   : > { %p616_p3 = scmp.ne.s32.totalorder %s743_s6, %s615_s15  ;;  %s620_s22 = sshll.u32 %s666_s21, 4  ;;  %s621_s22 = int_to_ptr.vmem [resolvable:$false] %s620_s22 }
  0x1b   : > { %s622_s25 = scalar_lea.vmem %s621_s22, 512  ;;  %p623_p6 = scmp.lt.s32.totalorder %s743_s6, %s621_s22 }
  0x1c   : > { %p618_p4 = pnand %p616_p3, %p604_p10  ;;  %p624_p9 = scmp.lt.s32.totalorder %s622_s25, %s615_s15 }
  0x1e   : > { %p619_p5 = pneg %p618_p4  ;;  %p625_p11 = por %p624_p9, %p623_p6 }
  0x20   : > { %p626_p7 = pnand %p625_p11, %p619_p5 }
  0x22   : > { %629 = shalt.err (!%p626_p7)
}
  0x23   : > { %s667_s26 = smov 256   ;;  %s668_s27 = smov 128  }
  0x24   : > { %s669_s28 = smov 8   ;;  %p538_p10 = scmp.ge.s32.totalorder %s664_s18, 1 }
  0x25   : > { %556 = dma.hbm_to_vmem [thread:$0]  (!%p745_p8), %s741_s30, 256, %s743_s6, %s749_s8, %s667_s26, %s668_s27, %s669_s28  }
  0x26   : > { %p198_p12 = scmp.lt.s32.totalorder %s664_s18, 3 }
  0x28   : > { %p199_p13 = pnand %p538_p10, %p198_p12 }
  0x29   : > { %s204_s29 = sand.u32 (!%p199_p13), 1, %s656_s16   ;;  %p829_p7 = scmp.ne.s32.totalorder (!%p199_p13), %s827_s24, 0 }
  0x2a   : > { %202 = sbr.rel (%p199_p13) target bundleno = 316 (0x13c), region = 36  ;;  %s539_s5 = sshll.u32 (!%p199_p13), %s204_s29, 4 }
  0x2b   : > { %s205_s9 = scalar_lea.sflag (!%p199_p13), [#allocation3], %s204_s29  ;;  %s208_s10 = scalar_lea.vmem (!%p199_p13), [#allocation2], %s539_s5 }
  0x2f   : > { %647 = dma.done.wait (%p829_p7), %s205_s9, 256  }
  0x30   : > { %649 = vsyncadd (%p829_p7), %s205_s9, 4294967040  ;;  %v670_v0 = vmov 0   ;;  %v595_v1 = vld [vmem:[%s208_s10 + $0x4] ss:$8 sps:$4 sm:$0xff]   ;;  %v597_v2 = vld [vmem:[%s208_s10] ss:$8 sps:$4 sm:$0xff]   ;;  %v368_v52 = vlaneseq }
  0x31   : > { %306 = vmatprep.mubr.bf16.mxu0 %v670_v0  ;;  %288 = vmatprep.subr.bf16.mxu0 %v595_v1  ;;  %v257_v3 = vld [vmem:[%s821_s0] sm:$0x1]  ;;  %vm270_vm0 = vcmask 130048   ;;  %vm315_vm1 = vcmask 1041408   ;;  %s540_s24 = sshll.u32 %s531_s19, 1 }
  0x32   : > { %289 = vmatpush1.bf16.msra.mxu0 %v597_v2  ;;  %v671_v50 = vmov 1966171168   ;;  %p242_p8 = scmp.lt.s32.totalorder %s540_s24, 3  ;;  %v369_v54 = vshrl.u32 %v368_v52, 7 }
  0x33   : > { %v366_v51 = vunpack.c.l.s4 %v671_v50 }
  0x34   : > { %s835_s24 = smov (!%p242_p8, %s540_s24), 3  ;;  %v385_v62 = vsub.s32 0, %v369_v54  ;;  %v389_v63 = vsub.s32 1, %v369_v54 }
  0x35   : > { %545 = vmatmul.mubr.msk.bf16.vlgmr.msra.gmra.mxu0 %vm270_vm0, %v257_v3  ;;  %v367_v53 = vunpack.c.0.s8 %v366_v51  ;;  %s244_s11 = scalar_lea.vmem %s823_s2, %s835_s24  ;;  %s249_s12 = scalar_lea.vmem %s824_s3, %s835_s24 }
  0x36   : > { %v357_v60 = vld [vmem:[%s244_s11] sm:$0x3]  ;;  %s254_s15 = scalar_lea.vmem %s825_s4, %s835_s24 }
  0x37   : > { %v370_v56 = vsub.s32 %v367_v53, %v369_v54 }
  0xf5   : > { %v780_v4 = vpop.f32.mrf.mxu0 }
  0xf6   : > { %v316_v5 = vsel %vm315_vm1, %v780_v4, 0.0  ;;  %v330_v6 = vmul.f32 %v780_v4, %v780_v4 }
  0xf7   : > { %v317_v7 = vrot.slane %v316_v5, 4  ;;  %v785_v8 = vpop.f32.mrf.mxu0 }
  0xf8   : > { %v332_v9 = vsel %vm315_vm1, %v330_v6, 0.0  ;;  %v323_v10 = vsel %vm315_vm1, %v785_v8, 0.0  ;;  %v331_v11 = vmul.f32 %v785_v8, %v785_v8 }
  0xf9   : > { %v318_v12 = vadd.f32 %v317_v7, %v316_v5  ;;  %v333_v13 = vrot.slane %v332_v9, 4  ;;  %v324_v14 = vrot.slane %v323_v10, 4  ;;  %v312_v15 = vpop.f32.mrf.mxu0 }
  0xfa   : > { %v339_v16 = vsel %vm315_vm1, %v331_v11, 0.0 }
  0xfb   : > { %v319_v17 = vrot.slane %v318_v12, 2  ;;  %v334_v18 = vadd.f32 %v333_v13, %v332_v9  ;;  %v325_v19 = vadd.f32 %v324_v14, %v323_v10  ;;  %v340_v20 = vrot.slane %v339_v16, 4  ;;  %v313_v21 = vpop.f32.mrf.mxu0  ;;  %v381_v9 = vld [vmem:[%s249_s12] sm:$0x3] }
  0xfd   : > { %v320_v22 = vadd.f32 %v319_v17, %v318_v12  ;;  %v335_v23 = vrot.slane %v334_v18, 2  ;;  %v326_v24 = vrot.slane %v325_v19, 2  ;;  %v341_v25 = vadd.f32 %v340_v20, %v339_v16 }
  0xff   : > { %v321_v26 = vrot.slane %v320_v22, 1  ;;  %v336_v27 = vadd.f32 %v335_v23, %v334_v18  ;;  %v327_v28 = vadd.f32 %v326_v24, %v325_v19  ;;  %v342_v29 = vrot.slane %v341_v25, 2 }
 0x101   : > { %v322_v30 = vadd.f32 %v321_v26, %v320_v22  ;;  %v337_v31 = vrot.slane %v336_v27, 1  ;;  %v328_v32 = vrot.slane %v327_v28, 1  ;;  %v343_v33 = vadd.f32 %v342_v29, %v341_v25 }
 0x103   : > { %v338_v34 = vadd.f32 %v337_v31, %v336_v27  ;;  %v347_v35 = vmul.f32 0.5, %v322_v30  ;;  %v329_v36 = vadd.f32 %v328_v32, %v327_v28  ;;  %v344_v37 = vrot.slane %v343_v33, 1 }
 0x105   : > { %v349_v38 = vmul.f32 0.5, %v338_v34  ;;  %v351_v39 = vmul.f32 %v347_v35, %v347_v35  ;;  %v345_v40 = vadd.f32 %v344_v37, %v343_v33  ;;  %v348_v41 = vmul.f32 0.5, %v329_v36 }
 0x107   : > { %v353_v42 = vsub.f32 %v349_v38, %v351_v39  ;;  %v350_v43 = vmul.f32 0.5, %v345_v40  ;;  %v352_v44 = vmul.f32 %v348_v41, %v348_v41 }
 0x109   : > { %v355_v45 = vmax.f32 %v353_v42, 0.0  ;;  %v354_v46 = vsub.f32 %v350_v43, %v352_v44 }
 0x10b   : > { %v358_v47 = vadd.f32 1e-05, %v355_v45  ;;  %v356_v48 = vmax.f32 %v354_v46, 0.0 }
 0x10d   : > { %v359_v49 = vadd.f32 1e-05, %v356_v48  ;;  %598 = vrsqrt.f32 %v358_v47 }
 0x10f   : > { %600 = vrsqrt.f32 %v359_v49 }
 0x11a   : > { %v599_v55 = vpop.eup %598 }
 0x11c   : > { %v601_v57 = vpop.eup %600 }
 0x11d   : > { %v364_v58 = vcombine.low %v599_v55, %v601_v57 }
 0x11f   : > { %v371_v59 = vrot.slane %v364_v58, %v370_v56 }
 0x121   : > { %v378_v61 = vrot.slane %v371_v59, %v370_v56 }
 0x123   : > { %v380_v0 = vmul.f32 %v378_v61, %v357_v60 }
 0x125   : > { %v386_v1 = vrot.slane %v380_v0, %v385_v62  ;;  %v390_v2 = vrot.slane %v380_v0, %v389_v63 }
 0x127   : > { %v393_v3 = vmul.f32 %v386_v1, %v347_v35  ;;  %v394_v5 = vmul.f32 %v390_v2, %v348_v41  ;;  %v414_v12 = vmul.f32 %v386_v1, %v780_v4  ;;  %v415_v13 = vmul.f32 %v390_v2, %v785_v8 }
 0x129   : > { %v397_v6 = vcombine.low %v393_v3, %v394_v5 }
 0x12b   : > { %v404_v7 = vrot.slane %v397_v6, %v370_v56 }
 0x12d   : > { %v411_v10 = vrot.slane %v404_v7, %v370_v56 }
 0x12f   : > { %v413_v11 = vsub.f32 %v381_v9, %v411_v10 }
 0x131   : > { %v420_v14 = vrot.slane %v413_v11, %v385_v62  ;;  %v424_v15 = vrot.slane %v413_v11, %v389_v63 }
 0x133   : > { %v427_v16 = vadd.f32 %v420_v14, %v414_v12  ;;  %v428_v17 = vadd.f32 %v424_v15, %v415_v13 }
 0x135   : > { %v429_v18 = vmax.f32 %v427_v16, 0.0  ;;  %v430_v19 = vmax.f32 %v428_v17, 0.0 }
 0x137   : > { %v546_v20 = vpack.c.bf16 %v430_v19, %v429_v18 }
 0x139   : > { %v442_v21 = vrot.slane %v546_v20, %v370_v56 }
 0x13b   : > { %547 = vst.sshfl [vmem:[%s254_s15] sm:$0x5 pattern:$0x73625140] %v442_v21 }
 0x13c PF: > { %p14_p0 = scmp.ge.s32.totalorder %s717_s20, 4   ;;  %s830_s15 = smov %s656_s16 }
 0x13d   : > { %s831_s16 = smov %s660_s17  ;;  %s832_s17 = smov %s727_s23 }
 0x13e   : > { %s833_s18 = smov %s717_s20  ;;  %16 = sbr.rel (!%p14_p0) target bundleno = 3 (0x3), region = 82 }
 0x143   :  { %472 = vsyncpa [#allocation3], 1 }
 0x144   :  { %474 = vsyncpa [#allocation3 + $0x1], 1 }

// kernel: _lambda_.5
= control target key start
LH: loop header
LB: loop body
LE: loop exit
PB: predicated region body
PF: predicated region fallthrough
CT: control target
= control target key end

     0   :  { %s1628_s15 = smov 0   ;;  %s1630_s16 = smov 0   ;;  %s2068_s0 = inlined_call_operand.vmem [shape: bf16[2,10,10,32], index: 0, kind: input, shape index: {}]   ;;  %s2069_s1 = inlined_call_operand.vmem [shape: bf16[288,16], index: 1, kind: input, shape index: {}]   ;;  %s2070_s2 = inlined_call_operand.vmem [shape: f32[1,16], index: 2, kind: input, shape index: {}]   ;;  %s2071_s3 = inlined_call_operand.vmem [shape: f32[1,16], index: 3, kind: input, shape index: {}]   ;;  %s2072_s4 = inlined_call_operand.vmem [shape: bf16[2,64,16], index: 4, kind: output, shape index: {}]  }
   0x1   :  { %s1632_s17 = smov 0  }
   0x2 LB: > { %s26_s18 = sadd.s32 1, %s1594_s16  ;;  %p1322_p0 = scmp.ge.s32.totalorder %s1598_s17, 1  ;;  %s1598_s17 = sphi %s1632_s17, %s14_s17   ;;  %s1594_s16 = sphi %s1630_s16, %s2074_s16   ;;  %s1590_s15 = sphi %s1628_s15, %s2073_s15  }
   0x3   : > { %p28_p1 = scmp.ge.s32.totalorder %s26_s18, 2  ;;  %p201_p2 = scmp.lt.s32.totalorder %s1598_s17, 3 }
   0x5   : > { %s2076_s18 = smov (%p28_p1, %s26_s18), 0  ;;  %p202_p3 = pnand %p1322_p0, %p201_p2 }
   0x6   : > { %p240_p4 = scmp.lt.s32.totalorder (!%p202_p3), %s1590_s15, 1  ;;  %s1600_s9 = smov (!%p202_p3), 64  }
   0x7   : > { %205 = sbr.rel (%p202_p3) target bundleno = 498 (0x1f2), region = 36  ;;  %s1601_s14 = smov (!%p202_p3), 32  }
   0x8   : > { %s1602_s11 = smov (!%p202_p3), 96  }
   0xc   : > { %v1555_v0 = vld [vmem:[%s2069_s1 + $0x78] sm:$0xff]   ;;  %s2078_s15 = smov (!%p240_p4, %s1590_s15), 1  ;;  %v1557_v2 = vld [vmem:[%s2069_s1 + $0x70] sm:$0xff]   ;;  %v1559_v4 = vld [vmem:[%s2069_s1 + $0x68] sm:$0xff]   ;;  %vm558_vm0 = vcmask 261120   ;;  %vm583_vm1 = vcmask 523264  }
   0xd   : > { %v1556_v1 = vld [vmem:[%s2069_s1 + $0x38] sm:$0xff]   ;;  %1434 = vmatprep.subr.bf16.mxu0 %v1555_v0  ;;  %1492 = vmatprep.subr.bf16.mxu1 %v1555_v0  ;;  %s1508_s25 = smul.u32 80, %s2078_s15  ;;  %v1558_v3 = vld [vmem:[%s2069_s1 + $0x30] sm:$0xff]   ;;  %v1560_v7 = vld [vmem:[%s2069_s1 + $0x28] sm:$0xff]   ;;  %vm600_vm2 = vcmask 785408   ;;  %vm1015_vm3 = vcmask 125952  }
   0xe   : > { %1435 = vmatpush3.bf16.msra.mxu0 %v1556_v1  ;;  %1500 = vmatpush3.bf16.msra.mxu1 %v1556_v1  ;;  %v1561_v23 = vld [vmem:[%s2069_s1 + $0x60] sm:$0xff]   ;;  %v1564_v33 = vld [vmem:[%s2069_s1 + $0x58] sm:$0xff]   ;;  %v1566_v46 = vld [vmem:[%s2069_s1 + $0x50] sm:$0xff]   ;;  %vm1024_vm4 = vcmask 130048  }
   0xf   : > { %1436 = vmatprep.subr.bf16.mxu0 %v1557_v2  ;;  %1493 = vmatprep.subr.bf16.mxu1 %v1557_v2  ;;  %s1667_s6 = scalar_lea.vmem %s2068_s0, %s1508_s25  ;;  %v1563_v24 = vld [vmem:[%s2069_s1 + $0x20] sm:$0xff]   ;;  %v1565_v41 = vld [vmem:[%s2069_s1 + $0x18] sm:$0xff]   ;;  %v1567_v51 = vld [vmem:[%s2069_s1 + $0x10] sm:$0xff]  }
  0x10   : > { %v309_v5 = vld [vmem:[%s1667_s6 + $0x18] sm:$0xf]  ;;  %v307_v6 = vld [vmem:[%s1667_s6 + $0x10] sm:$0xf]  ;;  %v308_v9 = vld [vmem:[%s1667_s6 + $0x14] sm:$0x1] }
  0x11   : > { %v1674_v8 = vcombine.low %v309_v5, %v309_v5  ;;  %v1677_v10 = vcombine.low %v307_v6, %v307_v6  ;;  %v1680_v11 = vld [vmem:[%s1667_s6 + $0x8] sm:$0xf]  ;;  %v306_v12 = vld [vmem:[%s1667_s6 + $0xc] sm:$0x1]  ;;  %v1687_v14 = vld [vmem:[%s1667_s6 + $0x40] sm:$0xf]  ;;  %v1696_v18 = vcombine.low %v307_v6, %v308_v9 }
  0x12   : > { %1437 = vmatpush3.bf16.msra.mxu0 %v1558_v3  ;;  %1501 = vmatpush3.bf16.msra.mxu1 %v1558_v3  ;;  %v1684_v13 = vcombine.low %v1680_v11, %v306_v12  ;;  %v320_v15 = vld [vmem:[%s1667_s6 + $0x44] sm:$0x1]  ;;  %v1691_v16 = vld [vmem:[%s1667_s6] sm:$0xf]  ;;  %v310_v17 = vld [vmem:[%s1667_s6 + $0x1c] sm:$0x1]  ;;  %v1795_v6 = vcombine.low %v1680_v11, %v1680_v11  ;;  %v1342_v9 = vcombine.low %v1687_v14, %v1687_v14 }
  0x13   : > { %1438 = vmatprep.subr.bf16.mxu0 %v1559_v4  ;;  %1494 = vmatprep.subr.bf16.mxu1 %v1559_v4  ;;  %v1701_v19 = vcombine.low %v1687_v14, %v320_v15  ;;  %v304_v20 = vld [vmem:[%s1667_s6 + $0x4] sm:$0x1]  ;;  %v1712_v25 = vcombine.low %v309_v5, %v310_v17  ;;  %v1715_v27 = vld [vmem:[%s1667_s6 + $0x38] sm:$0xf]  ;;  %v318_v28 = vld [vmem:[%s1667_s6 + $0x3c] sm:$0x1] }
  0x14   : > { %519 = vrot.lane.b32.xlu1 %v1674_v8, %s1600_s9  ;;  %517 = vrot.lane.b32.xlu0 %v1677_v10, %s1600_s9  ;;  %v444_v21 = vrot.slane %v1684_v13, 1  ;;  %v1334_v22 = vcombine.low %v1691_v16, %v304_v20  ;;  %v1722_v30 = vrot.slane %v1696_v18, 1  ;;  %v373_v32 = vshll.u32 %v1684_v13, 16  ;;  %v1729_v35 = vld [vmem:[%s1667_s6 + $0x30] sm:$0xf]  ;;  %v1568_v56 = vld [vmem:[%s2069_s1 + $0x48] sm:$0xff]  }
  0x15   : > { %v499_v29 = vrot.slane %v1701_v19, 1  ;;  %v316_v36 = vld [vmem:[%s1667_s6 + $0x34] sm:$0x1]  ;;  %v1341_v37 = vcombine.low %v1715_v27, %v318_v28  ;;  %v371_v39 = vshrl.u32 %v1684_v13, 16  ;;  %v387_v40 = vshll.u32 %v1712_v25, 16  ;;  %v1569_v57 = vld [vmem:[%s2069_s1 + $0x8] sm:$0xff]  }
  0x16   : > { %1439 = vmatpush3.bf16.msra.mxu0 %v1560_v7  ;;  %1502 = vmatpush3.bf16.msra.mxu1 %v1560_v7  ;;  %v366_v26 = vshll.u32 %v1334_v22, 16  ;;  %v364_v31 = vshrl.u32 %v1334_v22, 16  ;;  %v443_v38 = vrot.slane %v1334_v22, 1  ;;  %v375_v43 = vrot.slane %v373_v32, 1  ;;  %v1570_v0 = vld [vmem:[%s2069_s1 + $0x40] sm:$0xff]   ;;  %v1812_v14 = vld [vmem:[%s2069_s1 + $0x88] sm:$0xff]  }
  0x17   : > { %1440 = vmatprep.subr.bf16.mxu0 %v1561_v23  ;;  %1495 = vmatprep.subr.bf16.mxu1 %v1561_v23  ;;  %v380_v44 = vshll.u32 %v1696_v18, 16  ;;  %v1340_v45 = vcombine.low %v1729_v35, %v316_v36  ;;  %v385_v47 = vshrl.u32 %v1712_v25, 16  ;;  %v1749_v48 = vrot.slane %v1341_v37, 1  ;;  %v1571_v1 = vld [vmem:[%s2069_s1] sm:$0xff]   ;;  %v322_v4 = vld [vmem:[%s1667_s6 + $0x4c] sm:$0x1] }
  0x18   : > { %453 = vrot.lane.b32.xlu1 %v444_v21, %s1600_s9  ;;  %500 = vrot.lane.b32.xlu0 %v444_v21, %s1601_s14  ;;  %v368_v34 = vrot.slane %v366_v26, 1  ;;  %v378_v49 = vshrl.u32 %v1696_v18, 16  ;;  %v389_v50 = vrot.slane %v387_v40, 1  ;;  %v1757_v52 = vor.u32 %v375_v43, %v371_v39  ;;  %v321_v5 = vld [vmem:[%s1667_s6 + $0x48] sm:$0xf] }
  0x19   : > { %v382_v53 = vrot.slane %v380_v44, 1  ;;  %v408_v54 = vshll.u32 %v1340_v45, 16  ;;  %v415_v55 = vshll.u32 %v1341_v37, 16  ;;  %v406_v58 = vshrl.u32 %v1340_v45, 16  ;;  %v311_v26 = vld [vmem:[%s1667_s6 + $0x20] sm:$0xf] }
  0x1a   : > { %1441 = vmatpush3.bf16.msra.mxu0 %v1563_v24  ;;  %1503 = vmatpush3.bf16.msra.mxu1 %v1563_v24  ;;  %v369_v42 = vor.u32 %v368_v34, %v364_v31  ;;  %v413_v59 = vshrl.u32 %v1341_v37, 16  ;;  %v1771_v61 = vor.u32 %v389_v50, %v385_v47  ;;  %v1345_v7 = vcombine.low %v321_v5, %v322_v4  ;;  %v312_v28 = vld [vmem:[%s1667_s6 + $0x24] sm:$0x1]  ;;  %v314_v34 = vld [vmem:[%s1667_s6 + $0x2c] sm:$0x1] }
  0x1b   : > { %1442 = vmatprep.subr.bf16.mxu0 %v1564_v33  ;;  %1496 = vmatprep.subr.bf16.mxu1 %v1564_v33  ;;  %v1769_v60 = vor.u32 %v382_v53, %v378_v49  ;;  %v410_v62 = vrot.slane %v408_v54, 1  ;;  %v417_v63 = vrot.slane %v415_v55, 1  ;;  %v1344_v12 = vcombine.low %v321_v5, %v321_v5  ;;  %v313_v37 = vld [vmem:[%s1667_s6 + $0x28] sm:$0xf] }
  0x1c   : > { %514 = vrot.lane.b32.xlu1 %v499_v29, %s1601_s14  ;;  %502 = vrot.lane.b32.xlu0 %v1722_v30, %s1601_s14  ;;  %v494_v13 = vshll.u32 %v1701_v19, 16  ;;  %v536_v15 = vshll.u32 %v1345_v7, 16  ;;  %v1804_v17 = vrot.slane %v1340_v45, 1  ;;  %v492_v11 = vshrl.u32 %v1701_v19, 16 }
  0x1d   : > { %v1783_v2 = vor.u32 %v410_v62, %v406_v58  ;;  %v1785_v3 = vor.u32 %v417_v63, %v413_v59  ;;  %v534_v20 = vshrl.u32 %v1345_v7, 16  ;;  %v1822_v24 = vrot.slane %v1712_v25, 1 }
  0x1e   : > { %1443 = vmatpush3.bf16.msra.mxu0 %v1565_v41  ;;  %1504 = vmatpush3.bf16.msra.mxu1 %v1565_v41  ;;  %v496_v18 = vrot.slane %v494_v13, 1  ;;  %v538_v21 = vrot.slane %v536_v15, 1  ;;  %v1833_v32 = vcombine.low %v1715_v27, %v1715_v27  ;;  %v1338_v33 = vcombine.low %v311_v26, %v312_v28 }
  0x1f   : > { %1444 = vmatprep.subr.bf16.mxu0 %v1566_v46  ;;  %1497 = vmatprep.subr.bf16.mxu1 %v1566_v46  ;;  %v1348_v31 = vcombine.low %v1722_v30, %v1822_v24  ;;  %v557_v36 = vrot.slane %v1345_v7, 1  ;;  %v1339_v27 = vcombine.low %v313_v37, %v314_v34  ;;  %v1856_v40 = vcombine.low %v311_v26, %v311_v26 }
  0x20   : > { %451 = vrot.lane.b32.xlu0 %v443_v38, %s1600_s9  ;;  %419 = vrot.lane.b32.xlu1 %v369_v42, %s1601_s14  ;;  %v1819_v22 = vor.u32 %v496_v18, %v492_v11  ;;  %v539_v23 = vor.u32 %v538_v21, %v534_v20  ;;  %v1838_v25 = vrot.slane %v1338_v33, 1  ;;  %v1354_v38 = vcombine.low %v1804_v17, %v1749_v48 }
  0x21   : > { %v1850_v39 = vcombine.low %v499_v29, %v557_v36  ;;  %v1858_v41 = vcombine.low %v313_v37, %v313_v37  ;;  %v394_v42 = vshll.u32 %v1338_v33, 16  ;;  %v401_v43 = vshll.u32 %v1339_v27, 16 }
  0x22   : > { %1445 = vmatpush3.bf16.msra.mxu0 %v1567_v51  ;;  %1505 = vmatpush3.bf16.msra.mxu1 %v1567_v51  ;;  %v392_v19 = vshrl.u32 %v1338_v33, 16  ;;  %v399_v44 = vshrl.u32 %v1339_v27, 16  ;;  %v1880_v49 = vrot.slane %v1339_v27, 1  ;;  %v1332_v50 = vcombine.low %v1729_v35, %v1729_v35 }
  0x23   : > { %1446 = vmatprep.subr.bf16.mxu0 %v1568_v56  ;;  %1498 = vmatprep.subr.bf16.mxu1 %v1568_v56  ;;  %v396_v29 = vrot.slane %v394_v42, 1  ;;  %v403_v45 = vrot.slane %v401_v43, 1 }
  0x24   : > { %512 = vrot.lane.b32.xlu0 %v1749_v48, %s1601_s14  ;;  %421 = vrot.lane.b32.xlu1 %v1757_v52, %s1601_s14 }
  0x25   : > { %v1868_v46 = vor.u32 %v396_v29, %v392_v19  ;;  %v1870_v47 = vor.u32 %v403_v45, %v399_v44 }
  0x26   : > { %1447 = vmatpush3.bf16.msra.mxu0 %v1569_v57  ;;  %1506 = vmatpush3.bf16.msra.mxu1 %v1569_v57 }
  0x27   : > { %1448 = vmatprep.subr.bf16.mxu0 %v1570_v0  ;;  %1499 = vmatprep.subr.bf16.mxu1 %v1570_v0 }
  0x28   : > { %540 = vrot.lane.b32.xlu0 %v1769_v60, %s1602_s11  ;;  %542 = vrot.lane.b32.xlu1 %v1771_v61, %s1602_s11 }
  0x2a   : > { %1449 = vmatpush3.bf16.msra.mxu0 %v1571_v1  ;;  %1507 = vmatpush3.bf16.msra.mxu1 %v1571_v1 }
  0x2b   : > { %1480 = vmatprep.subr.bf16.mxu1 %v1812_v14 }
  0x2c   : > { %431 = vrot.lane.b32.xlu0 %v1783_v2, %s1601_s14  ;;  %433 = vrot.lane.b32.xlu1 %v1785_v3, %s1601_s14 }
  0x30   : > { %475 = vrot.lane.b32.xlu0 %v1795_v6, %s1602_s11  ;;  %477 = vrot.lane.b32.xlu1 %v1677_v10, %s1602_s11 }
  0x34   : > { %529 = vrot.lane.b32.xlu0 %v1342_v9, %s1600_s9  ;;  %531 = vrot.lane.b32.xlu1 %v1344_v12, %s1600_s9 }
  0x38   : > { %463 = vrot.lane.b32.xlu0 %v1804_v17, %s1600_s9  ;;  %465 = vrot.lane.b32.xlu1 %v1749_v48, %s1600_s9 }
  0x3c   : > { %552 = vrot.lane.b32.xlu0 %v1819_v22, %s1602_s11  ;;  %554 = vrot.lane.b32.xlu1 %v539_v23, %s1602_s11 }
  0x40   : > { %487 = vrot.lane.b32.xlu0 %v1833_v32, %s1602_s11  ;;  %489 = vrot.lane.b32.xlu1 %v1342_v9, %s1602_s11  ;;  %v1326_v9 = vcombine.low %v1691_v16, %v1691_v16 }
  0x44   : > { %504 = vrot.lane.b32.xlu0 %v1822_v24, %s1601_s14  ;;  %506 = vrot.lane.b32.xlu1 %v1838_v25, %s1601_s14 }
  0x48   : > { %423 = vrot.lane.b32.xlu0 %v1769_v60, %s1601_s14  ;;  %425 = vrot.lane.b32.xlu1 %v1771_v61, %s1601_s14 }
  0x4c   : > { %521 = vrot.lane.b32.xlu0 %v1856_v40, %s1600_s9  ;;  %523 = vrot.lane.b32.xlu1 %v1858_v41, %s1600_s9 }
  0x50   : > { %455 = vrot.lane.b32.xlu0 %v1722_v30, %s1600_s9  ;;  %457 = vrot.lane.b32.xlu1 %v1822_v24, %s1600_s9 }
  0x54   : > { %544 = vrot.lane.b32.xlu0 %v1868_v46, %s1602_s11  ;;  %546 = vrot.lane.b32.xlu1 %v1870_v47, %s1602_s11 }
  0x58   : > { %479 = vrot.lane.b32.xlu0 %v1674_v8, %s1602_s11  ;;  %481 = vrot.lane.b32.xlu1 %v1856_v40, %s1602_s11 }
  0x5c   : > { %508 = vrot.lane.b32.xlu0 %v1880_v49, %s1601_s14  ;;  %510 = vrot.lane.b32.xlu1 %v1804_v17, %s1601_s14 }
  0x60   : > { %427 = vrot.lane.b32.xlu0 %v1868_v46, %s1601_s14  ;;  %429 = vrot.lane.b32.xlu1 %v1870_v47, %s1601_s14  ;;  %s1398_s14 = sshll.u32 %s2078_s15, 5 }
  0x61   : > { %s1991_s21 = scalar_lea.vmem %s2072_s4, %s1398_s14 }
  0x64   : > { %525 = vrot.lane.b32.xlu0 %v1332_v50, %s1600_s9  ;;  %527 = vrot.lane.b32.xlu1 %v1833_v32, %s1600_s9 }
  0x68   : > { %459 = vrot.lane.b32.xlu0 %v1838_v25, %s1600_s9  ;;  %461 = vrot.lane.b32.xlu1 %v1880_v49, %s1600_s9 }
  0x6c   : > { %548 = vrot.lane.b32.xlu0 %v1783_v2, %s1602_s11  ;;  %550 = vrot.lane.b32.xlu1 %v1785_v3, %s1602_s11 }
  0x70   : > { %483 = vrot.lane.b32.xlu0 %v1858_v41, %s1602_s11  ;;  %485 = vrot.lane.b32.xlu1 %v1332_v50, %s1602_s11 }
  0x86   : > { %v520_v35 = vpop.permute.xlu1 %519  ;;  %v518_v51 = vpop.permute.xlu0 %517 }
  0x8a   : > { %v454_v53 = vpop.permute.xlu1 %453  ;;  %v501_v54 = vpop.permute.xlu0 %500 }
  0x8b   : > { %v619_v63 = vsel %vm558_vm0, %v1757_v52, %v501_v54 }
  0x8c   : > { %v642_v5 = vsel %vm583_vm1, %v619_v63, %v518_v51 }
  0x8e   : > { %v515_v55 = vpop.permute.xlu1 %514  ;;  %v503_v56 = vpop.permute.xlu0 %502 }
  0x8f   : > { %v622_v0 = vsel %vm558_vm0, %v1769_v60, %v503_v56  ;;  %v640_v42 = vsel %vm558_vm0, %v1819_v22, %v515_v55 }
  0x90   : > { %v644_v7 = vsel %vm583_vm1, %v622_v0, %v520_v35 }
  0x92   : > { %v452_v57 = vpop.permute.xlu0 %451  ;;  %v420_v58 = vpop.permute.xlu1 %419 }
  0x93   : > { %v561_v60 = vsel %vm558_vm0, %v1326_v9, %v420_v58 }
  0x94   : > { %v585_v21 = vsel %vm583_vm1, %v561_v60, %v452_v57 }
  0x96   : > { %v513_v59 = vpop.permute.xlu0 %512  ;;  %v422_v62 = vpop.permute.xlu1 %421 }
  0x97   : > { %v564_v18 = vsel %vm558_vm0, %v1795_v6, %v422_v62  ;;  %v637_v6 = vsel %vm558_vm0, %v1785_v3, %v513_v59  ;;  %v1573_v62 = vld [vmem:[%s2069_s1 + $0x80] sm:$0xff]  }
  0x98   : > { %v587_v23 = vsel %vm583_vm1, %v564_v18, %v454_v53 }
  0x9a   : > { %v541_v1 = vpop.permute.xlu0 %540  ;;  %v543_v4 = vpop.permute.xlu1 %542 }
  0x9b   : > { %v658_v12 = vsel %vm600_vm2, %v642_v5, %v541_v1  ;;  %v660_v13 = vsel %vm600_vm2, %v644_v7, %v543_v4 }
  0x9c   : > { %v1347_v15 = vcombine.low %v658_v12, %v660_v13 }
  0x9e   : > { %v432_v52 = vpop.permute.xlu0 %431  ;;  %885 = vmatprep.mubr.bf16.mxu0 %v1347_v15  ;;  %v434_v11 = vpop.permute.xlu1 %433 }
  0x9f   : > { %v579_v53 = vsel %vm558_vm0, %v1332_v50, %v432_v52  ;;  %v582_v54 = vsel %vm558_vm0, %v1833_v32, %v434_v11  ;;  %v1351_v32 = vcombine.low %v1838_v25, %v1880_v49 }
  0xa2   : > { %v476_v20 = vpop.permute.xlu0 %475  ;;  %v478_v26 = vpop.permute.xlu1 %477 }
  0xa3   : > { %v602_v16 = vsel %vm600_vm2, %v585_v21, %v476_v20  ;;  %v604_v28 = vsel %vm600_vm2, %v587_v23, %v478_v26 }
  0xa4   : > { %v1346_v33 = vcombine.low %v602_v16, %v604_v28 }
  0xa6   : > { %v530_v34 = vpop.permute.xlu0 %529  ;;  %v532_v36 = vpop.permute.xlu1 %531  ;;  %886 = vmatmul.mubr.bf16.vlgmr.msra.gmra.mxu0 %v1346_v33 }
  0xa7   : > { %v654_v43 = vsel %vm583_vm1, %v637_v6, %v530_v34  ;;  %v656_v19 = vsel %vm583_vm1, %v640_v42, %v532_v36 }
  0xaa   : > { %v464_v37 = vpop.permute.xlu0 %463  ;;  %v466_v27 = vpop.permute.xlu1 %465 }
  0xab   : > { %v597_v22 = vsel %vm583_vm1, %v579_v53, %v464_v37  ;;  %v599_v3 = vsel %vm583_vm1, %v582_v54, %v466_v27 }
  0xae   : > { %v553_v29 = vpop.permute.xlu0 %552  ;;  %v555_v44 = vpop.permute.xlu1 %554 }
  0xaf   : > { %v670_v45 = vsel %vm600_vm2, %v654_v43, %v553_v29  ;;  %v672_v35 = vsel %vm600_vm2, %v656_v19, %v555_v44 }
  0xb0   : > { %v1356_v51 = vcombine.low %v670_v45, %v672_v35 }
  0xb2   : > { %v488_v55 = vpop.permute.xlu0 %487  ;;  %909 = vmatprep.mubr.bf16.mxu1 %v1356_v51  ;;  %v490_v56 = vpop.permute.xlu1 %489 }
  0xb3   : > { %v614_v57 = vsel %vm600_vm2, %v597_v22, %v488_v55  ;;  %v616_v58 = vsel %vm600_vm2, %v599_v3, %v490_v56 }
  0xb4   : > { %v1355_v59 = vcombine.low %v614_v57, %v616_v58 }
  0xb6   : > { %v505_v50 = vpop.permute.xlu0 %504  ;;  %910 = vmatmul.mubr.bf16.vlgmr.msra.gmra.mxu1 %v1355_v59  ;;  %v507_v63 = vpop.permute.xlu1 %506 }
  0xb7   : > { %1481 = vmatpush3.bf16.msra.mxu1 %v1812_v14  ;;  %1484 = vmatprep.mubr.msk.bf16.mxu1 %vm558_vm0, %v1348_v31  ;;  %v625_v24 = vsel %vm558_vm0, %v1771_v61, %v505_v50  ;;  %v628_v31 = vsel %vm558_vm0, %v1868_v46, %v507_v63 }
  0xb8   : > { %1482 = vmatprep.subr.bf16.mxu1 %v1573_v62 }
  0xba   : > { %v424_v0 = vpop.permute.xlu0 %423  ;;  %v426_v1 = vpop.permute.xlu1 %425 }
  0xbb   : > { %1483 = vmatpush3.bf16.msra.mxu1 %v1573_v62  ;;  %v567_v61 = vsel %vm558_vm0, %v1677_v10, %v424_v0  ;;  %v570_v46 = vsel %vm558_vm0, %v1674_v8, %v426_v1 }
  0xbe   : > { %v522_v4 = vpop.permute.xlu0 %521  ;;  %1485 = vmatmul.mubr.msk.bf16.vlgmr.msra.gmra.mxu1 %vm558_vm0, %v1351_v32  ;;  %v524_v5 = vpop.permute.xlu1 %523 }
  0xbf   : > { %1488 = vmatprep.mubr.msk.bf16.mxu1 %vm558_vm0, %v1354_v38  ;;  %v646_v25 = vsel %vm583_vm1, %v625_v24, %v522_v4  ;;  %v648_v49 = vsel %vm583_vm1, %v628_v31, %v524_v5 }
  0xc2   : > { %v456_v14 = vpop.permute.xlu0 %455  ;;  %v458_v30 = vpop.permute.xlu1 %457 }
  0xc3   : > { %v589_v12 = vsel %vm583_vm1, %v567_v61, %v456_v14  ;;  %v591_v13 = vsel %vm583_vm1, %v570_v46, %v458_v30 }
  0xc6   : > { %v545_v7 = vpop.permute.xlu0 %544  ;;  %1489 = vmatmul.mubr.msk.bf16.gmra.mxu1 %vm558_vm0, %v1850_v39  ;;  %v547_v9 = vpop.permute.xlu1 %546 }
  0xc7   : > { %v662_v48 = vsel %vm600_vm2, %v646_v25, %v545_v7  ;;  %v664_v17 = vsel %vm600_vm2, %v648_v49, %v547_v9 }
  0xc8   : > { %v1350_v38 = vcombine.low %v662_v48, %v664_v17 }
  0xca   : > { %v480_v15 = vpop.permute.xlu0 %479  ;;  %v482_v52 = vpop.permute.xlu1 %481  ;;  %893 = vmatprep.mubr.bf16.mxu0 %v1350_v38 }
  0xcb   : > { %v606_v39 = vsel %vm600_vm2, %v589_v12, %v480_v15  ;;  %v608_v11 = vsel %vm600_vm2, %v591_v13, %v482_v52 }
  0xcc   : > { %v1349_v60 = vcombine.low %v606_v39, %v608_v11 }
  0xce   : > { %v509_v18 = vpop.permute.xlu0 %508  ;;  %v511_v20 = vpop.permute.xlu1 %510  ;;  %894 = vmatmul.mubr.bf16.gmra.mxu0 %v1349_v60 }
  0xcf   : > { %v631_v28 = vsel %vm558_vm0, %v1870_v47, %v509_v18  ;;  %v634_v33 = vsel %vm558_vm0, %v1783_v2, %v511_v20 }
  0xd2   : > { %v428_v21 = vpop.permute.xlu0 %427  ;;  %v430_v10 = vpop.permute.xlu1 %429 }
  0xd3   : > { %v573_v19 = vsel %vm558_vm0, %v1856_v40, %v428_v21  ;;  %v576_v47 = vsel %vm558_vm0, %v1858_v41, %v430_v10 }
  0xd6   : > { %v526_v23 = vpop.permute.xlu0 %525  ;;  %v528_v26 = vpop.permute.xlu1 %527 }
  0xd7   : > { %v650_v34 = vsel %vm583_vm1, %v631_v28, %v526_v23  ;;  %v652_v36 = vsel %vm583_vm1, %v634_v33, %v528_v26 }
  0xda   : > { %v460_v8 = vpop.permute.xlu0 %459  ;;  %v462_v16 = vpop.permute.xlu1 %461 }
  0xdb   : > { %v593_v29 = vsel %vm583_vm1, %v573_v19, %v460_v8  ;;  %v595_v2 = vsel %vm583_vm1, %v576_v47, %v462_v16 }
  0xde   : > { %v549_v37 = vpop.permute.xlu0 %548  ;;  %v551_v27 = vpop.permute.xlu1 %550 }
  0xdf   : > { %v666_v42 = vsel %vm600_vm2, %v650_v34, %v549_v37  ;;  %v668_v6 = vsel %vm600_vm2, %v652_v36, %v551_v27 }
  0xe0   : > { %v1353_v43 = vcombine.low %v666_v42, %v668_v6 }
  0xe2   : > { %v484_v44 = vpop.permute.xlu0 %483  ;;  %v486_v45 = vpop.permute.xlu1 %485  ;;  %901 = vmatprep.mubr.bf16.mxu0 %v1353_v43 }
  0xe3   : > { %v610_v35 = vsel %vm600_vm2, %v593_v29, %v484_v44  ;;  %v612_v51 = vsel %vm600_vm2, %v595_v2, %v486_v45 }
  0xe4   : > { %v1352_v53 = vcombine.low %v610_v35, %v612_v51 }
  0xe6   : > { %902 = vmatmul.mubr.bf16.gmra.mxu0 %v1352_v53 }
 0x166   : > { %v1450_v54 = vpop.f32.mrf.mxu0 }
 0x168   : > { %v1451_v40 = vpop.f32.mrf.mxu0 }
 0x169   : > { %v1452_v58 = vadd.f32 %v1451_v40, %v1450_v54 }
 0x16a   : > { %v1453_v41 = vpop.f32.mrf.mxu0 }
 0x16c   : > { %v1454_v59 = vpop.f32.mrf.mxu0 }
 0x16d   : > { %v1455_v32 = vadd.f32 %v1454_v59, %v1453_v41 }
 0x176   : > { %v1468_v22 = vpop.f32.mrf.mxu1 }
 0x178   : > { %v1469_v3 = vpop.f32.mrf.mxu1 }
 0x179   : > { %v1470_v4 = vadd.f32 %v1469_v3, %v1468_v22 }
 0x17a   : > { %v1471_v55 = vpop.f32.mrf.mxu1 }
 0x17c   : > { %v1472_v56 = vpop.f32.mrf.mxu1 }
 0x17d   : > { %v1473_v25 = vadd.f32 %v1472_v56, %v1471_v55 }
 0x17e   : > { %v1486_v57 = vpop.f32.mrf.mxu1 }
 0x180   : > { %v952_v62 = vpop.f32.mrf.mxu1 }
 0x181   : > { %v953_v50 = vadd.f32 %v1452_v58, %v952_v62 }
 0x182   : > { %v1487_v63 = vpop.f32.mrf.mxu1 }
 0x183   : > { %v1399_v0 = vpack.c.bf16 %v953_v50, %v953_v50  ;;  %v1047_v20 = vmul.f32 %v953_v50, %v953_v50  ;;  %v1025_v8 = vsel %vm1024_vm4, %v953_v50, 0.0 }
 0x184   : > { %v955_v1 = vpop.f32.mrf.mxu1 }
 0x185   : > { %1016 = vst.msk [vmem:[%s1991_s21] sm:$0xf] %vm1015_vm3, %v1399_v0  ;;  %v956_v5 = vadd.f32 %v1455_v32, %v955_v1  ;;  %v1055_v37 = vsel %vm1024_vm4, %v1047_v20, 0.0 }
 0x186   : > { %v1490_v14 = vpop.f32.mrf.mxu1 }
 0x187   : > { %v1400_v30 = vpack.c.bf16 %v956_v5, %v956_v5  ;;  %v977_v24 = vadd.f32 %v1490_v14, %v1470_v4  ;;  %v1048_v60 = vmul.f32 %v956_v5, %v956_v5  ;;  %v1026_v21 = vsel %vm1024_vm4, %v956_v5, 0.0 }
 0x188   : > { %v968_v31 = vpop.f32.mrf.mxu1  ;;  %v1027_v34 = vadd.f32 %v1026_v21, %v1025_v8  ;;  %v1107_v21 = vlaneseq }
 0x189   : > { %1017 = vst.msk [vmem:[%s1991_s21 + $0x4] sm:$0xf] %vm1015_vm3, %v1400_v30  ;;  %v1405_v49 = vpack.c.bf16 %v977_v24, %v977_v24  ;;  %v1056_v16 = vsel %vm1024_vm4, %v1048_v60, 0.0  ;;  %v1053_v41 = vmul.f32 %v977_v24, %v977_v24  ;;  %v1036_v50 = vsel %vm1024_vm4, %v977_v24, 0.0 }
 0x18a   : > { %v1491_v7 = vpop.f32.mrf.mxu1  ;;  %v1057_v43 = vadd.f32 %v1056_v16, %v1055_v37 }
 0x18b   : > { %1022 = vst.msk [vmem:[%s1991_s21 + $0x18] sm:$0xf] %vm1015_vm3, %v1405_v49  ;;  %v980_v9 = vadd.f32 %v1491_v7, %v1473_v25  ;;  %v1066_v4 = vsel %vm1024_vm4, %v1053_v41, 0.0 }
 0x18c   : > { %v971_v54 = vpop.f32.mrf.mxu1 }
 0x18d   : > { %v1406_v48 = vpack.c.bf16 %v980_v9, %v980_v9  ;;  %v1038_v5 = vsel %vm1024_vm4, %v980_v9, 0.0 }
 0x18e   : > { %v1456_v17 = vpop.f32.mrf.mxu0 }
 0x18f   : > { %1023 = vst.msk [vmem:[%s1991_s21 + $0x1c] sm:$0xf] %vm1015_vm3, %v1406_v48 }
 0x190   : > { %v1457_v38 = vpop.f32.mrf.mxu0  ;;  %v1416_v16 = vld [vmem:[%s1991_s21] sm:$0xff]  }
 0x191   : > { %v1458_v61 = vadd.f32 %v1457_v38, %v1456_v17 }
 0x192   : > { %v1459_v46 = vpop.f32.mrf.mxu0 }
 0x193   : > { %v961_v12 = vadd.f32 %v1486_v57, %v1458_v61 }
 0x194   : > { %v1460_v13 = vpop.f32.mrf.mxu0 }
 0x195   : > { %v1401_v15 = vpack.c.bf16 %v961_v12, %v961_v12  ;;  %v1461_v52 = vadd.f32 %v1460_v13, %v1459_v46  ;;  %v1049_v10 = vmul.f32 %v961_v12, %v961_v12  ;;  %v1028_v28 = vsel %vm1024_vm4, %v961_v12, 0.0 }
 0x196   : > { %v1029_v19 = vadd.f32 %v1028_v28, %v1027_v34 }
 0x197   : > { %1018 = vst.msk [vmem:[%s1991_s21 + $0x8] sm:$0xf] %vm1015_vm3, %v1401_v15  ;;  %v964_v39 = vadd.f32 %v1487_v63, %v1461_v52  ;;  %v1058_v27 = vsel %vm1024_vm4, %v1049_v10, 0.0  ;;  %v1054_v63 = vmul.f32 %v980_v9, %v980_v9  ;;  %v1108_v10 = vshrl.u32 %v1107_v21, 7 }
 0x198   : > { %v1059_v51 = vadd.f32 %v1058_v27, %v1057_v43  ;;  %v1418_v43 = vunpack.c.h.bf16 %v1416_v16 }
 0x199   : > { %v1402_v11 = vpack.c.bf16 %v964_v39, %v964_v39  ;;  %v1050_v23 = vmul.f32 %v964_v39, %v964_v39  ;;  %v1030_v42 = vsel %vm1024_vm4, %v964_v39, 0.0 }
 0x19a   : > { %v1031_v53 = vadd.f32 %v1030_v42, %v1029_v19 }
 0x19b   : > { %1019 = vst.msk [vmem:[%s1991_s21 + $0xc] sm:$0xf] %vm1015_vm3, %v1402_v11  ;;  %v1060_v47 = vsel %vm1024_vm4, %v1050_v23, 0.0  ;;  %v1083_v23 = vld [vmem:[%s2070_s2] sm:$0x1] }
 0x19c   : > { %v1061_v3 = vadd.f32 %v1060_v47, %v1059_v51 }
 0x1a2   : > { %v1431_v34 = vld [vmem:[%s1991_s21 + $0x8] sm:$0xff]  }
 0x1a3   : > { %v1421_v47 = vunpack.c.l.bf16 %v1431_v34 }
 0x1a6   : > { %v1462_v18 = vpop.f32.mrf.mxu0 }
 0x1a8   : > { %v1463_v26 = vpop.f32.mrf.mxu0 }
 0x1a9   : > { %v1464_v33 = vadd.f32 %v1463_v26, %v1462_v18  ;;  %v1109_v26 = vsub.s32 0, %v1108_v10 }
 0x1aa   : > { %v1465_v36 = vpop.f32.mrf.mxu0 }
 0x1ab   : > { %v969_v6 = vadd.f32 %v1464_v33, %v968_v31  ;;  %v1068_v31 = vsel %vm1024_vm4, %v1054_v63, 0.0  ;;  %v1433_v33 = vld [vmem:[%s1991_s21 + $0x18] sm:$0xff]  }
 0x1ac   : > { %v1466_v29 = vpop.f32.mrf.mxu0  ;;  %v1429_v19 = vunpack.c.l.bf16 %v1433_v33 }
 0x1ad   : > { %v1403_v2 = vpack.c.bf16 %v969_v6, %v969_v6  ;;  %v1032_v44 = vsel %vm1024_vm4, %v969_v6, 0.0  ;;  %v1051_v45 = vmul.f32 %v969_v6, %v969_v6  ;;  %v1467_v35 = vadd.f32 %v1466_v29, %v1465_v36  ;;  %v1087_v36 = vld [vmem:[%s2071_s3] sm:$0x1] }
 0x1ae   : > { %v1033_v55 = vadd.f32 %v1032_v44, %v1031_v53  ;;  %v1417_v6 = vunpack.c.l.bf16 %v1416_v16  ;;  %v1422_v29 = vunpack.c.h.bf16 %v1431_v34  ;;  %v1430_v44 = vunpack.c.h.bf16 %v1433_v33 }
 0x1af   : > { %1020 = vst.msk [vmem:[%s1991_s21 + $0x10] sm:$0xf] %vm1015_vm3, %v1403_v2  ;;  %v1062_v22 = vsel %vm1024_vm4, %v1051_v45, 0.0  ;;  %v972_v40 = vadd.f32 %v1467_v35, %v971_v54 }
 0x1b0   : > { %v1063_v59 = vadd.f32 %v1062_v22, %v1061_v3 }
 0x1b1   : > { %v1404_v56 = vpack.c.bf16 %v972_v40, %v972_v40  ;;  %v1034_v57 = vsel %vm1024_vm4, %v972_v40, 0.0  ;;  %v1052_v58 = vmul.f32 %v972_v40, %v972_v40 }
 0x1b2   : > { %v1035_v62 = vadd.f32 %v1034_v57, %v1033_v55 }
 0x1b3   : > { %1021 = vst.msk [vmem:[%s1991_s21 + $0x14] sm:$0xf] %vm1015_vm3, %v1404_v56  ;;  %v1064_v32 = vsel %vm1024_vm4, %v1052_v58, 0.0 }
 0x1b4   : > { %v1037_v0 = vadd.f32 %v1036_v50, %v1035_v62  ;;  %v1065_v1 = vadd.f32 %v1064_v32, %v1063_v59 }
 0x1b6   : > { %v1039_v14 = vadd.f32 %v1038_v5, %v1037_v0  ;;  %v1067_v30 = vadd.f32 %v1066_v4, %v1065_v1 }
 0x1b8   : > { %v1040_v25 = vrot.slane %v1039_v14, 4  ;;  %v1069_v49 = vadd.f32 %v1068_v31, %v1067_v30 }
 0x1ba   : > { %v1041_v7 = vadd.f32 %v1040_v25, %v1039_v14  ;;  %v1070_v48 = vrot.slane %v1069_v49, 4  ;;  %v1432_v27 = vld [vmem:[%s1991_s21 + $0x10] sm:$0xff]  }
 0x1bb   : > { %v1425_v45 = vunpack.c.l.bf16 %v1432_v27  ;;  %v1426_v35 = vunpack.c.h.bf16 %v1432_v27 }
 0x1bc   : > { %v1042_v24 = vrot.slane %v1041_v7, 2  ;;  %v1071_v17 = vadd.f32 %v1070_v48, %v1069_v49 }
 0x1be   : > { %v1043_v38 = vadd.f32 %v1042_v24, %v1041_v7  ;;  %v1072_v61 = vrot.slane %v1071_v17, 2 }
 0x1c0   : > { %v1044_v46 = vrot.slane %v1043_v38, 1  ;;  %v1073_v12 = vadd.f32 %v1072_v61, %v1071_v17 }
 0x1c2   : > { %v1045_v13 = vadd.f32 %v1044_v46, %v1043_v38  ;;  %v1074_v15 = vrot.slane %v1073_v12, 1 }
 0x1c4   : > { %v1075_v52 = vadd.f32 %v1074_v15, %v1073_v12  ;;  %v1078_v9 = vmul.f32 0.015625, %v1045_v13 }
 0x1c6   : > { %v1079_v39 = vmul.f32 0.015625, %v1075_v52  ;;  %v1080_v11 = vmul.f32 %v1078_v9, %v1078_v9 }
 0x1c8   : > { %v1081_v60 = vsub.f32 %v1079_v39, %v1080_v11 }
 0x1ca   : > { %v1082_v18 = vmax.f32 %v1081_v60, 0.0 }
 0x1cc   : > { %v1084_v20 = vadd.f32 1e-05, %v1082_v18 }
 0x1ce   : > { %1574 = vrsqrt.f32 %v1084_v20 }
 0x1db   : > { %v1575_v8 = vpop.eup %1574 }
 0x1dc   : > { %v1086_v28 = vmul.f32 %v1575_v8, %v1083_v23 }
 0x1de   : > { %v1088_v37 = vmul.f32 %v1086_v28, %v1078_v9  ;;  %v1110_v42 = vrot.slane %v1086_v28, %v1109_v26 }
 0x1e0   : > { %v1089_v2 = vsub.f32 %v1087_v36, %v1088_v37  ;;  %v1112_v51 = vmul.f32 %v1417_v6, %v1110_v42  ;;  %v1113_v53 = vmul.f32 %v1418_v43, %v1110_v42  ;;  %v1114_v54 = vmul.f32 %v1421_v47, %v1110_v42 }
 0x1e1   : > { %v1115_v22 = vmul.f32 %v1422_v29, %v1110_v42  ;;  %v1116_v3 = vmul.f32 %v1425_v45, %v1110_v42  ;;  %v1117_v55 = vmul.f32 %v1426_v35, %v1110_v42  ;;  %v1118_v41 = vmul.f32 %v1429_v19, %v1110_v42 }
 0x1e2   : > { %v1124_v40 = vrot.slane %v1089_v2, %v1109_v26  ;;  %v1119_v56 = vmul.f32 %v1430_v44, %v1110_v42 }
 0x1e4   : > { %v1126_v57 = vadd.f32 %v1124_v40, %v1112_v51  ;;  %v1127_v58 = vadd.f32 %v1124_v40, %v1113_v53  ;;  %v1128_v59 = vadd.f32 %v1124_v40, %v1114_v54  ;;  %v1129_v62 = vadd.f32 %v1124_v40, %v1115_v22 }
 0x1e5   : > { %v1130_v50 = vadd.f32 %v1124_v40, %v1116_v3  ;;  %v1131_v63 = vadd.f32 %v1124_v40, %v1117_v55  ;;  %v1132_v32 = vadd.f32 %v1124_v40, %v1118_v41  ;;  %v1133_v0 = vadd.f32 %v1124_v40, %v1119_v56 }
 0x1e6   : > { %vm1134_vm5 = vcmp.ge.f32.partialorder %v1126_v57, 0.0  ;;  %vm1135_vm6 = vcmp.ge.f32.partialorder %v1127_v58, 0.0  ;;  %vm1136_vm7 = vcmp.ge.f32.partialorder %v1128_v59, 0.0  ;;  %vm1137_vm8 = vcmp.ge.f32.partialorder %v1129_v62, 0.0 }
 0x1e7   : > { %vm1138_vm9 = vcmp.ge.f32.partialorder %v1130_v50, 0.0  ;;  %vm1139_vm10 = vcmp.ge.f32.partialorder %v1131_v63, 0.0  ;;  %vm1140_vm11 = vcmp.ge.f32.partialorder %v1132_v32, 0.0  ;;  %vm1141_vm12 = vcmp.ge.f32.partialorder %v1133_v0, 0.0 }
 0x1e8   : > { %v1142_v1 = vmul.f32 0.2, %v1126_v57  ;;  %v1143_v4 = vmul.f32 0.2, %v1127_v58  ;;  %v1144_v5 = vmul.f32 0.2, %v1128_v59 }
 0x1e9   : > { %v1145_v14 = vmul.f32 0.2, %v1129_v62  ;;  %v1146_v30 = vmul.f32 0.2, %v1130_v50  ;;  %v1147_v31 = vmul.f32 0.2, %v1131_v63 }
 0x1ea   : > { %v1148_v25 = vmul.f32 0.2, %v1132_v32  ;;  %v1149_v49 = vmul.f32 0.2, %v1133_v0  ;;  %v1150_v7 = vsel %vm1134_vm5, %v1126_v57, %v1142_v1  ;;  %v1151_v48 = vsel %vm1135_vm6, %v1127_v58, %v1143_v4 }
 0x1eb   : > { %v1152_v24 = vsel %vm1136_vm7, %v1128_v59, %v1144_v5  ;;  %v1153_v17 = vsel %vm1137_vm8, %v1129_v62, %v1145_v14  ;;  %v1154_v38 = vsel %vm1138_vm9, %v1130_v50, %v1146_v30  ;;  %v1155_v61 = vsel %vm1139_vm10, %v1131_v63, %v1147_v31 }
 0x1ec   : > { %v1156_v46 = vsel %vm1140_vm11, %v1132_v32, %v1148_v25  ;;  %v1157_v12 = vsel %vm1141_vm12, %v1133_v0, %v1149_v49  ;;  %v1407_v13 = vpack.c.bf16 %v1150_v7, %v1150_v7  ;;  %v1408_v15 = vpack.c.bf16 %v1151_v48, %v1151_v48 }
 0x1ed   : > { %v1409_v52 = vpack.c.bf16 %v1152_v24, %v1152_v24  ;;  %v1410_v9 = vpack.c.bf16 %v1153_v17, %v1153_v17  ;;  %v1411_v39 = vpack.c.bf16 %v1154_v38, %v1154_v38  ;;  %v1412_v11 = vpack.c.bf16 %v1155_v61, %v1155_v61 }
 0x1ee   : > { %v1413_v60 = vpack.c.bf16 %v1156_v46, %v1156_v46  ;;  %v1414_v18 = vpack.c.bf16 %v1157_v12, %v1157_v12  ;;  %1190 = vst.msk [vmem:[%s1991_s21] sm:$0xf] %vm1015_vm3, %v1407_v13  ;;  %1191 = vst.msk [vmem:[%s1991_s21 + $0x4] sm:$0xf] %vm1015_vm3, %v1408_v15 }
 0x1ef   : > { %1192 = vst.msk [vmem:[%s1991_s21 + $0x8] sm:$0xf] %vm1015_vm3, %v1409_v52  ;;  %1193 = vst.msk [vmem:[%s1991_s21 + $0xc] sm:$0xf] %vm1015_vm3, %v1410_v9 }
 0x1f0   : > { %1194 = vst.msk [vmem:[%s1991_s21 + $0x10] sm:$0xf] %vm1015_vm3, %v1411_v39  ;;  %1195 = vst.msk [vmem:[%s1991_s21 + $0x14] sm:$0xf] %vm1015_vm3, %v1412_v11 }
 0x1f1   : > { %1196 = vst.msk [vmem:[%s1991_s21 + $0x18] sm:$0xf] %vm1015_vm3, %v1413_v60  ;;  %1197 = vst.msk [vmem:[%s1991_s21 + $0x1c] sm:$0xf] %vm1015_vm3, %v1414_v18 }
 0x1f2 PF: > { %s14_s17 = sadd.s32 1, %s1598_s17   ;;  %s2073_s15 = smov %s1594_s16 }
 0x1f3   : > { %p11_p5 = scmp.ge.s32.totalorder %s14_s17, 4   ;;  %s2074_s16 = smov %s2076_s18 }
 0x1f5   :  { %13 = sbr.rel (!%p11_p5) target bundleno = 2 (0x2), region = 76 }

// kernel: _lambda_.7
= control target key start
LH: loop header
LB: loop body
LE: loop exit
PB: predicated region body
PF: predicated region fallthrough
CT: control target
= control target key end

     0   :  { %s1817_s14 = smov 0   ;;  %s2618_s0 = inlined_call_operand.vmem [shape: bf16[2,18,18,8], index: 0, kind: input, shape index: {}]   ;;  %s2619_s1 = inlined_call_operand.vmem [shape: bf16[72,1], index: 1, kind: input, shape index: {}]   ;;  %s2620_s2 = inlined_call_operand.<no memory space> [shape: f32[1,1], index: 2, kind: input, shape index: {}]   ;;  %s2621_s3 = inlined_call_operand.vmem [shape: f32[2,256,1], index: 3, kind: output, shape index: {}]  }
   0x1   :  { %v8_v0 = vstv %s2620_s2 }
   0x2   :  { %9 = vst [vmem:[#allocation2] sm:$0x1] %v8_v0 }
   0x3 LB: > { %s1510_s15 = sadd.s32 4294967295, %s1784_s14   ;;  %p1514_p0 = scmp.ge.s32.totalorder %s1784_s14, 1  ;;  %s1784_s14 = sphi %s1817_s14, %s15_s14  }
   0x4   : > { %p139_p1 = scmp.lt.s32.totalorder %s1784_s14, 3 }
   0x6   : > { %p140_p2 = pnand %p1514_p0, %p139_p1 }
   0x7   : > { %p163_p3 = scmp.lt.s32.totalorder (!%p140_p2), %s1510_s15, 1  ;;  %s1786_s19 = smov (!%p140_p2), 24  }
   0x8   : > { %143 = sbr.rel (%p140_p2) target bundleno = 603 (0x25b), region = 32  ;;  %s1787_s20 = smov (!%p140_p2), 16  }
   0x9   : > { %s1788_s21 = smov (!%p140_p2), 8   ;;  %s1789_s22 = smov (!%p140_p2), 32  }
   0xa   : > { %s1790_s23 = smov (!%p140_p2), 40   ;;  %s1791_s28 = smov (!%p140_p2), 48  }
   0xb   : > { %s1792_s6 = smov (!%p140_p2), 56   ;;  %s1793_s9 = smov (!%p140_p2), 64  }
   0xd   : > { %s2623_s15 = smov (!%p163_p3, %s1510_s15), 1  ;;  %vm588_vm0 = vcmask 1046528   ;;  %vm331_vm1 = vsmask.f32 7424  ;;  %vm1225_vm2 = vcmask 1043456   ;;  %vm895_vm3 = vcmask 64512  }
   0xe   : > { %s1654_s2 = smul.u32 216, %s2623_s15  ;;  %vm928_vm4 = vcmask 130048   ;;  %vm994_vm5 = vcmask 261120   ;;  %vm961_vm6 = vcmask 195584   ;;  %vm1027_vm7 = vcmask 326656   ;;  %s1578_s10 = sshll.u32 %s2623_s15, 8 }
   0xf   : > { %vm1060_vm8 = vcmask 392192   ;;  %vm1093_vm9 = vcmask 457728   ;;  %vm1126_vm10 = vcmask 523264   ;;  %vm1192_vm11 = vcmask 588800   ;;  %s2525_s13 = scalar_lea.vmem %s2621_s3, %s1578_s10 }
  0x10   : > { %s1831_s18 = scalar_lea.vmem %s2618_s0, %s1654_s2  ;;  %vm1422_vm12 = vcmask 7168  }
  0x11   : > { %v1834_v1 = vld [vmem:[%s1831_s18 + $0x6c] sm:$0xff]   ;;  %v1844_v3 = vld [vmem:[%s1831_s18 + $0x60] sm:$0xff]   ;;  %v1674_v4 = vld [vmem:[%s1831_s18 + $0x68] ss:$0 sps:$4 sm:$0x11]  }
  0x12   : > { %v1837_v2 = vld [vmem:[%s1831_s18 + $0xc] sm:$0xff]   ;;  %686 = vrot.lane.b32.xlu1 %v1834_v1, %s1786_s19  ;;  %v1848_v5 = vld [vmem:[%s1831_s18] sm:$0xff]   ;;  %v616_v6 = vrot.slane %v1834_v1, 1  ;;  %v613_v7 = vrot.slane %v1844_v3, 1  ;;  %v614_v8 = vrot.slane %v1674_v4, 1  ;;  %v441_v27 = vshrl.u32 %v1834_v1, 16 }
  0x13   : > { %670 = vrot.lane.b32.xlu0 %v1837_v2, %s1786_s19  ;;  %v1676_v9 = vld [vmem:[%s1831_s18 + $0x8] ss:$0 sps:$4 sm:$0x11]   ;;  %v592_v10 = vrot.slane %v1837_v2, 1  ;;  %v589_v11 = vrot.slane %v1848_v5, 1  ;;  %v345_v17 = vshrl.u32 %v1837_v2, 16 }
  0x14   : > { %v1677_v12 = vld [vmem:[%s1831_s18 + $0x74] ss:$0 sps:$4 sm:$0x11]   ;;  %v1857_v13 = vsel %vm588_vm0, %v613_v7, %v614_v8  ;;  %v590_v14 = vrot.slane %v1676_v9, 1  ;;  %v347_v18 = vshll.u32 %v1837_v2, 16  ;;  %v333_v19 = vshrl.u32 %v1848_v5, 16 }
  0x15   : > { %v1678_v15 = vld [vmem:[%s1831_s18 + $0x14] ss:$0 sps:$4 sm:$0x11]   ;;  %v617_v16 = vrot.slane %v1677_v12, 1  ;;  %v335_v23 = vshll.u32 %v1848_v5, 16  ;;  %v340_v26 = vshll.u32 %v1676_v9, 16 }
  0x16   : > { %653 = vrot.lane.b32.xlu1 %v1857_v13, %s1787_s20  ;;  %v591_v20 = vsel %vm588_vm0, %v589_v11, %v590_v14  ;;  %v593_v21 = vrot.slane %v1678_v15, 1  ;;  %v352_v22 = vshll.u32 %v1678_v15, 16  ;;  %v349_v25 = vrot.slane %v347_v18, 1  ;;  %v1879_v40 = vld [vmem:[%s1831_s18 + $0x78] sm:$0xff]   ;;  %v1927_v11 = vld [vmem:[%s1831_s18 + $0x84] sm:$0xff]  }
  0x17   : > { %637 = vrot.lane.b32.xlu0 %v591_v20, %s1787_s20  ;;  %v1869_v24 = vsel %vm588_vm0, %v616_v6, %v617_v16  ;;  %v337_v30 = vrot.slane %v335_v23, 1  ;;  %v443_v31 = vshll.u32 %v1834_v1, 16  ;;  %v342_v33 = vrot.slane %v340_v26, 1  ;;  %v1885_v47 = vld [vmem:[%s1831_s18 + $0x18] sm:$0xff]   ;;  %v1937_v15 = vld [vmem:[%s1831_s18 + $0x24] sm:$0xff]  }
  0x18   : > { %v594_v28 = vsel %vm588_vm0, %v592_v10, %v593_v21  ;;  %v354_v29 = vrot.slane %v352_v22, 1  ;;  %v350_v32 = vor.u32 %v349_v25, %v345_v17  ;;  %v448_v34 = vshll.u32 %v1677_v12, 16  ;;  %v1681_v48 = vld [vmem:[%s1831_s18 + $0x80] ss:$0 sps:$4 sm:$0x11]   ;;  %v1700_v20 = vld [vmem:[%s2619_s1 + $0x18] sm:$0xff]  }
  0x19   : > { %v429_v35 = vshrl.u32 %v1844_v3, 16  ;;  %v338_v36 = vor.u32 %v337_v30, %v333_v19  ;;  %v445_v37 = vrot.slane %v443_v31, 1  ;;  %v431_v38 = vshll.u32 %v1844_v3, 16  ;;  %v1682_v53 = vld [vmem:[%s1831_s18 + $0x20] ss:$0 sps:$4 sm:$0x11]  }
  0x1a   : > { %655 = vrot.lane.b32.xlu1 %v1869_v24, %s1787_s20  ;;  %v436_v39 = vshll.u32 %v1674_v4, 16  ;;  %v355_v41 = vsel %vm331_vm1, %v350_v32, %v354_v29  ;;  %v450_v42 = vrot.slane %v448_v34, 1  ;;  %v455_v51 = vshll.u32 %v1879_v40, 16  ;;  %v1940_v16 = vld [vmem:[%s1831_s18 + $0x8c] ss:$0 sps:$4 sm:$0x11]  }
  0x1b   : > { %639 = vrot.lane.b32.xlu0 %v594_v28, %s1787_s20  ;;  %v343_v43 = vsel %vm331_vm1, %v338_v36, %v342_v33  ;;  %v446_v44 = vor.u32 %v445_v37, %v441_v27  ;;  %v433_v45 = vrot.slane %v431_v38, 1  ;;  %v359_v54 = vshll.u32 %v1885_v47, 16  ;;  %v1699_v18 = vld [vmem:[%s2619_s1 + $0x20] ss:$0 sps:$4 sm:$0xff]   ;;  %v1701_v27 = vld [vmem:[%s2619_s1 + $0x10] sm:$0xff]   ;;  %v1702_v33 = vld [vmem:[%s2619_s1 + $0x8] sm:$0xff]  }
  0x1c   : > { %v438_v46 = vrot.slane %v436_v39, 1  ;;  %v453_v55 = vshrl.u32 %v1879_v40, 16  ;;  %v457_v56 = vrot.slane %v455_v51, 1  ;;  %v460_v57 = vshll.u32 %v1681_v48, 16  ;;  %1652 = vmatprep.subr.msk.bf16.mxu0 %vm1225_vm2, %v1699_v18  ;;  %1653 = vmatprep.subr.msk.bf16.mxu1 %vm1225_vm2, %v1699_v18  ;;  %v1705_v37 = vld [vmem:[%s2619_s1] sm:$0xff]  }
  0x1d   : > { %v1890_v49 = vsel %vm331_vm1, %v446_v44, %v450_v42  ;;  %v434_v50 = vor.u32 %v433_v45, %v429_v35  ;;  %v357_v58 = vshrl.u32 %v1885_v47, 16  ;;  %v361_v59 = vrot.slane %v359_v54, 1  ;;  %v1686_v21 = vld [vmem:[%s1831_s18 + $0x2c] ss:$0 sps:$4 sm:$0x11]  }
  0x1e   : > { %526 = vrot.lane.b32.xlu1 %v355_v41, %s1788_s21  ;;  %v364_v60 = vshll.u32 %v1682_v53, 16  ;;  %v458_v61 = vor.u32 %v457_v56, %v453_v55  ;;  %v462_v62 = vrot.slane %v460_v57, 1  ;;  %v619_v7 = vrot.slane %v1879_v40, 1 }
  0x1f   : > { %524 = vrot.lane.b32.xlu0 %v343_v43, %s1788_s21  ;;  %v1895_v52 = vsel %vm331_vm1, %v434_v50, %v438_v46  ;;  %v362_v63 = vor.u32 %v361_v59, %v357_v58  ;;  %v620_v8 = vrot.slane %v1681_v48, 1  ;;  %v595_v9 = vrot.slane %v1885_v47, 1  ;;  %v2003_v46 = vld [vmem:[%s1831_s18 + $0x90] sm:$0xff]   ;;  %v1689_v50 = vld [vmem:[%s1831_s18 + $0x98] ss:$0 sps:$4 sm:$0x11]  }
  0x20   : > { %v366_v0 = vrot.slane %v364_v60, 1  ;;  %v1912_v4 = vsel %vm331_vm1, %v458_v61, %v462_v62  ;;  %v596_v10 = vrot.slane %v1682_v53, 1  ;;  %v467_v17 = vshll.u32 %v1927_v11, 16  ;;  %v2008_v48 = vld [vmem:[%s1831_s18 + $0x30] sm:$0xff]  }
  0x21   : > { %v1930_v12 = vsel %vm588_vm0, %v619_v7, %v620_v8  ;;  %v465_v19 = vshrl.u32 %v1927_v11, 16  ;;  %v1227_v22 = vsel %vm1225_vm2, %v1699_v18, 0  ;;  %v472_v23 = vshll.u32 %v1940_v16, 16  ;;  %v1690_v53 = vld [vmem:[%s1831_s18 + $0x38] ss:$0 sps:$4 sm:$0x11]  }
  0x22   : > { %542 = vrot.lane.b32.xlu1 %v1890_v49, %s1788_s21  ;;  %v1916_v6 = vsel %vm331_vm1, %v362_v63, %v366_v0  ;;  %v1934_v14 = vsel %vm588_vm0, %v595_v9, %v596_v10  ;;  %v371_v25 = vshll.u32 %v1937_v15, 16  ;;  %1601 = vmatpush3.bf16.msra.mxu0 %v1227_v22  ;;  %v469_v26 = vrot.slane %v467_v17, 1  ;;  %v2042_v17 = vld [vmem:[%s1831_s18 + $0x3c] sm:$0xff]   ;;  %v1693_v18 = vld [vmem:[%s1831_s18 + $0xa4] ss:$0 sps:$4 sm:$0x11]  }
  0x23   : > { %540 = vrot.lane.b32.xlu0 %v1895_v52, %s1788_s21  ;;  %1647 = vmatpush3.bf16.msra.mxu1 %v1227_v22  ;;  %v376_v30 = vshll.u32 %v1686_v21, 16  ;;  %v474_v32 = vrot.slane %v472_v23, 1  ;;  %v622_v39 = vrot.slane %v1927_v11, 1  ;;  %v598_v42 = vrot.slane %v1937_v15, 1 }
  0x24   : > { %1602 = vmatprep.subr.bf16.mxu0 %v1700_v20  ;;  %1643 = vmatprep.subr.bf16.mxu1 %v1700_v20  ;;  %v373_v29 = vrot.slane %v371_v25, 1  ;;  %v470_v31 = vor.u32 %v469_v26, %v465_v19  ;;  %v599_v43 = vrot.slane %v1686_v21, 1  ;;  %v479_v51 = vshll.u32 %v2003_v46, 16 }
  0x25   : > { %v378_v35 = vrot.slane %v376_v30, 1  ;;  %v383_v54 = vshll.u32 %v2008_v48, 16  ;;  %v477_v55 = vshrl.u32 %v2003_v46, 16  ;;  %v484_v57 = vshll.u32 %v1689_v50, 16 }
  0x26   : > { %688 = vrot.lane.b32.xlu1 %v1879_v40, %s1786_s19  ;;  %1603 = vmatpush3.bf16.msra.mxu0 %v1700_v20  ;;  %v475_v36 = vsel %vm331_vm1, %v470_v31, %v474_v32  ;;  %v600_v45 = vsel %vm588_vm0, %v598_v42, %v599_v43  ;;  %v481_v56 = vrot.slane %v479_v51, 1  ;;  %v381_v58 = vshrl.u32 %v2008_v48, 16 }
  0x27   : > { %672 = vrot.lane.b32.xlu0 %v1885_v47, %s1786_s19  ;;  %1648 = vmatpush3.bf16.msra.mxu1 %v1700_v20  ;;  %v385_v59 = vrot.slane %v383_v54, 1  ;;  %v388_v60 = vshll.u32 %v1690_v53, 16  ;;  %v486_v62 = vrot.slane %v484_v57, 1  ;;  %v625_v7 = vrot.slane %v2003_v46, 1 }
  0x28   : > { %1604 = vmatprep.subr.bf16.mxu0 %v1701_v27  ;;  %1644 = vmatprep.subr.bf16.mxu1 %v1701_v27  ;;  %v482_v61 = vor.u32 %v481_v56, %v477_v55  ;;  %v626_v8 = vrot.slane %v1689_v50, 1  ;;  %v601_v9 = vrot.slane %v2008_v48, 1  ;;  %v602_v10 = vrot.slane %v1690_v53, 1  ;;  %v1694_v20 = vld [vmem:[%s1831_s18 + $0x44] ss:$0 sps:$4 sm:$0x11]  }
  0x29   : > { %v386_v63 = vor.u32 %v385_v59, %v381_v58  ;;  %v390_v0 = vrot.slane %v388_v60, 1  ;;  %v395_v21 = vshll.u32 %v2042_v17, 16  ;;  %v496_v25 = vshll.u32 %v1693_v18, 16  ;;  %v2103_v59 = vld [vmem:[%s1831_s18 + $0xa8] sm:$0xff]  }
  0x2a   : > { %730 = vrot.lane.b32.xlu1 %v1890_v49, %s1789_s22  ;;  %1605 = vmatpush3.bf16.msra.mxu0 %v1701_v27  ;;  %v393_v26 = vshrl.u32 %v2042_v17, 16  ;;  %v604_v43 = vrot.slane %v2042_v17, 1 }
  0x2b   : > { %714 = vrot.lane.b32.xlu0 %v355_v41, %s1789_s22  ;;  %1649 = vmatpush3.bf16.msra.mxu1 %v1701_v27  ;;  %v623_v41 = vrot.slane %v1940_v16, 1  ;;  %v603_v16 = vsel %vm588_vm0, %v601_v9, %v602_v10  ;;  %v397_v27 = vrot.slane %v395_v21, 1  ;;  %v498_v30 = vrot.slane %v496_v25, 1 }
  0x2c   : > { %1606 = vmatprep.subr.bf16.mxu0 %v1702_v33  ;;  %1645 = vmatprep.subr.bf16.mxu1 %v1702_v33  ;;  %v501_v9 = vshrl.u32 %v2103_v59, 16 }
  0x2d   : > { %v624_v44 = vsel %vm588_vm0, %v622_v39, %v623_v41  ;;  %v398_v31 = vor.u32 %v397_v27, %v393_v26  ;;  %v629_v41 = vrot.slane %v1693_v18, 1 }
  0x2e   : > { %732 = vrot.lane.b32.xlu1 %v1912_v4, %s1789_s22  ;;  %1607 = vmatpush3.bf16.msra.mxu0 %v1702_v33 }
  0x2f   : > { %716 = vrot.lane.b32.xlu0 %v1916_v6, %s1789_s22  ;;  %1650 = vmatpush3.bf16.msra.mxu1 %v1702_v33 }
  0x30   : > { %1608 = vmatprep.subr.bf16.mxu0 %v1705_v37  ;;  %1646 = vmatprep.subr.bf16.mxu1 %v1705_v37 }
  0x32   : > { %766 = vrot.lane.b32.xlu1 %v1869_v24, %s1790_s23  ;;  %1609 = vmatpush3.bf16.msra.mxu0 %v1705_v37 }
  0x33   : > { %750 = vrot.lane.b32.xlu0 %v594_v28, %s1790_s23  ;;  %v369_v28 = vshrl.u32 %v1937_v15, 16  ;;  %1651 = vmatpush3.bf16.msra.mxu1 %v1705_v37 }
  0x35   : > { %v374_v34 = vor.u32 %v373_v29, %v369_v28  ;;  %v400_v28 = vshll.u32 %v1694_v20, 16 }
  0x36   : > { %768 = vrot.lane.b32.xlu1 %v1930_v12, %s1790_s23 }
  0x37   : > { %752 = vrot.lane.b32.xlu0 %v1934_v14, %s1790_s23  ;;  %v379_v38 = vsel %vm331_vm1, %v374_v34, %v378_v35  ;;  %v402_v32 = vrot.slane %v400_v28, 1 }
  0x3a   : > { %799 = vrot.lane.b32.xlu1 %v1879_v40, %s1791_s28 }
  0x3b   : > { %783 = vrot.lane.b32.xlu0 %v1885_v47, %s1791_s28 }
  0x3e   : > { %801 = vrot.lane.b32.xlu1 %v1927_v11, %s1791_s28 }
  0x3f   : > { %785 = vrot.lane.b32.xlu0 %v1937_v15, %s1791_s28 }
  0x42   : > { %843 = vrot.lane.b32.xlu1 %v1912_v4, %s1792_s6 }
  0x43   : > { %827 = vrot.lane.b32.xlu0 %v1916_v6, %s1792_s6 }
  0x46   : > { %845 = vrot.lane.b32.xlu1 %v475_v36, %s1792_s6 }
  0x47   : > { %829 = vrot.lane.b32.xlu0 %v379_v38, %s1792_s6 }
  0x4a   : > { %879 = vrot.lane.b32.xlu1 %v1930_v12, %s1793_s9 }
  0x4b   : > { %863 = vrot.lane.b32.xlu0 %v1934_v14, %s1793_s9 }
  0x4e   : > { %544 = vrot.lane.b32.xlu1 %v1912_v4, %s1788_s21  ;;  %v487_v4 = vsel %vm331_vm1, %v482_v61, %v486_v62  ;;  %v2109_v61 = vld [vmem:[%s1831_s18 + $0x48] sm:$0xff]  }
  0x4f   : > { %528 = vrot.lane.b32.xlu0 %v1916_v6, %s1788_s21  ;;  %v391_v6 = vsel %vm331_vm1, %v386_v63, %v390_v0  ;;  %v1697_v63 = vld [vmem:[%s1831_s18 + $0xb0] ss:$0 sps:$4 sm:$0x11]   ;;  %v503_v0 = vshll.u32 %v2103_v59, 16  ;;  %v405_v18 = vshrl.u32 %v2109_v61, 16 }
  0x51   : > { %v505_v10 = vrot.slane %v503_v0, 1 }
  0x52   : > { %881 = vrot.lane.b32.xlu1 %v624_v44, %s1793_s9 }
  0x53   : > { %865 = vrot.lane.b32.xlu0 %v600_v45, %s1793_s9 }
  0x56   : > { %546 = vrot.lane.b32.xlu1 %v475_v36, %s1788_s21 }
  0x57   : > { %530 = vrot.lane.b32.xlu0 %v379_v38, %s1788_s21 }
  0x5a   : > { %657 = vrot.lane.b32.xlu1 %v1930_v12, %s1787_s20  ;;  %v627_v12 = vsel %vm588_vm0, %v625_v7, %v626_v8  ;;  %v407_v7 = vshll.u32 %v2109_v61, 16 }
  0x5b   : > { %641 = vrot.lane.b32.xlu0 %v1934_v14, %s1787_s20  ;;  %v2037_v14 = vld [vmem:[%s1831_s18 + $0x9c] sm:$0xff]  }
  0x5c   : > { %v491_v19 = vshll.u32 %v2037_v14, 16  ;;  %v489_v22 = vshrl.u32 %v2037_v14, 16  ;;  %v628_v39 = vrot.slane %v2037_v14, 1 }
  0x5e   : > { %659 = vrot.lane.b32.xlu1 %v624_v44, %s1787_s20  ;;  %v493_v23 = vrot.slane %v491_v19, 1  ;;  %v630_v50 = vsel %vm588_vm0, %v628_v39, %v629_v41  ;;  %v409_v19 = vrot.slane %v407_v7, 1  ;;  %v631_v39 = vrot.slane %v2103_v59, 1  ;;  %v2165_v7 = vld [vmem:[%s1831_s18 + $0xb4] sm:$0xff]  }
  0x5f   : > { %643 = vrot.lane.b32.xlu0 %v600_v45, %s1787_s20  ;;  %v632_v41 = vrot.slane %v1697_v63, 1 }
  0x60   : > { %v494_v29 = vor.u32 %v493_v23, %v489_v22  ;;  %v506_v22 = vor.u32 %v505_v10, %v501_v9  ;;  %v410_v26 = vor.u32 %v409_v19, %v405_v18 }
  0x62   : > { %690 = vrot.lane.b32.xlu1 %v1927_v11, %s1786_s19  ;;  %v499_v34 = vsel %vm331_vm1, %v494_v29, %v498_v30 }
  0x63   : > { %674 = vrot.lane.b32.xlu0 %v1937_v15, %s1786_s19 }
  0x66   : > { %692 = vrot.lane.b32.xlu1 %v2003_v46, %s1786_s19 }
  0x67   : > { %676 = vrot.lane.b32.xlu0 %v2008_v48, %s1786_s19 }
  0x6a   : > { %734 = vrot.lane.b32.xlu1 %v475_v36, %s1789_s22  ;;  %v403_v36 = vsel %vm331_vm1, %v398_v31, %v402_v32 }
  0x6b   : > { %718 = vrot.lane.b32.xlu0 %v379_v38, %s1789_s22 }
  0x6e   : > { %736 = vrot.lane.b32.xlu1 %v487_v4, %s1789_s22 }
  0x6f   : > { %720 = vrot.lane.b32.xlu0 %v391_v6, %s1789_s22 }
  0x72   : > { %770 = vrot.lane.b32.xlu1 %v624_v44, %s1790_s23  ;;  %v605_v44 = vrot.slane %v1694_v20, 1 }
  0x73   : > { %754 = vrot.lane.b32.xlu0 %v600_v45, %s1790_s23 }
  0x74   : > { %v2088_v53 = vsel %vm588_vm0, %v604_v43, %v605_v44 }
  0x76   : > { %772 = vrot.lane.b32.xlu1 %v627_v12, %s1790_s23 }
  0x77   : > { %756 = vrot.lane.b32.xlu0 %v603_v16, %s1790_s23 }
  0x7a   : > { %803 = vrot.lane.b32.xlu1 %v2003_v46, %s1791_s28 }
  0x7b   : > { %787 = vrot.lane.b32.xlu0 %v2008_v48, %s1791_s28 }
  0x7e   : > { %805 = vrot.lane.b32.xlu1 %v2037_v14, %s1791_s28 }
  0x7f   : > { %789 = vrot.lane.b32.xlu0 %v2042_v17, %s1791_s28 }
  0x82   : > { %847 = vrot.lane.b32.xlu1 %v487_v4, %s1792_s6 }
  0x83   : > { %831 = vrot.lane.b32.xlu0 %v391_v6, %s1792_s6 }
  0x84   : > { %v2061_v33 = vpop.permute.xlu1 %686 }
  0x85   : > { %v2065_v35 = vpop.permute.xlu0 %670 }
  0x86   : > { %849 = vrot.lane.b32.xlu1 %v499_v34, %s1792_s6 }
  0x87   : > { %833 = vrot.lane.b32.xlu0 %v403_v36, %s1792_s6 }
  0x88   : > { %v2070_v37 = vpop.permute.xlu1 %653 }
  0x89   : > { %v2072_v38 = vpop.permute.xlu0 %637 }
  0x8a   : > { %883 = vrot.lane.b32.xlu1 %v627_v12, %s1793_s9 }
  0x8b   : > { %867 = vrot.lane.b32.xlu0 %v603_v16, %s1793_s9 }
  0x8c   : > { %v2077_v42 = vpop.permute.xlu1 %655 }
  0x8d   : > { %v2080_v45 = vpop.permute.xlu0 %639 }
  0x8e   : > { %548 = vrot.lane.b32.xlu1 %v487_v4, %s1788_s21 }
  0x8f   : > { %532 = vrot.lane.b32.xlu0 %v391_v6, %s1788_s21  ;;  %v1698_v6 = vld [vmem:[%s1831_s18 + $0x50] ss:$0 sps:$4 sm:$0x11]  }
  0x90   : > { %v2085_v51 = vpop.permute.xlu1 %526  ;;  %v412_v20 = vshll.u32 %v1698_v6, 16  ;;  %v608_v43 = vrot.slane %v1698_v6, 1 }
  0x91   : > { %v525_v54 = vpop.permute.xlu0 %524 }
  0x92   : > { %885 = vrot.lane.b32.xlu1 %v630_v50, %s1793_s9  ;;  %v414_v27 = vrot.slane %v412_v20, 1  ;;  %v897_v9 = vsel %vm895_vm3, %v1848_v5, %v525_v54 }
  0x93   : > { %869 = vrot.lane.b32.xlu0 %v2088_v53, %s1793_s9  ;;  %v930_v5 = vsel %vm928_vm4, %v897_v9, %v2072_v38  ;;  %v2194_v38 = vld [vmem:[%s1831_s18 + $0x5c] ss:$0 sps:$4 sm:$0x11]  }
  0x94   : > { %v2093_v55 = vpop.permute.xlu1 %542  ;;  %v2146_v31 = vsel %vm331_vm1, %v410_v26, %v414_v27  ;;  %v513_v26 = vshrl.u32 %v2165_v7, 16 }
  0x95   : > { %v541_v56 = vpop.permute.xlu0 %540 }
  0x96   : > { %550 = vrot.lane.b32.xlu1 %v499_v34, %s1788_s21  ;;  %v913_v44 = vsel %vm895_vm3, %v1844_v3, %v541_v56 }
  0x97   : > { %534 = vrot.lane.b32.xlu0 %v403_v36, %s1788_s21  ;;  %v946_v56 = vsel %vm928_vm4, %v913_v44, %v2070_v37  ;;  %v515_v37 = vshll.u32 %v2165_v7, 16 }
  0x98   : > { %v2097_v57 = vpop.permute.xlu1 %688  ;;  %v979_v54 = vsel %vm961_vm6, %v946_v56, %v2061_v33  ;;  %v424_v56 = vshll.u32 %v2194_v38, 16 }
  0x99   : > { %v2099_v58 = vpop.permute.xlu0 %672 }
  0x9a   : > { %661 = vrot.lane.b32.xlu1 %v627_v12, %s1787_s20  ;;  %v508_v12 = vshll.u32 %v1697_v63, 16  ;;  %v2162_v63 = vsel %vm588_vm0, %v631_v39, %v632_v41  ;;  %v517_v39 = vrot.slane %v515_v37, 1 }
  0x9b   : > { %645 = vrot.lane.b32.xlu0 %v603_v16, %s1787_s20 }
  0x9c   : > { %v2106_v60 = vpop.permute.xlu1 %730  ;;  %v510_v23 = vrot.slane %v508_v12, 1 }
  0x9d   : > { %v2111_v62 = vpop.permute.xlu0 %714  ;;  %v1012_v19 = vsel %vm994_vm5, %v979_v54, %v2106_v60 }
  0x9e   : > { %663 = vrot.lane.b32.xlu1 %v630_v50, %s1787_s20  ;;  %v2142_v29 = vsel %vm331_vm1, %v506_v22, %v510_v23  ;;  %v963_v22 = vsel %vm961_vm6, %v930_v5, %v2065_v35  ;;  %v915_v35 = vsel %vm895_vm3, %v1834_v1, %v2093_v55  ;;  %v899_v1 = vsel %vm895_vm3, %v1837_v2, %v2085_v51 }
  0x9f   : > { %647 = vrot.lane.b32.xlu0 %v2088_v53, %s1787_s20  ;;  %v996_v60 = vsel %vm994_vm5, %v963_v22, %v2111_v62  ;;  %v518_v5 = vor.u32 %v517_v39, %v513_v26  ;;  %v932_v51 = vsel %vm928_vm4, %v899_v1, %v2080_v45 }
  0xa0   : > { %v2118_v4 = vpop.permute.xlu1 %732 }
  0xa1   : > { %v2122_v8 = vpop.permute.xlu0 %716 }
  0xa2   : > { %694 = vrot.lane.b32.xlu1 %v2037_v14, %s1786_s19 }
  0xa3   : > { %678 = vrot.lane.b32.xlu0 %v2042_v17, %s1786_s19 }
  0xa4   : > { %v767_v16 = vpop.permute.xlu1 %766 }
  0xa5   : > { %v2130_v21 = vpop.permute.xlu0 %750  ;;  %v1045_v23 = vsel %vm1027_vm7, %v1012_v19, %v767_v16  ;;  %v426_v19 = vrot.slane %v424_v56, 1  ;;  %v1708_v56 = vld [vmem:[%s1831_s18 + $0xc0] sm:$0xff]  }
  0xa6   : > { %696 = vrot.lane.b32.xlu1 %v2103_v59, %s1786_s19  ;;  %v1029_v16 = vsel %vm1027_vm7, %v996_v60, %v2130_v21 }
  0xa7   : > { %680 = vrot.lane.b32.xlu0 %v2109_v61, %s1786_s19 }
  0xa8   : > { %v2136_v25 = vpop.permute.xlu1 %768 }
  0xa9   : > { %v2138_v28 = vpop.permute.xlu0 %752 }
  0xaa   : > { %738 = vrot.lane.b32.xlu1 %v499_v34, %s1789_s22 }
  0xab   : > { %722 = vrot.lane.b32.xlu0 %v403_v36, %s1789_s22  ;;  %v607_v36 = vrot.slane %v2109_v61, 1 }
  0xac   : > { %v800_v30 = vpop.permute.xlu1 %799 }
  0xad   : > { %v784_v32 = vpop.permute.xlu0 %783  ;;  %v2174_v10 = vsel %vm588_vm0, %v607_v36, %v608_v43  ;;  %v1078_v27 = vsel %vm1060_vm8, %v1045_v23, %v800_v30 }
  0xae   : > { %740 = vrot.lane.b32.xlu1 %v2142_v29, %s1789_s22  ;;  %v1062_v30 = vsel %vm1060_vm8, %v1029_v16, %v784_v32  ;;  %v948_v32 = vsel %vm928_vm4, %v915_v35, %v2077_v42 }
  0xaf   : > { %724 = vrot.lane.b32.xlu0 %v2146_v31, %s1789_s22  ;;  %v981_v54 = vsel %vm961_vm6, %v948_v32, %v2097_v57  ;;  %v705_v32 = vshll.u32 %v1708_v56, 16 }
  0xb0   : > { %v2153_v34 = vpop.permute.xlu1 %801  ;;  %v1014_v42 = vsel %vm994_vm5, %v981_v54, %v2118_v4 }
  0xb1   : > { %v2158_v0 = vpop.permute.xlu0 %785  ;;  %v1047_v57 = vsel %vm1027_vm7, %v1014_v42, %v2136_v25 }
  0xb2   : > { %774 = vrot.lane.b32.xlu1 %v630_v50, %s1790_s23  ;;  %v2177_v50 = vld [vmem:[%s1831_s18 + $0x54] sm:$0xff]   ;;  %v1080_v45 = vsel %vm1060_vm8, %v1047_v57, %v2153_v34 }
  0xb3   : > { %758 = vrot.lane.b32.xlu0 %v2088_v53, %s1790_s23  ;;  %v2184_v53 = vld [vmem:[%s1831_s18 + $0xbc] ss:$0 sps:$4 sm:$0x11]   ;;  %v419_v20 = vshll.u32 %v2177_v50, 16  ;;  %v417_v62 = vshrl.u32 %v2177_v50, 16  ;;  %v610_v16 = vrot.slane %v2177_v50, 1 }
  0xb4   : > { %v844_v6 = vpop.permute.xlu1 %843  ;;  %v520_v41 = vshll.u32 %v2184_v53, 16 }
  0xb5   : > { %v828_v12 = vpop.permute.xlu0 %827  ;;  %v1111_v36 = vsel %vm1093_vm9, %v1078_v27, %v844_v6  ;;  %v421_v9 = vrot.slane %v419_v20, 1  ;;  %v965_v20 = vsel %vm961_vm6, %v932_v51, %v2099_v58 }
  0xb6   : > { %776 = vrot.lane.b32.xlu1 %v2162_v63, %s1790_s23  ;;  %v1095_v55 = vsel %vm1093_vm9, %v1062_v30, %v828_v12  ;;  %v522_v37 = vrot.slane %v520_v41, 1  ;;  %v998_v23 = vsel %vm994_vm5, %v965_v20, %v2122_v8  ;;  %v635_v41 = vrot.slane %v2184_v53, 1 }
  0xb7   : > { %760 = vrot.lane.b32.xlu0 %v2174_v10, %s1790_s23  ;;  %v422_v12 = vor.u32 %v421_v9, %v417_v62  ;;  %v1031_v26 = vsel %vm1027_vm7, %v998_v23, %v2138_v28 }
  0xb8   : > { %v846_v18 = vpop.permute.xlu1 %845  ;;  %v523_v4 = vsel %vm331_vm1, %v518_v5, %v522_v37  ;;  %v1064_v60 = vsel %vm1060_vm8, %v1031_v26, %v2158_v0  ;;  %v707_v37 = vrot.slane %v705_v32, 1  ;;  %v747_v26 = vrot.slane %v1708_v56, 1 }
  0xb9   : > { %v830_v33 = vpop.permute.xlu0 %829  ;;  %v1113_v58 = vsel %vm1093_vm9, %v1080_v45, %v846_v18  ;;  %v427_v8 = vsel %vm331_vm1, %v422_v12, %v426_v19 }
  0xba   : > { %807 = vrot.lane.b32.xlu1 %v2103_v59, %s1791_s28  ;;  %v1097_v34 = vsel %vm1093_vm9, %v1064_v60, %v830_v33  ;;  %v634_v33 = vrot.slane %v2165_v7, 1  ;;  %v2339_v60 = vld [vmem:[%s1831_s18 + $0xcc] sm:$0xff]  }
  0xbb   : > { %791 = vrot.lane.b32.xlu0 %v2109_v61, %s1791_s28 }
  0xbc   : > { %v880_v43 = vpop.permute.xlu1 %879  ;;  %v636_v62 = vsel %vm588_vm0, %v634_v33, %v635_v41  ;;  %v818_v33 = vshll.u32 %v2339_v60, 16 }
  0xbd   : > { %v1144_v44 = vsel %vm1126_vm10, %v1111_v36, %v880_v43  ;;  %v864_v21 = vpop.permute.xlu0 %863  ;;  %v611_v36 = vrot.slane %v2194_v38, 1 }
  0xbe   : > { %809 = vrot.lane.b32.xlu1 %v2165_v7, %s1791_s28  ;;  %1626 = vmatprep.mubr.msk.bf16.mxu1 %vm1192_vm11, %v1144_v44  ;;  %v1128_v6 = vsel %vm1126_vm10, %v1095_v55, %v864_v21  ;;  %v1709_v21 = vld [vmem:[%s1831_s18 + $0xc8] ss:$0 sps:$4 sm:$0x11]  }
  0xbf   : > { %793 = vrot.lane.b32.xlu0 %v2177_v50, %s1791_s28  ;;  %1610 = vmatprep.mubr.msk.bf16.mxu0 %vm1192_vm11, %v1128_v6  ;;  %v612_v30 = vsel %vm588_vm0, %v610_v16, %v611_v36  ;;  %v710_v54 = vshll.u32 %v1709_v21, 16 }
  0xc0   : > { %v2234_v2 = vpop.permute.xlu1 %544 }
  0xc1   : > { %v2244_v22 = vpop.permute.xlu0 %528  ;;  %v712_v12 = vrot.slane %v710_v54, 1 }
  0xc2   : > { %851 = vrot.lane.b32.xlu1 %v2142_v29, %s1792_s6  ;;  %v901_v41 = vsel %vm895_vm3, %v1885_v47, %v2244_v22  ;;  %v816_v47 = vshrl.u32 %v2339_v60, 16 }
  0xc3   : > { %835 = vrot.lane.b32.xlu0 %v2146_v31, %s1792_s6 }
  0xc4   : > { %v882_v25 = vpop.permute.xlu1 %881 }
  0xc5   : > { %v1146_v27 = vsel %vm1126_vm10, %v1113_v58, %v882_v25  ;;  %v866_v39 = vpop.permute.xlu0 %865 }
  0xc6   : > { %853 = vrot.lane.b32.xlu1 %v523_v4, %s1792_s6  ;;  %1627 = vmatmul.mubr.msk.bf16.vlgmr.msra.gmra.mxu1 %vm1192_vm11, %v1146_v27  ;;  %v1130_v28 = vsel %vm1126_vm10, %v1097_v34, %v866_v39 }
  0xc7   : > { %837 = vrot.lane.b32.xlu0 %v427_v8, %s1792_s6  ;;  %1611 = vmatmul.mubr.msk.bf16.vlgmr.msra.gmra.mxu0 %vm1192_vm11, %v1130_v28  ;;  %v2349_v28 = vld [vmem:[%s1831_s18 + $0xd4] ss:$0 sps:$4 sm:$0x11]  }
  0xc8   : > { %v2268_v18 = vpop.permute.xlu1 %546  ;;  %v823_v32 = vshll.u32 %v2349_v28, 16 }
  0xc9   : > { %v2270_v0 = vpop.permute.xlu0 %530 }
  0xca   : > { %887 = vrot.lane.b32.xlu1 %v2162_v63, %s1793_s9 }
  0xcb   : > { %871 = vrot.lane.b32.xlu0 %v2174_v10, %s1793_s9 }
  0xcc   : > { %v658_v35 = vpop.permute.xlu1 %657 }
  0xcd   : > { %v2280_v43 = vpop.permute.xlu0 %641 }
  0xce   : > { %552 = vrot.lane.b32.xlu1 %v2142_v29, %s1788_s21 }
  0xcf   : > { %536 = vrot.lane.b32.xlu0 %v2146_v31, %s1788_s21 }
  0xd0   : > { %v2287_v53 = vpop.permute.xlu1 %659 }
  0xd1   : > { %v2290_v44 = vpop.permute.xlu0 %643 }
  0xd2   : > { %889 = vrot.lane.b32.xlu1 %v636_v62, %s1793_s9 }
  0xd3   : > { %873 = vrot.lane.b32.xlu0 %v612_v30, %s1793_s9 }
  0xd4   : > { %v691_v38 = vpop.permute.xlu1 %690 }
  0xd5   : > { %v675_v9 = vpop.permute.xlu0 %674 }
  0xd6   : > { %554 = vrot.lane.b32.xlu1 %v523_v4, %s1788_s21 }
  0xd7   : > { %538 = vrot.lane.b32.xlu0 %v427_v8, %s1788_s21 }
  0xd8   : > { %v2296_v29 = vpop.permute.xlu1 %692 }
  0xd9   : > { %v2298_v31 = vpop.permute.xlu0 %676 }
  0xda   : > { %665 = vrot.lane.b32.xlu1 %v2162_v63, %s1787_s20  ;;  %v703_v63 = vshrl.u32 %v1708_v56, 16 }
  0xdb   : > { %649 = vrot.lane.b32.xlu0 %v2174_v10, %s1787_s20 }
  0xdc   : > { %v735_v1 = vpop.permute.xlu1 %734  ;;  %v708_v42 = vor.u32 %v707_v37, %v703_v63  ;;  %v1776_v63 = vld [vmem:[%s1831_s18 + $0x60] sm:$0xff]  }
  0xdd   : > { %v719_v55 = vpop.permute.xlu0 %718 }
  0xde   : > { %667 = vrot.lane.b32.xlu1 %v636_v62, %s1787_s20  ;;  %v2325_v57 = vsel %vm331_vm1, %v708_v42, %v712_v12 }
  0xdf   : > { %651 = vrot.lane.b32.xlu0 %v612_v30, %s1787_s20 }
  0xe0   : > { %v2308_v6 = vpop.permute.xlu1 %736 }
  0xe1   : > { %v2310_v5 = vpop.permute.xlu0 %720 }
  0xe2   : > { %698 = vrot.lane.b32.xlu1 %v2165_v7, %s1786_s19 }
  0xe3   : > { %682 = vrot.lane.b32.xlu0 %v2177_v50, %s1786_s19 }
  0xe4   : > { %v771_v10 = vpop.permute.xlu1 %770 }
  0xe5   : > { %v755_v51 = vpop.permute.xlu0 %754 }
  0xe6   : > { %700 = vrot.lane.b32.xlu1 %v1708_v56, %s1786_s19 }
  0xe7   : > { %684 = vrot.lane.b32.xlu0 %v1844_v3, %s1786_s19  ;;  %v748_v3 = vrot.slane %v1709_v21, 1  ;;  %v820_v21 = vrot.slane %v818_v33, 1  ;;  %v861_v33 = vrot.slane %v2349_v28, 1 }
  0xe8   : > { %v2319_v19 = vpop.permute.xlu1 %772 }
  0xe9   : > { %v2321_v20 = vpop.permute.xlu0 %756  ;;  %v821_v12 = vor.u32 %v820_v21, %v816_v47 }
  0xea   : > { %742 = vrot.lane.b32.xlu1 %v523_v4, %s1789_s22  ;;  %v2336_v4 = vsel %vm588_vm0, %v747_v26, %v748_v3 }
  0xeb   : > { %726 = vrot.lane.b32.xlu0 %v427_v8, %s1789_s22  ;;  %v917_v8 = vsel %vm895_vm3, %v1879_v40, %v2234_v2  ;;  %v934_v2 = vsel %vm928_vm4, %v901_v41, %v2280_v43 }
  0xec   : > { %v804_v23 = vpop.permute.xlu1 %803  ;;  %v950_v39 = vsel %vm928_vm4, %v917_v8, %v658_v35  ;;  %v967_v36 = vsel %vm961_vm6, %v934_v2, %v675_v9 }
  0xed   : > { %v788_v45 = vpop.permute.xlu0 %787  ;;  %v983_v16 = vsel %vm961_vm6, %v950_v39, %v691_v38  ;;  %v1000_v22 = vsel %vm994_vm5, %v967_v36, %v719_v55  ;;  %v919_v55 = vsel %vm895_vm3, %v1927_v11, %v2268_v18  ;;  %v1777_v18 = vld [vmem:[%s1831_s18 + $0x6c] sm:$0xff]  }
  0xee   : > { %744 = vrot.lane.b32.xlu1 %v2325_v57, %s1789_s22  ;;  %v1016_v35 = vsel %vm994_vm5, %v983_v16, %v735_v1  ;;  %v1033_v43 = vsel %vm1027_vm7, %v1000_v22, %v755_v51  ;;  %v952_v51 = vsel %vm928_vm4, %v919_v55, %v2287_v53 }
  0xef   : > { %728 = vrot.lane.b32.xlu0 %v1895_v52, %s1789_s22  ;;  %v985_v11 = vsel %vm961_vm6, %v952_v51, %v2296_v29 }
  0xf0   : > { %v806_v58 = vpop.permute.xlu1 %805  ;;  %v1018_v3 = vsel %vm994_vm5, %v985_v11, %v2308_v6 }
  0xf1   : > { %v2332_v25 = vpop.permute.xlu0 %789 }
  0xf2   : > { %778 = vrot.lane.b32.xlu1 %v636_v62, %s1790_s23  ;;  %v1049_v62 = vsel %vm1027_vm7, %v1016_v35, %v771_v10 }
  0xf3   : > { %762 = vrot.lane.b32.xlu0 %v612_v30, %s1790_s23  ;;  %v1082_v38 = vsel %vm1060_vm8, %v1049_v62, %v804_v23  ;;  %v825_v23 = vrot.slane %v823_v32, 1 }
  0xf4   : > { %v848_v27 = vpop.permute.xlu1 %847 }
  0xf5   : > { %v832_v34 = vpop.permute.xlu0 %831  ;;  %v1115_v1 = vsel %vm1093_vm9, %v1082_v38, %v848_v27 }
  0xf6   : > { %780 = vrot.lane.b32.xlu1 %v2336_v4, %s1790_s23 }
  0xf7   : > { %764 = vrot.lane.b32.xlu0 %v1857_v13, %s1790_s23 }
  0xf8   : > { %v850_v40 = vpop.permute.xlu1 %849 }
  0xf9   : > { %v834_v30 = vpop.permute.xlu0 %833 }
  0xfa   : > { %811 = vrot.lane.b32.xlu1 %v1708_v56, %s1791_s28  ;;  %v1066_v56 = vsel %vm1060_vm8, %v1033_v43, %v788_v45  ;;  %v903_v45 = vsel %vm895_vm3, %v1937_v15, %v2270_v0  ;;  %v1051_v15 = vsel %vm1027_vm7, %v1018_v3, %v2319_v19 }
  0xfb   : > { %795 = vrot.lane.b32.xlu0 %v1776_v63, %s1791_s28  ;;  %v1099_v54 = vsel %vm1093_vm9, %v1066_v56, %v832_v34  ;;  %v936_v53 = vsel %vm928_vm4, %v903_v45, %v2290_v44  ;;  %v1084_v8 = vsel %vm1060_vm8, %v1051_v15, %v806_v58  ;;  %v826_v44 = vsel %vm331_vm1, %v821_v12, %v825_v23 }
  0xfc   : > { %v884_v9 = vpop.permute.xlu1 %883  ;;  %v969_v27 = vsel %vm961_vm6, %v936_v53, %v2298_v31  ;;  %v1117_v34 = vsel %vm1093_vm9, %v1084_v8, %v850_v40  ;;  %v860_v58 = vrot.slane %v2339_v60, 1 }
  0xfd   : > { %v1148_v37 = vsel %vm1126_vm10, %v1115_v1, %v884_v9  ;;  %v868_v10 = vpop.permute.xlu0 %867  ;;  %v1002_v29 = vsel %vm994_vm5, %v969_v27, %v2310_v5 }
  0xfe   : > { %813 = vrot.lane.b32.xlu1 %v2339_v60, %s1791_s28  ;;  %1630 = vmatprep.mubr.msk.bf16.mxu1 %vm1192_vm11, %v1148_v37  ;;  %v1132_v42 = vsel %vm1126_vm10, %v1099_v54, %v868_v10  ;;  %v1035_v6 = vsel %vm1027_vm7, %v1002_v29, %v2321_v20  ;;  %v862_v41 = vsel %vm588_vm0, %v860_v58, %v861_v33 }
  0xff   : > { %797 = vrot.lane.b32.xlu0 %v1777_v18, %s1791_s28  ;;  %1614 = vmatprep.mubr.msk.bf16.mxu0 %vm1192_vm11, %v1132_v42  ;;  %v1068_v19 = vsel %vm1060_vm8, %v1035_v6, %v2332_v25 }
 0x100   : > { %v549_v26 = vpop.permute.xlu1 %548  ;;  %v1101_v5 = vsel %vm1093_vm9, %v1068_v19, %v834_v30 }
 0x101   : > { %v533_v0 = vpop.permute.xlu0 %532 }
 0x102   : > { %855 = vrot.lane.b32.xlu1 %v2325_v57, %s1792_s6  ;;  %v905_v55 = vsel %vm895_vm3, %v2008_v48, %v533_v0 }
 0x103   : > { %839 = vrot.lane.b32.xlu0 %v1895_v52, %s1792_s6 }
 0x104   : > { %v886_v31 = vpop.permute.xlu1 %885 }
 0x105   : > { %v1150_v57 = vsel %vm1126_vm10, %v1117_v34, %v886_v31  ;;  %v870_v39 = vpop.permute.xlu0 %869 }
 0x106   : > { %857 = vrot.lane.b32.xlu1 %v826_v44, %s1792_s6  ;;  %1631 = vmatmul.mubr.msk.bf16.gmra.mxu1 %vm1192_vm11, %v1150_v57  ;;  %v1134_v20 = vsel %vm1126_vm10, %v1101_v5, %v870_v39 }
 0x107   : > { %841 = vrot.lane.b32.xlu0 %v1890_v49, %s1792_s6  ;;  %1615 = vmatmul.mubr.msk.bf16.gmra.mxu0 %vm1192_vm11, %v1134_v20 }
 0x108   : > { %v551_v52 = vpop.permute.xlu1 %550 }
 0x109   : > { %v535_v25 = vpop.permute.xlu0 %534  ;;  %v923_v27 = vsel %vm895_vm3, %v2037_v14, %v551_v52 }
 0x10a   : > { %891 = vrot.lane.b32.xlu1 %v2336_v4, %s1793_s9  ;;  %v907_v44 = vsel %vm895_vm3, %v2042_v17, %v535_v25 }
 0x10b   : > { %875 = vrot.lane.b32.xlu0 %v1857_v13, %s1793_s9 }
 0x10c   : > { %v662_v16 = vpop.permute.xlu1 %661 }
 0x10d   : > { %v646_v40 = vpop.permute.xlu0 %645 }
 0x10e   : > { %893 = vrot.lane.b32.xlu1 %v862_v41, %s1793_s9  ;;  %v938_v51 = vsel %vm928_vm4, %v905_v55, %v646_v40 }
 0x10f   : > { %877 = vrot.lane.b32.xlu0 %v1869_v24, %s1793_s9  ;;  %v921_v24 = vsel %vm895_vm3, %v2003_v46, %v549_v26 }
 0x110   : > { %v664_v49 = vpop.permute.xlu1 %663  ;;  %v954_v37 = vsel %vm928_vm4, %v921_v24, %v662_v16 }
 0x111   : > { %v648_v60 = vpop.permute.xlu0 %647  ;;  %v956_v29 = vsel %vm928_vm4, %v923_v27, %v664_v49 }
 0x112   : > { %v940_v31 = vsel %vm928_vm4, %v907_v44, %v648_v60 }
 0x114   : > { %v695_v28 = vpop.permute.xlu1 %694 }
 0x115   : > { %v679_v2 = vpop.permute.xlu0 %678  ;;  %v987_v54 = vsel %vm961_vm6, %v954_v37, %v695_v28 }
 0x116   : > { %v971_v12 = vsel %vm961_vm6, %v938_v51, %v679_v2 }
 0x118   : > { %v697_v35 = vpop.permute.xlu1 %696 }
 0x119   : > { %v681_v36 = vpop.permute.xlu0 %680  ;;  %v989_v6 = vsel %vm961_vm6, %v956_v29, %v697_v35 }
 0x11a   : > { %v973_v19 = vsel %vm961_vm6, %v940_v31, %v681_v36 }
 0x11c   : > { %v739_v62 = vpop.permute.xlu1 %738 }
 0x11d   : > { %v723_v4 = vpop.permute.xlu0 %722  ;;  %v1020_v42 = vsel %vm994_vm5, %v987_v54, %v739_v62 }
 0x11e   : > { %v1004_v46 = vsel %vm994_vm5, %v971_v12, %v723_v4 }
 0x120   : > { %v741_v30 = vpop.permute.xlu1 %740 }
 0x121   : > { %v725_v47 = vpop.permute.xlu0 %724  ;;  %v1022_v14 = vsel %vm994_vm5, %v989_v6, %v741_v30 }
 0x122   : > { %v1006_v39 = vsel %vm994_vm5, %v973_v19, %v725_v47 }
 0x124   : > { %v775_v22 = vpop.permute.xlu1 %774 }
 0x125   : > { %v759_v38 = vpop.permute.xlu0 %758  ;;  %v1053_v23 = vsel %vm1027_vm7, %v1020_v42, %v775_v22 }
 0x126   : > { %v1037_v18 = vsel %vm1027_vm7, %v1004_v46, %v759_v38 }
 0x128   : > { %v777_v13 = vpop.permute.xlu1 %776 }
 0x129   : > { %v761_v21 = vpop.permute.xlu0 %760  ;;  %v1055_v57 = vsel %vm1027_vm7, %v1022_v14, %v777_v13 }
 0x12a   : > { %v1039_v17 = vsel %vm1027_vm7, %v1006_v39, %v761_v21 }
 0x12c   : > { %v808_v32 = vpop.permute.xlu1 %807 }
 0x12d   : > { %v792_v43 = vpop.permute.xlu0 %791  ;;  %v1086_v11 = vsel %vm1060_vm8, %v1053_v23, %v808_v32 }
 0x12e   : > { %v1070_v53 = vsel %vm1060_vm8, %v1037_v18, %v792_v43 }
 0x130   : > { %v810_v1 = vpop.permute.xlu1 %809 }
 0x131   : > { %v794_v63 = vpop.permute.xlu0 %793  ;;  %v1088_v20 = vsel %vm1060_vm8, %v1055_v57, %v810_v1 }
 0x132   : > { %v1072_v52 = vsel %vm1060_vm8, %v1039_v17, %v794_v63 }
 0x134   : > { %v852_v9 = vpop.permute.xlu1 %851 }
 0x135   : > { %v836_v56 = vpop.permute.xlu0 %835  ;;  %v1119_v48 = vsel %vm1093_vm9, %v1086_v11, %v852_v9 }
 0x136   : > { %v1103_v15 = vsel %vm1093_vm9, %v1070_v53, %v836_v56 }
 0x138   : > { %v854_v10 = vpop.permute.xlu1 %853 }
 0x139   : > { %v838_v45 = vpop.permute.xlu0 %837  ;;  %v1121_v58 = vsel %vm1093_vm9, %v1088_v20, %v854_v10 }
 0x13a   : > { %v1105_v41 = vsel %vm1093_vm9, %v1072_v52, %v838_v45 }
 0x13c   : > { %v888_v26 = vpop.permute.xlu1 %887 }
 0x13d   : > { %v1152_v3 = vsel %vm1126_vm10, %v1119_v48, %v888_v26  ;;  %v872_v0 = vpop.permute.xlu0 %871 }
 0x13e   : > { %1634 = vmatprep.mubr.msk.bf16.mxu1 %vm1192_vm11, %v1152_v3  ;;  %v1136_v8 = vsel %vm1126_vm10, %v1103_v15, %v872_v0 }
 0x13f   : > { %1618 = vmatprep.mubr.msk.bf16.mxu0 %vm1192_vm11, %v1136_v8 }
 0x140   : > { %v553_v34 = vpop.permute.xlu1 %552 }
 0x141   : > { %v537_v5 = vpop.permute.xlu0 %536  ;;  %v925_v54 = vsel %vm895_vm3, %v2103_v59, %v553_v34 }
 0x142   : > { %v909_v42 = vsel %vm895_vm3, %v2109_v61, %v537_v5 }
 0x144   : > { %v890_v33 = vpop.permute.xlu1 %889 }
 0x145   : > { %v1154_v25 = vsel %vm1126_vm10, %v1121_v58, %v890_v33  ;;  %v874_v16 = vpop.permute.xlu0 %873 }
 0x146   : > { %1635 = vmatmul.mubr.msk.bf16.gmra.mxu1 %vm1192_vm11, %v1154_v25  ;;  %v1138_v40 = vsel %vm1126_vm10, %v1105_v41, %v874_v16  ;;  %v2511_v16 = vld [vmem:[#allocation2] ss:$0 sm:$0xff] }
 0x147   : > { %1619 = vmatmul.mubr.msk.bf16.gmra.mxu0 %vm1192_vm11, %v1138_v40 }
 0x148   : > { %v555_v49 = vpop.permute.xlu1 %554 }
 0x149   : > { %v539_v60 = vpop.permute.xlu0 %538  ;;  %v927_v11 = vsel %vm895_vm3, %v2165_v7, %v555_v49 }
 0x14a   : > { %v911_v3 = vsel %vm895_vm3, %v2177_v50, %v539_v60 }
 0x14c   : > { %v666_v28 = vpop.permute.xlu1 %665 }
 0x14d   : > { %v650_v2 = vpop.permute.xlu0 %649  ;;  %v958_v51 = vsel %vm928_vm4, %v925_v54, %v666_v28 }
 0x14e   : > { %v942_v45 = vsel %vm928_vm4, %v909_v42, %v650_v2 }
 0x150   : > { %v668_v35 = vpop.permute.xlu1 %667 }
 0x151   : > { %v652_v36 = vpop.permute.xlu0 %651  ;;  %v960_v26 = vsel %vm928_vm4, %v927_v11, %v668_v35 }
 0x152   : > { %v944_v29 = vsel %vm928_vm4, %v911_v3, %v652_v36 }
 0x154   : > { %v699_v62 = vpop.permute.xlu1 %698 }
 0x155   : > { %v683_v4 = vpop.permute.xlu0 %682  ;;  %v991_v12 = vsel %vm961_vm6, %v958_v51, %v699_v62 }
 0x156   : > { %v975_v18 = vsel %vm961_vm6, %v942_v45, %v683_v4 }
 0x158   : > { %v701_v30 = vpop.permute.xlu1 %700 }
 0x159   : > { %v685_v47 = vpop.permute.xlu0 %684  ;;  %v993_v27 = vsel %vm961_vm6, %v960_v26, %v701_v30 }
 0x15a   : > { %v977_v34 = vsel %vm961_vm6, %v944_v29, %v685_v47 }
 0x15c   : > { %v743_v22 = vpop.permute.xlu1 %742 }
 0x15d   : > { %v727_v38 = vpop.permute.xlu0 %726  ;;  %v1024_v46 = vsel %vm994_vm5, %v991_v12, %v743_v22 }
 0x15e   : > { %v1008_v53 = vsel %vm994_vm5, %v975_v18, %v727_v38 }
 0x160   : > { %v745_v13 = vpop.permute.xlu1 %744 }
 0x161   : > { %v729_v21 = vpop.permute.xlu0 %728  ;;  %v1026_v8 = vsel %vm994_vm5, %v993_v27, %v745_v13 }
 0x162   : > { %v1010_v19 = vsel %vm994_vm5, %v977_v34, %v729_v21 }
 0x164   : > { %v779_v32 = vpop.permute.xlu1 %778 }
 0x165   : > { %v763_v43 = vpop.permute.xlu0 %762  ;;  %v1057_v59 = vsel %vm1027_vm7, %v1024_v46, %v779_v32 }
 0x166   : > { %v1041_v15 = vsel %vm1027_vm7, %v1008_v53, %v763_v43 }
 0x168   : > { %v781_v1 = vpop.permute.xlu1 %780 }
 0x169   : > { %v765_v63 = vpop.permute.xlu0 %764  ;;  %v1059_v31 = vsel %vm1027_vm7, %v1026_v8, %v781_v1 }
 0x16a   : > { %v1043_v39 = vsel %vm1027_vm7, %v1010_v19, %v765_v63 }
 0x16c   : > { %v812_v9 = vpop.permute.xlu1 %811 }
 0x16d   : > { %v796_v24 = vpop.permute.xlu0 %795  ;;  %v1090_v61 = vsel %vm1060_vm8, %v1057_v59, %v812_v9 }
 0x16e   : > { %v1074_v44 = vsel %vm1060_vm8, %v1041_v15, %v796_v24 }
 0x170   : > { %v814_v56 = vpop.permute.xlu1 %813 }
 0x171   : > { %v798_v37 = vpop.permute.xlu0 %797  ;;  %v1092_v57 = vsel %vm1060_vm8, %v1059_v31, %v814_v56 }
 0x172   : > { %v1076_v58 = vsel %vm1060_vm8, %v1043_v39, %v798_v37 }
 0x174   : > { %v856_v55 = vpop.permute.xlu1 %855 }
 0x175   : > { %v840_v10 = vpop.permute.xlu0 %839  ;;  %v1123_v7 = vsel %vm1093_vm9, %v1090_v61, %v856_v55 }
 0x176   : > { %v1107_v50 = vsel %vm1093_vm9, %v1074_v44, %v840_v10 }
 0x178   : > { %v858_v23 = vpop.permute.xlu1 %857 }
 0x179   : > { %v842_v48 = vpop.permute.xlu0 %841  ;;  %v1125_v20 = vsel %vm1093_vm9, %v1092_v57, %v858_v23 }
 0x17a   : > { %v1109_v52 = vsel %vm1093_vm9, %v1076_v58, %v842_v48 }
 0x17c   : > { %v892_v0 = vpop.permute.xlu1 %891 }
 0x17d   : > { %v1156_v6 = vsel %vm1126_vm10, %v1123_v7, %v892_v0  ;;  %v876_v14 = vpop.permute.xlu0 %875 }
 0x17e   : > { %1638 = vmatprep.mubr.msk.bf16.mxu1 %vm1192_vm11, %v1156_v6  ;;  %v1140_v5 = vsel %vm1126_vm10, %v1107_v50, %v876_v14 }
 0x17f   : > { %1622 = vmatprep.mubr.msk.bf16.mxu0 %vm1192_vm11, %v1140_v5 }
 0x180   : > { %v894_v17 = vpop.permute.xlu1 %893 }
 0x181   : > { %v1158_v33 = vsel %vm1126_vm10, %v1125_v20, %v894_v17  ;;  %v878_v25 = vpop.permute.xlu0 %877 }
 0x182   : > { %1639 = vmatmul.mubr.msk.bf16.gmra.mxu1 %vm1192_vm11, %v1158_v33  ;;  %v1142_v41 = vsel %vm1126_vm10, %v1109_v52, %v878_v25 }
 0x183   : > { %1623 = vmatmul.mubr.msk.bf16.gmra.mxu0 %vm1192_vm11, %v1142_v41 }
 0x186   : > { %v1628_v40 = vpop.f32.mrf.mxu1 }
 0x187   : > { %v1336_v49 = vadd.f32 %v1628_v40, %v2511_v16  ;;  %v1612_v60 = vpop.f32.mrf.mxu0 }
 0x188   : > { %v1327_v28 = vpop.f32.mrf.mxu1  ;;  %v1272_v2 = vadd.f32 %v1612_v60, %v2511_v16 }
 0x189   : > { %1712 = vtanh.f32 %v1336_v49  ;;  %v1328_v35 = vadd.f32 %v2511_v16, %v1327_v28  ;;  %v1263_v36 = vpop.f32.mrf.mxu0 }
 0x18a   : > { %v1629_v62 = vpop.f32.mrf.mxu1  ;;  %1714 = vtanh.f32 %v1272_v2  ;;  %v1264_v4 = vadd.f32 %v2511_v16, %v1263_v36 }
 0x18b   : > { %v1339_v30 = vadd.f32 %v1629_v62, %v2511_v16  ;;  %1716 = vtanh.f32 %v1328_v35  ;;  %v1613_v47 = vpop.f32.mrf.mxu0 }
 0x18c   : > { %v1330_v22 = vpop.f32.mrf.mxu1  ;;  %1718 = vtanh.f32 %v1264_v4  ;;  %v1275_v38 = vadd.f32 %v1613_v47, %v2511_v16 }
 0x18d   : > { %v1331_v13 = vadd.f32 %v2511_v16, %v1330_v22  ;;  %1720 = vtanh.f32 %v1339_v30  ;;  %v1266_v21 = vpop.f32.mrf.mxu0 }
 0x18e   : > { %1722 = vtanh.f32 %v1275_v38  ;;  %v1267_v32 = vadd.f32 %v2511_v16, %v1266_v21 }
 0x18f   : > { %1724 = vtanh.f32 %v1331_v13 }
 0x190   : > { %1726 = vtanh.f32 %v1267_v32 }
 0x196   : > { %v1713_v43 = vpop.eup %1712 }
 0x197   : > { %1441 = vst.msk [vmem:[%s2525_s13 + $0x90] sm:$0xff] %vm1422_vm12, %v1713_v43  ;;  %v1715_v1 = vpop.eup %1714 }
 0x198   : > { %v1717_v63 = vpop.eup %1716  ;;  %1425 = vst.msk [vmem:[%s2525_s13 + $0x10] sm:$0xff] %vm1422_vm12, %v1715_v1 }
 0x199   : > { %v1719_v9 = vpop.eup %1718  ;;  %1439 = vst.msk [vmem:[%s2525_s13 + $0x80] sm:$0xff] %vm1422_vm12, %v1717_v63 }
 0x19a   : > { %v1721_v24 = vpop.eup %1720  ;;  %1423 = vst.msk [vmem:[%s2525_s13] sm:$0xff] %vm1422_vm12, %v1719_v9 }
 0x19b   : > { %v1723_v56 = vpop.eup %1722  ;;  %1442 = vst.msk [vmem:[%s2525_s13 + $0x98] sm:$0xff] %vm1422_vm12, %v1721_v24 }
 0x19c   : > { %v1725_v37 = vpop.eup %1724  ;;  %1426 = vst.msk [vmem:[%s2525_s13 + $0x18] sm:$0xff] %vm1422_vm12, %v1723_v56 }
 0x19d   : > { %v1727_v55 = vpop.eup %1726  ;;  %1440 = vst.msk [vmem:[%s2525_s13 + $0x88] sm:$0xff] %vm1422_vm12, %v1725_v37 }
 0x19e   : > { %1424 = vst.msk [vmem:[%s2525_s13 + $0x8] sm:$0xff] %vm1422_vm12, %v1727_v55 }
 0x1c6   : > { %v1632_v54 = vpop.f32.mrf.mxu1 }
 0x1c7   : > { %v1352_v10 = vadd.f32 %v1632_v54, %v2511_v16  ;;  %v1616_v51 = vpop.f32.mrf.mxu0 }
 0x1c8   : > { %v1343_v42 = vpop.f32.mrf.mxu1  ;;  %v1288_v12 = vadd.f32 %v1616_v51, %v2511_v16 }
 0x1c9   : > { %1728 = vtanh.f32 %v1352_v10  ;;  %v1344_v23 = vadd.f32 %v2511_v16, %v1343_v42  ;;  %v1279_v45 = vpop.f32.mrf.mxu0 }
 0x1ca   : > { %v1633_v46 = vpop.f32.mrf.mxu1  ;;  %1730 = vtanh.f32 %v1288_v12  ;;  %v1280_v11 = vadd.f32 %v2511_v16, %v1279_v45 }
 0x1cb   : > { %v1355_v18 = vadd.f32 %v1633_v46, %v2511_v16  ;;  %1732 = vtanh.f32 %v1344_v23  ;;  %v1617_v59 = vpop.f32.mrf.mxu0 }
 0x1cc   : > { %v1346_v48 = vpop.f32.mrf.mxu1  ;;  %1734 = vtanh.f32 %v1280_v11  ;;  %v1291_v26 = vadd.f32 %v1617_v59, %v2511_v16 }
 0x1cd   : > { %v1347_v53 = vadd.f32 %v2511_v16, %v1346_v48  ;;  %1736 = vtanh.f32 %v1355_v18  ;;  %v1282_v61 = vpop.f32.mrf.mxu0 }
 0x1ce   : > { %1738 = vtanh.f32 %v1291_v26  ;;  %v1283_v3 = vadd.f32 %v2511_v16, %v1282_v61 }
 0x1cf   : > { %1740 = vtanh.f32 %v1347_v53 }
 0x1d0   : > { %1742 = vtanh.f32 %v1283_v3 }
 0x1d6   : > { %v1729_v27 = vpop.eup %1728 }
 0x1d7   : > { %1445 = vst.msk [vmem:[%s2525_s13 + $0xb0] sm:$0xff] %vm1422_vm12, %v1729_v27  ;;  %v1731_v15 = vpop.eup %1730 }
 0x1d8   : > { %v1733_v7 = vpop.eup %1732  ;;  %1429 = vst.msk [vmem:[%s2525_s13 + $0x30] sm:$0xff] %vm1422_vm12, %v1731_v15 }
 0x1d9   : > { %v1735_v0 = vpop.eup %1734  ;;  %1443 = vst.msk [vmem:[%s2525_s13 + $0xa0] sm:$0xff] %vm1422_vm12, %v1733_v7 }
 0x1da   : > { %v1737_v29 = vpop.eup %1736  ;;  %1427 = vst.msk [vmem:[%s2525_s13 + $0x20] sm:$0xff] %vm1422_vm12, %v1735_v0 }
 0x1db   : > { %v1739_v8 = vpop.eup %1738  ;;  %1446 = vst.msk [vmem:[%s2525_s13 + $0xb8] sm:$0xff] %vm1422_vm12, %v1737_v29 }
 0x1dc   : > { %v1741_v44 = vpop.eup %1740  ;;  %1430 = vst.msk [vmem:[%s2525_s13 + $0x38] sm:$0xff] %vm1422_vm12, %v1739_v8 }
 0x1dd   : > { %v1743_v6 = vpop.eup %1742  ;;  %1444 = vst.msk [vmem:[%s2525_s13 + $0xa8] sm:$0xff] %vm1422_vm12, %v1741_v44 }
 0x1de   : > { %1428 = vst.msk [vmem:[%s2525_s13 + $0x28] sm:$0xff] %vm1422_vm12, %v1743_v6 }
 0x206   : > { %v1636_v34 = vpop.f32.mrf.mxu1 }
 0x207   : > { %v1368_v31 = vadd.f32 %v1636_v34, %v2511_v16  ;;  %v1620_v50 = vpop.f32.mrf.mxu0 }
 0x208   : > { %v1359_v14 = vpop.f32.mrf.mxu1  ;;  %v1304_v19 = vadd.f32 %v1620_v50, %v2511_v16 }
 0x209   : > { %1744 = vtanh.f32 %v1368_v31  ;;  %v1360_v57 = vadd.f32 %v2511_v16, %v1359_v14  ;;  %v1295_v5 = vpop.f32.mrf.mxu0 }
 0x20a   : > { %v1637_v39 = vpop.f32.mrf.mxu1  ;;  %1746 = vtanh.f32 %v1304_v19  ;;  %v1296_v20 = vadd.f32 %v2511_v16, %v1295_v5 }
 0x20b   : > { %v1371_v17 = vadd.f32 %v1637_v39, %v2511_v16  ;;  %1748 = vtanh.f32 %v1360_v57  ;;  %v1621_v58 = vpop.f32.mrf.mxu0 }
 0x20c   : > { %v1362_v33 = vpop.f32.mrf.mxu1  ;;  %1750 = vtanh.f32 %v1296_v20  ;;  %v1307_v52 = vadd.f32 %v1621_v58, %v2511_v16 }
 0x20d   : > { %v1363_v25 = vadd.f32 %v2511_v16, %v1362_v33  ;;  %1752 = vtanh.f32 %v1371_v17  ;;  %v1298_v41 = vpop.f32.mrf.mxu0 }
 0x20e   : > { %1754 = vtanh.f32 %v1307_v52  ;;  %v1299_v40 = vadd.f32 %v2511_v16, %v1298_v41 }
 0x20f   : > { %1756 = vtanh.f32 %v1363_v25 }
 0x210   : > { %1758 = vtanh.f32 %v1299_v40 }
 0x216   : > { %v1745_v49 = vpop.eup %1744 }
 0x217   : > { %1449 = vst.msk [vmem:[%s2525_s13 + $0xd0] sm:$0xff] %vm1422_vm12, %v1745_v49  ;;  %v1747_v60 = vpop.eup %1746 }
 0x218   : > { %v1749_v28 = vpop.eup %1748  ;;  %1433 = vst.msk [vmem:[%s2525_s13 + $0x50] sm:$0xff] %vm1422_vm12, %v1747_v60 }
 0x219   : > { %v1751_v2 = vpop.eup %1750  ;;  %1447 = vst.msk [vmem:[%s2525_s13 + $0xc0] sm:$0xff] %vm1422_vm12, %v1749_v28 }
 0x21a   : > { %v1753_v35 = vpop.eup %1752  ;;  %1431 = vst.msk [vmem:[%s2525_s13 + $0x40] sm:$0xff] %vm1422_vm12, %v1751_v2 }
 0x21b   : > { %v1755_v36 = vpop.eup %1754  ;;  %1450 = vst.msk [vmem:[%s2525_s13 + $0xd8] sm:$0xff] %vm1422_vm12, %v1753_v35 }
 0x21c   : > { %v1757_v62 = vpop.eup %1756  ;;  %1434 = vst.msk [vmem:[%s2525_s13 + $0x58] sm:$0xff] %vm1422_vm12, %v1755_v36 }
 0x21d   : > { %v1759_v4 = vpop.eup %1758  ;;  %1448 = vst.msk [vmem:[%s2525_s13 + $0xc8] sm:$0xff] %vm1422_vm12, %v1757_v62 }
 0x21e   : > { %1432 = vst.msk [vmem:[%s2525_s13 + $0x48] sm:$0xff] %vm1422_vm12, %v1759_v4 }
 0x242   : > { %v1640_v30 = vpop.f32.mrf.mxu1 }
 0x243   : > { %v1384_v47 = vadd.f32 %v1640_v30, %v2511_v16  ;;  %v1624_v22 = vpop.f32.mrf.mxu0 }
 0x244   : > { %v1375_v38 = vpop.f32.mrf.mxu1  ;;  %v1320_v13 = vadd.f32 %v1624_v22, %v2511_v16 }
 0x245   : > { %1760 = vtanh.f32 %v1384_v47  ;;  %v1376_v21 = vadd.f32 %v2511_v16, %v1375_v38  ;;  %v1311_v32 = vpop.f32.mrf.mxu0 }
 0x246   : > { %v1641_v43 = vpop.f32.mrf.mxu1  ;;  %1762 = vtanh.f32 %v1320_v13  ;;  %v1312_v1 = vadd.f32 %v2511_v16, %v1311_v32 }
 0x247   : > { %v1387_v63 = vadd.f32 %v1641_v43, %v2511_v16  ;;  %1764 = vtanh.f32 %v1376_v21  ;;  %v1625_v9 = vpop.f32.mrf.mxu0 }
 0x248   : > { %v1378_v24 = vpop.f32.mrf.mxu1  ;;  %1766 = vtanh.f32 %v1312_v1  ;;  %v1323_v56 = vadd.f32 %v1625_v9, %v2511_v16 }
 0x249   : > { %v1379_v37 = vadd.f32 %v2511_v16, %v1378_v24  ;;  %1768 = vtanh.f32 %v1387_v63  ;;  %v1314_v55 = vpop.f32.mrf.mxu0 }
 0x24a   : > { %1770 = vtanh.f32 %v1323_v56  ;;  %v1315_v54 = vadd.f32 %v2511_v16, %v1314_v55 }
 0x24b   : > { %1772 = vtanh.f32 %v1379_v37 }
 0x24c   : > { %1774 = vtanh.f32 %v1315_v54 }
 0x252   : > { %v1761_v10 = vpop.eup %1760 }
 0x253   : > { %1453 = vst.msk [vmem:[%s2525_s13 + $0xf0] sm:$0xff] %vm1422_vm12, %v1761_v10  ;;  %v1763_v51 = vpop.eup %1762 }
 0x254   : > { %v1765_v42 = vpop.eup %1764  ;;  %1437 = vst.msk [vmem:[%s2525_s13 + $0x70] sm:$0xff] %vm1422_vm12, %v1763_v51 }
 0x255   : > { %v1767_v12 = vpop.eup %1766  ;;  %1451 = vst.msk [vmem:[%s2525_s13 + $0xe0] sm:$0xff] %vm1422_vm12, %v1765_v42 }
 0x256   : > { %v1769_v23 = vpop.eup %1768  ;;  %1435 = vst.msk [vmem:[%s2525_s13 + $0x60] sm:$0xff] %vm1422_vm12, %v1767_v12 }
 0x257   : > { %v1771_v45 = vpop.eup %1770  ;;  %1454 = vst.msk [vmem:[%s2525_s13 + $0xf8] sm:$0xff] %vm1422_vm12, %v1769_v23 }
 0x258   : > { %v1773_v16 = vpop.eup %1772  ;;  %1438 = vst.msk [vmem:[%s2525_s13 + $0x78] sm:$0xff] %vm1422_vm12, %v1771_v45 }
 0x259   : > { %v1775_v46 = vpop.eup %1774  ;;  %1452 = vst.msk [vmem:[%s2525_s13 + $0xe8] sm:$0xff] %vm1422_vm12, %v1773_v16 }
 0x25a   : > { %1436 = vst.msk [vmem:[%s2525_s13 + $0x68] sm:$0xff] %vm1422_vm12, %v1775_v46 }
 0x25b PF: > { %s15_s14 = sadd.s32 1, %s1784_s14  }
 0x25c   : > { %p12_p4 = scmp.ge.s32.totalorder %s15_s14, 4  }
 0x25e   :  { %14 = sbr.rel (!%p12_p4) target bundleno = 3 (0x3), region = 63 }

// kernel: _lambda_.6
= control target key start
LH: loop header
LB: loop body
LE: loop exit
PB: predicated region body
PF: predicated region fallthrough
CT: control target
= control target key end

     0   :  { %s2768_s15 = smov 0   ;;  %s2770_s16 = smov 0   ;;  %s3982_s0 = inlined_call_operand.vmem [shape: bf16[2,18,18,16], index: 0, kind: input, shape index: {}]   ;;  %s3983_s1 = inlined_call_operand.vmem [shape: bf16[144,8], index: 1, kind: input, shape index: {}]   ;;  %s3984_s2 = inlined_call_operand.vmem [shape: f32[1,8], index: 2, kind: input, shape index: {}]   ;;  %s3985_s3 = inlined_call_operand.vmem [shape: f32[1,8], index: 3, kind: input, shape index: {}]   ;;  %s3986_s4 = inlined_call_operand.vmem [shape: bf16[2,256,8], index: 4, kind: output, shape index: {}]  }
   0x1   :  { %s2772_s17 = smov 0  }
   0x2 LB: > { %s26_s18 = sadd.s32 1, %s2729_s16  ;;  %p2338_p0 = scmp.ge.s32.totalorder %s2733_s17, 1  ;;  %s2733_s17 = sphi %s2772_s17, %s14_s17   ;;  %s2729_s16 = sphi %s2770_s16, %s4034_s16   ;;  %s2725_s15 = sphi %s2768_s15, %s4033_s15  }
   0x3   : > { %p28_p1 = scmp.ge.s32.totalorder %s26_s18, 2  ;;  %p201_p2 = scmp.lt.s32.totalorder %s2733_s17, 3 }
   0x5   : > { %s4036_s18 = smov (%p28_p1, %s26_s18), 0  ;;  %p202_p3 = pnand %p2338_p0, %p201_p2 }
   0x6   : > { %p240_p4 = scmp.lt.s32.totalorder (!%p202_p3), %s2725_s15, 1  ;;  %s2736_s29 = smov (!%p202_p3), 48  }
   0x7   : > { %205 = sbr.rel (%p202_p3) target bundleno = 673 (0x2a1), region = 36  ;;  %s2737_s6 = smov (!%p202_p3), 96  }
   0x8   : > { %s2738_s7 = smov (!%p202_p3), 32   ;;  %s2739_s10 = smov (!%p202_p3), 80  }
   0x9   : > { %s2740_s11 = smov (!%p202_p3), 64   ;;  %s2741_s12 = smov (!%p202_p3), 16  }
   0xa   : > { %s2742_s13 = smov (!%p202_p3), 112  }
   0xc   : > { %v2735_v0 = vmov 0   ;;  %s4038_s15 = smov (!%p240_p4, %s2725_s15), 1  ;;  %v2684_v1 = vld [vmem:[%s3983_s1 + $0x38] sm:$0xff]   ;;  %v2686_v2 = vld [vmem:[%s3983_s1 + $0x30] sm:$0xff]   ;;  %vm686_vm0 = vcmask 1046528   ;;  %v2689_v3 = vld [vmem:[%s3983_s1 + $0x28] sm:$0xff]  }
   0xd   : > { %1310 = vmatprep.subr.bf16.mxu0 %v2735_v0  ;;  %2613 = vmatprep.subr.bf16.mxu1 %v2735_v0  ;;  %s2631_s21 = smul.u32 216, %s4038_s15  ;;  %vm429_vm1 = vsmask.f32 7424  ;;  %v2691_v8 = vld [vmem:[%s3983_s1 + $0x20] sm:$0xff]   ;;  %v2692_v29 = vld [vmem:[%s3983_s1 + $0x18] sm:$0xff]   ;;  %v2693_v58 = vld [vmem:[%s3983_s1 + $0x10] sm:$0xff]  }
   0xe   : > { %1311 = vmatpush1.bf16.msra.mxu0 %v2684_v1  ;;  %2622 = vmatpush1.bf16.msra.mxu1 %v2684_v1  ;;  %v2694_v62 = vld [vmem:[%s3983_s1 + $0x8] sm:$0xff]   ;;  %vm961_vm2 = vcmask 130048   ;;  %vm994_vm3 = vcmask 261120   ;;  %vm1027_vm4 = vcmask 392192   ;;  %vm1060_vm5 = vcmask 523264  }
   0xf   : > { %1312 = vmatprep.subr.bf16.mxu0 %v2735_v0  ;;  %2614 = vmatprep.subr.bf16.mxu1 %v2735_v0  ;;  %s2802_s26 = scalar_lea.vmem %s3982_s0, %s2631_s21  ;;  %vm1093_vm6 = vcmask 654336   ;;  %vm1126_vm7 = vcmask 785408   ;;  %vm1159_vm8 = vcmask 916480   ;;  %vm3987_vm9 = vcmask 60416  }
  0x10   : > { %v2808_v4 = vld [vmem:[%s2802_s26 + $0xc] sm:$0xff]   ;;  %v2813_v5 = vld [vmem:[%s2802_s26] sm:$0xff]   ;;  %v2666_v6 = vld [vmem:[%s2802_s26 + $0x8] ss:$0 sps:$4 sm:$0x11]   ;;  %vm1632_vm10 = vcmask 64512  }
  0x11   : > { %768 = vrot.lane.b32.xlu1 %v2808_v4, %s2736_s29  ;;  %v2818_v7 = vld [vmem:[%s2802_s26 + $0x18] sm:$0xff]   ;;  %v687_v9 = vrot.slane %v2813_v5, 1  ;;  %v688_v10 = vrot.slane %v2666_v6, 1  ;;  %v2668_v11 = vld [vmem:[%s2802_s26 + $0x14] ss:$0 sps:$4 sm:$0x11]  }
  0x12   : > { %1313 = vmatpush1.bf16.msra.mxu0 %v2686_v2  ;;  %2623 = vmatpush1.bf16.msra.mxu1 %v2686_v2  ;;  %v690_v12 = vrot.slane %v2808_v4, 1  ;;  %v443_v13 = vshrl.u32 %v2808_v4, 16  ;;  %v445_v14 = vshll.u32 %v2808_v4, 16  ;;  %v431_v15 = vshrl.u32 %v2813_v5, 16  ;;  %v2841_v27 = vld [vmem:[%s2802_s26 + $0x24] sm:$0xff]   ;;  %v2875_v51 = vld [vmem:[%s2802_s26 + $0x30] sm:$0xff]  }
  0x13   : > { %1314 = vmatprep.subr.bf16.mxu0 %v2735_v0  ;;  %2615 = vmatprep.subr.bf16.mxu1 %v2735_v0  ;;  %v433_v16 = vshll.u32 %v2813_v5, 16  ;;  %v689_v17 = vsel %vm686_vm0, %v687_v9, %v688_v10  ;;  %v691_v18 = vrot.slane %v2668_v11, 1  ;;  %v450_v19 = vshll.u32 %v2668_v11, 16  ;;  %v2669_v22 = vld [vmem:[%s2802_s26 + $0x20] ss:$0 sps:$4 sm:$0x11]  }
  0x14   : > { %v438_v20 = vshll.u32 %v2666_v6, 16  ;;  %735 = vrot.lane.b32.xlu0 %v689_v17, %s2738_s7  ;;  %v447_v21 = vrot.slane %v445_v14, 1  ;;  %v457_v26 = vshll.u32 %v2818_v7, 16  ;;  %v2849_v30 = vld [vmem:[%s2802_s26 + $0x2c] ss:$0 sps:$4 sm:$0x11]  }
  0x15   : > { %881 = vrot.lane.b32.xlu1 %v2818_v7, %s2737_s6  ;;  %v692_v23 = vsel %vm686_vm0, %v690_v12, %v691_v18  ;;  %v452_v24 = vrot.slane %v450_v19, 1  ;;  %v435_v25 = vrot.slane %v433_v16, 1  ;;  %v455_v32 = vshrl.u32 %v2818_v7, 16  ;;  %v2878_v52 = vld [vmem:[%s2802_s26 + $0x80] ss:$0 sps:$4 sm:$0x11]  }
  0x16   : > { %1315 = vmatpush1.bf16.msra.mxu0 %v2689_v3  ;;  %2624 = vmatpush1.bf16.msra.mxu1 %v2689_v3  ;;  %v448_v28 = vor.u32 %v447_v21, %v443_v13  ;;  %v469_v33 = vshll.u32 %v2841_v27, 16  ;;  %v440_v35 = vrot.slane %v438_v20, 1  ;;  %v459_v36 = vrot.slane %v457_v26, 1  ;;  %v2882_v53 = vld [vmem:[%s2802_s26 + $0x78] sm:$0xff]   ;;  %v2909_v6 = vld [vmem:[%s2802_s26 + $0x60] sm:$0xff]  }
  0x17   : > { %1316 = vmatprep.subr.bf16.mxu0 %v2735_v0  ;;  %2616 = vmatprep.subr.bf16.mxu1 %v2735_v0  ;;  %v436_v34 = vor.u32 %v435_v25, %v431_v15  ;;  %v462_v37 = vshll.u32 %v2669_v22, 16  ;;  %v693_v38 = vrot.slane %v2818_v7, 1  ;;  %v694_v39 = vrot.slane %v2669_v22, 1  ;;  %v2673_v54 = vld [vmem:[%s2802_s26 + $0x38] ss:$0 sps:$4 sm:$0x11]  }
  0x18   : > { %848 = vrot.lane.b32.xlu0 %v692_v23, %s2739_s10  ;;  %v453_v31 = vsel %vm429_vm1, %v448_v28, %v452_v24  ;;  %v467_v40 = vshrl.u32 %v2841_v27, 16  ;;  %v471_v41 = vrot.slane %v469_v33, 1  ;;  %v474_v42 = vshll.u32 %v2849_v30, 16  ;;  %v2902_v2 = vld [vmem:[%s2802_s26 + $0x3c] sm:$0xff]  }
  0x19   : > { %770 = vrot.lane.b32.xlu1 %v2818_v7, %s2736_s29  ;;  %v441_v43 = vsel %vm429_vm1, %v436_v34, %v440_v35  ;;  %v460_v44 = vor.u32 %v459_v36, %v455_v32  ;;  %v464_v45 = vrot.slane %v462_v37, 1  ;;  %v695_v46 = vsel %vm686_vm0, %v693_v38, %v694_v39  ;;  %v2906_v3 = vld [vmem:[%s2802_s26 + $0x44] ss:$0 sps:$4 sm:$0x11]   ;;  %v2958_v32 = vld [vmem:[%s2802_s26 + $0x6c] sm:$0xff]  }
  0x1a   : > { %1317 = vmatpush1.bf16.msra.mxu0 %v2691_v8  ;;  %2625 = vmatpush1.bf16.msra.mxu1 %v2691_v8  ;;  %v472_v47 = vor.u32 %v471_v41, %v467_v40  ;;  %v476_v48 = vrot.slane %v474_v42, 1  ;;  %v481_v55 = vshll.u32 %v2875_v51, 16  ;;  %v717_v56 = vrot.slane %v2882_v53, 1  ;;  %v2695_v9 = vld [vmem:[%s3983_s1] sm:$0xff]  }
  0x1b   : > { %1318 = vmatprep.subr.bf16.mxu0 %v2735_v0  ;;  %2617 = vmatprep.subr.bf16.mxu1 %v2735_v0  ;;  %v465_v49 = vsel %vm429_vm1, %v460_v44, %v464_v45  ;;  %v718_v57 = vrot.slane %v2878_v52, 1  ;;  %v696_v59 = vrot.slane %v2841_v27, 1  ;;  %v697_v60 = vrot.slane %v2849_v30, 1  ;;  %v2677_v15 = vld [vmem:[%s2802_s26 + $0x68] ss:$0 sps:$4 sm:$0x11]  }
  0x1c   : > { %737 = vrot.lane.b32.xlu0 %v692_v23, %s2738_s7  ;;  %v477_v50 = vsel %vm429_vm1, %v472_v47, %v476_v48  ;;  %v479_v61 = vshrl.u32 %v2875_v51, 16  ;;  %v483_v63 = vrot.slane %v481_v55, 1  ;;  %v486_v1 = vshll.u32 %v2673_v54, 16  ;;  %2387 = vmatprep.mubr.msk.bf16.mxu0 %vm961_vm2, %v695_v46  ;;  %v2697_v19 = vld [vmem:[%s3983_s1 + $0x40] sm:$0xff]   ;;  %v2989_v48 = vld [vmem:[%s2802_s26 + $0x48] sm:$0xff]  }
  0x1d   : > { %812 = vrot.lane.b32.xlu1 %v453_v31, %s2740_s11  ;;  %v2912_v8 = vsel %vm686_vm0, %v717_v56, %v718_v57  ;;  %v493_v10 = vshll.u32 %v2902_v2, 16  ;;  %v2928_v11 = vsel %vm686_vm0, %v696_v59, %v697_v60  ;;  %v498_v14 = vshll.u32 %v2906_v3, 16  ;;  %v2679_v36 = vld [vmem:[%s2802_s26 + $0x74] ss:$0 sps:$4 sm:$0x11]  }
  0x1e   : > { %1319 = vmatpush1.bf16.msra.mxu0 %v2692_v29  ;;  %2626 = vmatpush1.bf16.msra.mxu1 %v2692_v29  ;;  %v484_v12 = vor.u32 %v483_v63, %v479_v61  ;;  %v488_v13 = vrot.slane %v486_v1, 1  ;;  %v699_v16 = vrot.slane %v2875_v51, 1  ;;  %v700_v17 = vrot.slane %v2673_v54, 1 }
  0x1f   : > { %1320 = vmatprep.subr.bf16.mxu0 %v2735_v0  ;;  %2618 = vmatprep.subr.bf16.mxu1 %v2735_v0  ;;  %v529_v18 = vshll.u32 %v2909_v6, 16  ;;  %v491_v20 = vshrl.u32 %v2902_v2, 16  ;;  %v495_v21 = vrot.slane %v493_v10, 1  ;;  %v500_v23 = vrot.slane %v498_v14, 1 }
  0x20   : > { %622 = vrot.lane.b32.xlu0 %v441_v43, %s2741_s12  ;;  %2395 = vmatprep.mubr.msk.bf16.mxu1 %vm961_vm2, %v2912_v8  ;;  %v489_v22 = vsel %vm429_vm1, %v484_v12, %v488_v13  ;;  %v527_v24 = vshrl.u32 %v2909_v6, 16  ;;  %v534_v26 = vshll.u32 %v2677_v15, 16  ;;  %v2950_v28 = vsel %vm686_vm0, %v699_v16, %v700_v17  ;;  %v3027_v13 = vld [vmem:[%s2802_s26 + $0x84] sm:$0xff]   ;;  %v2688_v14 = vld [vmem:[%s2802_s26 + $0x8c] ss:$0 sps:$4 sm:$0x11]  }
  0x21   : > { %624 = vrot.lane.b32.xlu1 %v453_v31, %s2741_s12  ;;  %v531_v25 = vrot.slane %v529_v18, 1  ;;  %v496_v29 = vor.u32 %v495_v21, %v491_v20  ;;  %v711_v34 = vrot.slane %v2909_v6, 1  ;;  %v712_v35 = vrot.slane %v2677_v15, 1  ;;  %v3036_v16 = vld [vmem:[%s2802_s26 + $0x54] sm:$0xff]  }
  0x22   : > { %1321 = vmatpush1.bf16.msra.mxu0 %v2693_v58  ;;  %2627 = vmatpush1.bf16.msra.mxu1 %v2693_v58  ;;  %v536_v31 = vrot.slane %v534_v26, 1  ;;  %v541_v37 = vshll.u32 %v2958_v32, 16  ;;  %v539_v39 = vshrl.u32 %v2958_v32, 16  ;;  %v546_v41 = vshll.u32 %v2679_v36, 16 }
  0x23   : > { %1322 = vmatprep.subr.bf16.mxu0 %v2735_v0  ;;  %2619 = vmatprep.subr.bf16.mxu1 %v2735_v0  ;;  %v532_v30 = vor.u32 %v531_v25, %v527_v24  ;;  %v2973_v38 = vsel %vm686_vm0, %v711_v34, %v712_v35  ;;  %v714_v45 = vrot.slane %v2958_v32, 1  ;;  %v553_v47 = vshll.u32 %v2882_v53, 16  ;;  %v2683_v58 = vld [vmem:[%s2802_s26 + $0x50] ss:$0 sps:$4 sm:$0x11]  }
  0x24   : > { %925 = vrot.lane.b32.xlu0 %v465_v49, %s2742_s13  ;;  %v543_v40 = vrot.slane %v541_v37, 1  ;;  %v548_v43 = vrot.slane %v546_v41, 1  ;;  %v558_v55 = vshll.u32 %v2878_v52, 16  ;;  %v702_v56 = vrot.slane %v2902_v2, 1 }
  0x25   : > { %850 = vrot.lane.b32.xlu1 %v695_v46, %s2739_s10  ;;  %v2963_v33 = vsel %vm429_vm1, %v532_v30, %v536_v31  ;;  %v555_v54 = vrot.slane %v553_v47, 1  ;;  %v703_v57 = vrot.slane %v2906_v3, 1  ;;  %v505_v59 = vshll.u32 %v2989_v48, 16 }
  0x26   : > { %1323 = vmatpush1.bf16.msra.mxu0 %v2694_v62  ;;  %2628 = vmatpush1.bf16.msra.mxu1 %v2694_v62  ;;  %v544_v42 = vor.u32 %v543_v40, %v539_v39  ;;  %v560_v61 = vrot.slane %v558_v55, 1  ;;  %v503_v52 = vshrl.u32 %v2989_v48, 16  ;;  %v510_v1 = vshll.u32 %v2683_v58, 16  ;;  %v3073_v39 = vld [vmem:[%s2802_s26 + $0x90] sm:$0xff]  }
  0x27   : > { %1324 = vmatprep.subr.bf16.mxu0 %v2735_v0  ;;  %2620 = vmatprep.subr.bf16.mxu1 %v2735_v0  ;;  %v3008_v62 = vsel %vm686_vm0, %v702_v56, %v703_v57  ;;  %v507_v63 = vrot.slane %v505_v59, 1  ;;  %v565_v15 = vshll.u32 %v3027_v13, 16  ;;  %v563_v17 = vshrl.u32 %v3027_v13, 16 }
  0x28   : > { %814 = vrot.lane.b32.xlu0 %v465_v49, %s2740_s11  ;;  %v2984_v44 = vsel %vm429_vm1, %v544_v42, %v548_v43  ;;  %v512_v10 = vrot.slane %v510_v1, 1  ;;  %v705_v20 = vrot.slane %v2989_v48, 1  ;;  %v706_v21 = vrot.slane %v2683_v58, 1 }
  0x29   : > { %927 = vrot.lane.b32.xlu1 %v477_v50, %s2742_s13  ;;  %v567_v18 = vrot.slane %v565_v15, 1  ;;  %v720_v42 = vrot.slane %v3027_v13, 1  ;;  %v721_v43 = vrot.slane %v2688_v14, 1  ;;  %v708_v58 = vrot.slane %v3036_v16, 1 }
  0x2a   : > { %1325 = vmatpush1.bf16.msra.mxu0 %v2695_v9  ;;  %2629 = vmatpush1.bf16.msra.mxu1 %v2695_v9  ;;  %v508_v9 = vor.u32 %v507_v63, %v503_v52  ;;  %v3049_v26 = vsel %vm686_vm0, %v705_v20, %v706_v21 }
  0x2b   : > { %1340 = vmatprep.subr.bf16.mxu0 %v2735_v0  ;;  %2621 = vmatprep.subr.bf16.mxu1 %v2735_v0  ;;  %v501_v0 = vsel %vm429_vm1, %v496_v29, %v500_v23  ;;  %v517_v23 = vshll.u32 %v3036_v16, 16  ;;  %v568_v24 = vor.u32 %v567_v18, %v563_v17  ;;  %v515_v29 = vshrl.u32 %v3036_v16, 16 }
  0x2c   : > { %883 = vrot.lane.b32.xlu0 %v2841_v27, %s2737_s6  ;;  %v513_v12 = vsel %vm429_vm1, %v508_v9, %v512_v10 }
  0x2d   : > { %739 = vrot.lane.b32.xlu1 %v695_v46, %s2738_s7  ;;  %v715_v46 = vrot.slane %v2679_v36, 1 }
  0x2e   : > { %1341 = vmatpush2.bf16.msra.mxu0 %v2697_v19  ;;  %2630 = vmatpush2.bf16.msra.mxu1 %v2697_v19  ;;  %v570_v19 = vshll.u32 %v2688_v14, 16 }
  0x30   : > { %626 = vrot.lane.b32.xlu0 %v465_v49, %s2741_s12  ;;  %v2996_v49 = vsel %vm686_vm0, %v714_v45, %v715_v46  ;;  %v572_v25 = vrot.slane %v570_v19, 1  ;;  %v3081_v45 = vld [vmem:[%s2802_s26 + $0x98] ss:$0 sps:$4 sm:$0x11]   ;;  %v577_v46 = vshll.u32 %v3073_v39, 16 }
  0x31   : > { %816 = vrot.lane.b32.xlu1 %v477_v50, %s2740_s11  ;;  %v582_v56 = vshll.u32 %v3081_v45, 16 }
  0x32   : > { %v3057_v31 = vsel %vm429_vm1, %v568_v24, %v572_v25  ;;  %v579_v55 = vrot.slane %v577_v46, 1 }
  0x33   : > { %v584_v52 = vrot.slane %v582_v56, 1 }
  0x34   : > { %772 = vrot.lane.b32.xlu0 %v2841_v27, %s2736_s29 }
  0x35   : > { %885 = vrot.lane.b32.xlu1 %v2875_v51, %s2737_s6 }
  0x38   : > { %852 = vrot.lane.b32.xlu0 %v2928_v11, %s2739_s10 }
  0x39   : > { %628 = vrot.lane.b32.xlu1 %v477_v50, %s2741_s12  ;;  %v551_v50 = vshrl.u32 %v2882_v53, 16 }
  0x3b   : > { %v556_v60 = vor.u32 %v555_v54, %v551_v50  ;;  %v3089_v50 = vsel %vm686_vm0, %v720_v42, %v721_v43  ;;  %v575_v54 = vshrl.u32 %v3073_v39, 16  ;;  %v3152_v42 = vld [vmem:[%s2802_s26 + $0xa4] ss:$0 sps:$4 sm:$0x11]  }
  0x3c   : > { %929 = vrot.lane.b32.xlu0 %v489_v22, %s2742_s13 }
  0x3d   : > { %774 = vrot.lane.b32.xlu1 %v2875_v51, %s2736_s29  ;;  %v561_v3 = vsel %vm429_vm1, %v556_v60, %v560_v61  ;;  %v580_v61 = vor.u32 %v579_v55, %v575_v54  ;;  %v594_v55 = vshll.u32 %v3152_v42, 16 }
  0x3f   : > { %v3111_v14 = vsel %vm429_vm1, %v580_v61, %v584_v52  ;;  %v596_v61 = vrot.slane %v594_v55, 1 }
  0x40   : > { %741 = vrot.lane.b32.xlu0 %v2928_v11, %s2738_s7 }
  0x41   : > { %854 = vrot.lane.b32.xlu1 %v2950_v28, %s2739_s10 }
  0x44   : > { %818 = vrot.lane.b32.xlu0 %v489_v22, %s2740_s11 }
  0x45   : > { %931 = vrot.lane.b32.xlu1 %v501_v0, %s2742_s13 }
  0x48   : > { %887 = vrot.lane.b32.xlu0 %v2902_v2, %s2737_s6 }
  0x49   : > { %638 = vrot.lane.b32.xlu1 %v2963_v33, %s2741_s12 }
  0x4c   : > { %630 = vrot.lane.b32.xlu0 %v489_v22, %s2741_s12  ;;  %v2690_v22 = vld [vmem:[%s2802_s26 + $0x5c] ss:$0 sps:$4 sm:$0x11]  }
  0x4d   : > { %751 = vrot.lane.b32.xlu1 %v2973_v38, %s2738_s7  ;;  %v522_v30 = vshll.u32 %v2690_v22, 16  ;;  %v709_v59 = vrot.slane %v2690_v22, 1 }
  0x4f   : > { %v524_v35 = vrot.slane %v522_v30, 1  ;;  %v3099_v1 = vsel %vm686_vm0, %v708_v58, %v709_v59 }
  0x50   : > { %743 = vrot.lane.b32.xlu0 %v2950_v28, %s2738_s7 }
  0x51   : > { %784 = vrot.lane.b32.xlu1 %v2958_v32, %s2736_s29 }
  0x54   : > { %776 = vrot.lane.b32.xlu0 %v2902_v2, %s2736_s29 }
  0x55   : > { %828 = vrot.lane.b32.xlu1 %v2984_v44, %s2740_s11 }
  0x58   : > { %820 = vrot.lane.b32.xlu0 %v501_v0, %s2740_s11 }
  0x59   : > { %864 = vrot.lane.b32.xlu1 %v2996_v49, %s2739_s10 }
  0x5c   : > { %856 = vrot.lane.b32.xlu0 %v3008_v62, %s2739_s10 }
  0x5d   : > { %897 = vrot.lane.b32.xlu1 %v2882_v53, %s2737_s6 }
  0x60   : > { %889 = vrot.lane.b32.xlu0 %v2989_v48, %s2737_s6 }
  0x61   : > { %941 = vrot.lane.b32.xlu1 %v561_v3, %s2742_s13 }
  0x64   : > { %933 = vrot.lane.b32.xlu0 %v513_v12, %s2742_s13 }
  0x65   : > { %640 = vrot.lane.b32.xlu1 %v2984_v44, %s2741_s12 }
  0x68   : > { %632 = vrot.lane.b32.xlu0 %v501_v0, %s2741_s12  ;;  %v519_v0 = vrot.slane %v517_v23, 1 }
  0x69   : > { %753 = vrot.lane.b32.xlu1 %v2996_v49, %s2738_s7 }
  0x6a   : > { %v520_v34 = vor.u32 %v519_v0, %v515_v29 }
  0x6c   : > { %745 = vrot.lane.b32.xlu0 %v3008_v62, %s2738_s7  ;;  %v3064_v36 = vsel %vm429_vm1, %v520_v34, %v524_v35  ;;  %v3139_v35 = vld [vmem:[%s2802_s26 + $0x9c] sm:$0xff]  }
  0x6d   : > { %786 = vrot.lane.b32.xlu1 %v2882_v53, %s2736_s29  ;;  %v589_v43 = vshll.u32 %v3139_v35, 16 }
  0x6f   : > { %v591_v54 = vrot.slane %v589_v43, 1 }
  0x70   : > { %778 = vrot.lane.b32.xlu0 %v2989_v48, %s2736_s29 }
  0x71   : > { %830 = vrot.lane.b32.xlu1 %v561_v3, %s2740_s11 }
  0x74   : > { %822 = vrot.lane.b32.xlu0 %v513_v12, %s2740_s11 }
  0x75   : > { %866 = vrot.lane.b32.xlu1 %v2912_v8, %s2739_s10 }
  0x78   : > { %858 = vrot.lane.b32.xlu0 %v3049_v26, %s2739_s10 }
  0x79   : > { %899 = vrot.lane.b32.xlu1 %v3027_v13, %s2737_s6 }
  0x7c   : > { %891 = vrot.lane.b32.xlu0 %v3036_v16, %s2737_s6 }
  0x7d   : > { %943 = vrot.lane.b32.xlu1 %v3057_v31, %s2742_s13 }
  0x80   : > { %935 = vrot.lane.b32.xlu0 %v3064_v36, %s2742_s13 }
  0x81   : > { %642 = vrot.lane.b32.xlu1 %v561_v3, %s2741_s12 }
  0x83   : > { %v769_v37 = vpop.permute.xlu1 %768 }
  0x84   : > { %634 = vrot.lane.b32.xlu0 %v513_v12, %s2741_s12 }
  0x85   : > { %755 = vrot.lane.b32.xlu1 %v2912_v8, %s2738_s7 }
  0x86   : > { %v736_v41 = vpop.permute.xlu0 %735 }
  0x87   : > { %v882_v40 = vpop.permute.xlu1 %881 }
  0x88   : > { %747 = vrot.lane.b32.xlu0 %v3049_v26, %s2738_s7 }
  0x89   : > { %788 = vrot.lane.b32.xlu1 %v3027_v13, %s2736_s29 }
  0x8a   : > { %v849_v47 = vpop.permute.xlu0 %848 }
  0x8b   : > { %v771_v8 = vpop.permute.xlu1 %770 }
  0x8c   : > { %780 = vrot.lane.b32.xlu0 %v3036_v16, %s2736_s29 }
  0x8d   : > { %832 = vrot.lane.b32.xlu1 %v3057_v31, %s2740_s11 }
  0x8e   : > { %v738_v60 = vpop.permute.xlu0 %737 }
  0x8f   : > { %v813_v57 = vpop.permute.xlu1 %812 }
  0x90   : > { %824 = vrot.lane.b32.xlu0 %v3064_v36, %s2740_s11 }
  0x91   : > { %868 = vrot.lane.b32.xlu1 %v3089_v50, %s2739_s10 }
  0x92   : > { %v623_v3 = vpop.permute.xlu0 %622 }
  0x93   : > { %v625_v63 = vpop.permute.xlu1 %624  ;;  %v963_v9 = vsel %vm961_vm2, %v2813_v5, %v623_v3 }
  0x94   : > { %v996_v10 = vsel %vm994_vm3, %v963_v9, %v736_v41  ;;  %v965_v12 = vsel %vm961_vm2, %v2808_v4, %v625_v63  ;;  %860 = vrot.lane.b32.xlu0 %v3099_v1, %s2739_s10  ;;  %v724_v41 = vrot.slane %v3081_v45, 1  ;;  %v587_v45 = vshrl.u32 %v3139_v35, 16 }
  0x95   : > { %901 = vrot.lane.b32.xlu1 %v3073_v39, %s2737_s6  ;;  %v1029_v15 = vsel %vm1027_vm4, %v996_v10, %v769_v37  ;;  %v998_v19 = vsel %vm994_vm3, %v965_v12, %v738_v60 }
  0x96   : > { %v926_v5 = vpop.permute.xlu0 %925  ;;  %v1062_v18 = vsel %vm1060_vm5, %v1029_v15, %v813_v57  ;;  %v1031_v23 = vsel %vm1027_vm4, %v998_v19, %v771_v8  ;;  %v592_v60 = vor.u32 %v591_v54, %v587_v45 }
  0x97   : > { %v851_v17 = vpop.permute.xlu1 %850  ;;  %v1095_v4 = vsel %vm1093_vm6, %v1062_v18, %v849_v47  ;;  %v3188_v18 = vld [vmem:[%s2802_s26 + $0xa8] sm:$0xff]  }
  0x98   : > { %893 = vrot.lane.b32.xlu0 %v2909_v6, %s2737_s6  ;;  %v1128_v20 = vsel %vm1126_vm7, %v1095_v4, %v882_v40  ;;  %v597_v10 = vsel %vm429_vm1, %v592_v60, %v596_v61 }
  0x99   : > { %945 = vrot.lane.b32.xlu1 %v3111_v14, %s2742_s13  ;;  %v1161_v21 = vsel %vm1159_vm8, %v1128_v20, %v926_v5  ;;  %v2702_v20 = vld [vmem:[%s2802_s26 + $0xb0] ss:$0 sps:$4 sm:$0x11]  }
  0x9a   : > { %1343 = vmatmul.mubr.bf16.vlgmr.msra.gmra.mxu0 %v1161_v21  ;;  %v815_v24 = vpop.permute.xlu0 %814  ;;  %v601_v21 = vshll.u32 %v3188_v18, 16 }
  0x9b   : > { %v928_v22 = vpop.permute.xlu1 %927  ;;  %v1064_v25 = vsel %vm1060_vm5, %v1031_v23, %v815_v24  ;;  %2388 = vmatprep.mubr.msk.bf16.mxu0 %vm961_vm2, %v2928_v11 }
  0x9c   : > { %937 = vrot.lane.b32.xlu0 %v2963_v33, %s2742_s13  ;;  %v1097_v0 = vsel %vm1093_vm6, %v1064_v25, %v851_v17 }
  0x9d   : > { %644 = vrot.lane.b32.xlu1 %v3057_v31, %s2741_s12 }
  0x9e   : > { %v884_v30 = vpop.permute.xlu0 %883 }
  0x9f   : > { %v740_v29 = vpop.permute.xlu1 %739  ;;  %v1130_v34 = vsel %vm1126_vm7, %v1097_v0, %v884_v30  ;;  %v727_v30 = vrot.slane %v3152_v42, 1 }
  0xa0   : > { %636 = vrot.lane.b32.xlu0 %v3064_v36, %s2741_s12  ;;  %v1164_v31 = vsel %vm1159_vm8, %v1130_v34, %v928_v22  ;;  %v723_v36 = vrot.slane %v3073_v39, 1  ;;  %v599_v34 = vshrl.u32 %v3188_v18, 16 }
  0xa1   : > { %757 = vrot.lane.b32.xlu1 %v3089_v50, %s2738_s7 }
  0xa2   : > { %1351 = vmatmul.mubr.bf16.gmra.mxu0 %v1164_v31  ;;  %v627_v37 = vpop.permute.xlu0 %626  ;;  %v603_v31 = vrot.slane %v601_v21, 1 }
  0xa3   : > { %v817_v11 = vpop.permute.xlu1 %816  ;;  %v967_v40 = vsel %vm961_vm2, %v2818_v7, %v627_v37  ;;  %2389 = vmatprep.mubr.msk.bf16.mxu0 %vm961_vm2, %v2950_v28  ;;  %v3162_v28 = vsel %vm686_vm0, %v723_v36, %v724_v41 }
  0xa4   : > { %749 = vrot.lane.b32.xlu0 %v3099_v1, %s2738_s7  ;;  %v1000_v7 = vsel %vm994_vm3, %v967_v40, %v740_v29  ;;  %v726_v29 = vrot.slane %v3139_v35, 1  ;;  %v604_v42 = vor.u32 %v603_v31, %v599_v34  ;;  %v3271_v34 = vld [vmem:[%s2802_s26 + $0xcc] sm:$0xff]  }
  0xa5   : > { %790 = vrot.lane.b32.xlu1 %v3073_v39, %s2736_s29 }
  0xa6   : > { %v773_v8 = vpop.permute.xlu0 %772  ;;  %v3221_v41 = vsel %vm686_vm0, %v726_v29, %v727_v30 }
  0xa7   : > { %v886_v46 = vpop.permute.xlu1 %885  ;;  %v1033_v47 = vsel %vm1027_vm4, %v1000_v7, %v773_v8  ;;  %v730_v7 = vrot.slane %v2702_v20, 1 }
  0xa8   : > { %782 = vrot.lane.b32.xlu0 %v2909_v6, %s2736_s29  ;;  %v1066_v57 = vsel %vm1060_vm5, %v1033_v47, %v817_v11  ;;  %v606_v11 = vshll.u32 %v2702_v20, 16 }
  0xa9   : > { %834 = vrot.lane.b32.xlu1 %v3111_v14, %s2740_s11 }
  0xaa   : > { %v853_v58 = vpop.permute.xlu0 %852  ;;  %v608_v43 = vrot.slane %v606_v11, 1 }
  0xab   : > { %v629_v56 = vpop.permute.xlu1 %628  ;;  %v1099_v59 = vsel %vm1093_vm6, %v1066_v57, %v853_v58 }
  0xac   : > { %826 = vrot.lane.b32.xlu0 %v2963_v33, %s2740_s11  ;;  %v1132_v3 = vsel %vm1126_vm7, %v1099_v59, %v886_v46  ;;  %v969_v12 = vsel %vm961_vm2, %v2841_v27, %v629_v56  ;;  %v609_v55 = vsel %vm429_vm1, %v604_v42, %v608_v43  ;;  %v3280_v42 = vld [vmem:[%s2802_s26 + $0xd4] ss:$0 sps:$4 sm:$0x11]   ;;  %v916_v43 = vshll.u32 %v3271_v34, 16 }
  0xad   : > { %870 = vrot.lane.b32.xlu1 %v3162_v28, %s2739_s10 }
  0xae   : > { %v930_v63 = vpop.permute.xlu0 %929 }
  0xaf   : > { %v775_v52 = vpop.permute.xlu1 %774  ;;  %v1167_v9 = vsel %vm1159_vm8, %v1132_v3, %v930_v63 }
  0xb0   : > { %862 = vrot.lane.b32.xlu0 %v2973_v38, %s2739_s10  ;;  %1359 = vmatmul.mubr.bf16.gmra.mxu0 %v1167_v9 }
  0xb1   : > { %903 = vrot.lane.b32.xlu1 %v3139_v35, %s2737_s6  ;;  %2390 = vmatprep.mubr.msk.bf16.mxu0 %vm961_vm2, %v3008_v62 }
  0xb2   : > { %v742_v15 = vpop.permute.xlu0 %741 }
  0xb3   : > { %v855_v33 = vpop.permute.xlu1 %854  ;;  %v1002_v17 = vsel %vm994_vm3, %v969_v12, %v742_v15 }
  0xb4   : > { %895 = vrot.lane.b32.xlu0 %v2958_v32, %s2737_s6  ;;  %v1035_v19 = vsel %vm1027_vm4, %v1002_v17, %v775_v52 }
  0xb5   : > { %947 = vrot.lane.b32.xlu1 %v597_v10, %s2742_s13 }
  0xb6   : > { %v819_v4 = vpop.permute.xlu0 %818 }
  0xb7   : > { %v932_v5 = vpop.permute.xlu1 %931  ;;  %v1068_v62 = vsel %vm1060_vm5, %v1035_v19, %v819_v4  ;;  %v2705_v19 = vld [vmem:[%s2802_s26 + $0xc0] sm:$0xff]  }
  0xb8   : > { %939 = vrot.lane.b32.xlu0 %v2984_v44, %s2742_s13  ;;  %v1101_v22 = vsel %vm1093_vm6, %v1068_v62, %v855_v33  ;;  %v3206_v44 = vld [vmem:[%s2802_s26 + $0xb4] sm:$0xff]   ;;  %v801_v11 = vshrl.u32 %v2705_v19, 16 }
  0xb9   : > { %759 = vrot.lane.b32.xlu1 %v3162_v28, %s2738_s7  ;;  %v613_v40 = vshll.u32 %v3206_v44, 16  ;;  %v611_v8 = vshrl.u32 %v3206_v44, 16  ;;  %v732_v30 = vrot.slane %v3206_v44, 1 }
  0xba   : > { %v888_v23 = vpop.permute.xlu0 %887 }
  0xbb   : > { %v639_v27 = vpop.permute.xlu1 %638  ;;  %v1134_v24 = vsel %vm1126_vm7, %v1101_v22, %v888_v23  ;;  %v615_v47 = vrot.slane %v613_v40, 1  ;;  %v2706_v23 = vld [vmem:[%s2802_s26 + $0xc8] ss:$0 sps:$4 sm:$0x11]  }
  0xbc   : > { %646 = vrot.lane.b32.xlu0 %v3111_v14, %s2741_s12  ;;  %v1170_v25 = vsel %vm1159_vm8, %v1134_v24, %v932_v5  ;;  %v3217_v14 = vld [vmem:[%s2802_s26 + $0xbc] ss:$0 sps:$4 sm:$0x11]   ;;  %v979_v61 = vsel %vm961_vm2, %v2909_v6, %v639_v27  ;;  %v803_v24 = vshll.u32 %v2705_v19, 16  ;;  %v808_v40 = vshll.u32 %v2706_v23, 16  ;;  %s2469_s26 = sshll.u32 %s4038_s15, 7 }
  0xbd   : > { %836 = vrot.lane.b32.xlu1 %v597_v10, %s2740_s11  ;;  %1367 = vmatmul.mubr.bf16.gmra.mxu0 %v1170_v25  ;;  %v618_v45 = vshll.u32 %v3217_v14, 16  ;;  %v616_v58 = vor.u32 %v615_v47, %v611_v8  ;;  %v733_v31 = vrot.slane %v3217_v14, 1  ;;  %v846_v47 = vrot.slane %v2706_v23, 1 }
  0xbe   : > { %v631_v37 = vpop.permute.xlu0 %630  ;;  %2391 = vmatprep.mubr.msk.bf16.mxu0 %vm961_vm2, %v3049_v26  ;;  %v729_v26 = vrot.slane %v3188_v18, 1 }
  0xbf   : > { %v752_v0 = vpop.permute.xlu1 %751  ;;  %v620_v59 = vrot.slane %v618_v45, 1  ;;  %v971_v15 = vsel %vm961_vm2, %v2875_v51, %v631_v37  ;;  %v805_v37 = vrot.slane %v803_v24, 1  ;;  %v914_v45 = vshrl.u32 %v3271_v34, 16 }
  0xc0   : > { %792 = vrot.lane.b32.xlu0 %v3139_v35, %s2736_s29  ;;  %v3234_v57 = vsel %vm686_vm0, %v729_v26, %v730_v7  ;;  %v1012_v3 = vsel %vm994_vm3, %v979_v61, %v752_v0  ;;  %v3284_v26 = vsel %vm686_vm0, %v732_v30, %v733_v31  ;;  %v810_v7 = vrot.slane %v808_v40, 1 }
  0xc1   : > { %905 = vrot.lane.b32.xlu1 %v3188_v18, %s2737_s6  ;;  %v621_v63 = vsel %vm429_vm1, %v616_v58, %v620_v59  ;;  %v806_v14 = vor.u32 %v805_v37, %v801_v11 }
  0xc2   : > { %v744_v46 = vpop.permute.xlu0 %743 }
  0xc3   : > { %v785_v36 = vpop.permute.xlu1 %784  ;;  %v1004_v4 = vsel %vm994_vm3, %v971_v15, %v744_v46  ;;  %v811_v58 = vsel %vm429_vm1, %v806_v14, %v810_v7 }
  0xc4   : > { %872 = vrot.lane.b32.xlu0 %v3221_v41, %s2739_s10 }
  0xc5   : > { %648 = vrot.lane.b32.xlu1 %v597_v10, %s2741_s12  ;;  %v1045_v10 = vsel %vm1027_vm4, %v1012_v3, %v785_v36 }
  0xc6   : > { %v777_v56 = vpop.permute.xlu0 %776 }
  0xc7   : > { %v829_v54 = vpop.permute.xlu1 %828  ;;  %v1037_v20 = vsel %vm1027_vm4, %v1004_v4, %v777_v56 }
  0xc8   : > { %949 = vrot.lane.b32.xlu0 %v609_v55, %s2742_s13  ;;  %v1078_v12 = vsel %vm1060_vm5, %v1045_v10, %v829_v54  ;;  %v918_v54 = vrot.slane %v916_v43, 1 }
  0xc9   : > { %794 = vrot.lane.b32.xlu1 %v3188_v18, %s2736_s29 }
  0xca   : > { %v821_v52 = vpop.permute.xlu0 %820  ;;  %v919_v61 = vor.u32 %v918_v54, %v914_v45 }
  0xcb   : > { %v865_v60 = vpop.permute.xlu1 %864  ;;  %v1070_v21 = vsel %vm1060_vm5, %v1037_v20, %v821_v52 }
  0xcc   : > { %761 = vrot.lane.b32.xlu0 %v3221_v41, %s2738_s7  ;;  %v1111_v6 = vsel %vm1093_vm6, %v1078_v12, %v865_v60 }
  0xcd   : > { %874 = vrot.lane.b32.xlu1 %v3234_v57, %s2739_s10 }
  0xce   : > { %v857_v33 = vpop.permute.xlu0 %856 }
  0xcf   : > { %v898_v9 = vpop.permute.xlu1 %897  ;;  %v1103_v51 = vsel %vm1093_vm6, %v1070_v21, %v857_v33 }
  0xd0   : > { %838 = vrot.lane.b32.xlu0 %v609_v55, %s2740_s11  ;;  %v1144_v17 = vsel %vm1126_vm7, %v1111_v6, %v898_v9 }
  0xd1   : > { %951 = vrot.lane.b32.xlu1 %v621_v63, %s2742_s13 }
  0xd2   : > { %v890_v62 = vpop.permute.xlu0 %889 }
  0xd3   : > { %v942_v5 = vpop.permute.xlu1 %941  ;;  %v1136_v25 = vsel %vm1126_vm7, %v1103_v51, %v890_v62 }
  0xd4   : > { %v1185_v27 = vsel %vm1159_vm8, %v1144_v17, %v942_v5  ;;  %907 = vrot.lane.b32.xlu0 %v3206_v44, %s2737_s6 }
  0xd5   : > { %1407 = vmatmul.mubr.bf16.vlgmr.msra.gmra.mxu1 %v1185_v27  ;;  %763 = vrot.lane.b32.xlu1 %v3234_v57, %s2738_s7 }
  0xd6   : > { %2396 = vmatprep.mubr.msk.bf16.mxu1 %vm961_vm2, %v3089_v50  ;;  %v934_v29 = vpop.permute.xlu0 %933 }
  0xd7   : > { %v641_v22 = vpop.permute.xlu1 %640  ;;  %v1173_v0 = vsel %vm1159_vm8, %v1136_v25, %v934_v29 }
  0xd8   : > { %650 = vrot.lane.b32.xlu0 %v609_v55, %s2741_s12  ;;  %1375 = vmatmul.mubr.bf16.gmra.mxu0 %v1173_v0  ;;  %v921_v55 = vshll.u32 %v3280_v42, 16  ;;  %v981_v3 = vsel %vm961_vm2, %v2958_v32, %v641_v22 }
  0xd9   : > { %840 = vrot.lane.b32.xlu1 %v621_v63, %s2740_s11  ;;  %2392 = vmatprep.mubr.msk.bf16.mxu0 %vm961_vm2, %v3099_v1  ;;  %v845_v1 = vrot.slane %v2705_v19, 1 }
  0xda   : > { %v633_v36 = vpop.permute.xlu0 %632  ;;  %v923_v52 = vrot.slane %v921_v55, 1 }
  0xdb   : > { %v754_v50 = vpop.permute.xlu1 %753  ;;  %v3295_v60 = vsel %vm686_vm0, %v845_v1, %v846_v47  ;;  %v973_v5 = vsel %vm961_vm2, %v2902_v2, %v633_v36 }
  0xdc   : > { %796 = vrot.lane.b32.xlu0 %v3206_v44, %s2736_s29  ;;  %v924_v10 = vsel %vm429_vm1, %v919_v61, %v923_v52  ;;  %v1014_v33 = vsel %vm994_vm3, %v981_v3, %v754_v50 }
  0xdd   : > { %909 = vrot.lane.b32.xlu1 %v2705_v19, %s2737_s6 }
  0xde   : > { %v746_v8 = vpop.permute.xlu0 %745 }
  0xdf   : > { %v787_v46 = vpop.permute.xlu1 %786  ;;  %v1006_v62 = vsel %vm994_vm3, %v973_v5, %v746_v8 }
  0xe0   : > { %876 = vrot.lane.b32.xlu0 %v3284_v26, %s2739_s10  ;;  %v1047_v6 = vsel %vm1027_vm4, %v1014_v33, %v787_v46 }
  0xe1   : > { %652 = vrot.lane.b32.xlu1 %v621_v63, %s2741_s12 }
  0xe2   : > { %v779_v59 = vpop.permute.xlu0 %778 }
  0xe3   : > { %v831_v56 = vpop.permute.xlu1 %830  ;;  %v1039_v21 = vsel %vm1027_vm4, %v1006_v62, %v779_v59 }
  0xe4   : > { %953 = vrot.lane.b32.xlu0 %v811_v58, %s2742_s13  ;;  %v1080_v17 = vsel %vm1060_vm5, %v1047_v6, %v831_v56 }
  0xe5   : > { %798 = vrot.lane.b32.xlu1 %v2705_v19, %s2736_s29  ;;  %s3400_s29 = scalar_lea.vmem %s3986_s4, %s2469_s26 }
  0xe6   : > { %v823_v9 = vpop.permute.xlu0 %822 }
  0xe7   : > { %v867_v63 = vpop.permute.xlu1 %866  ;;  %v1072_v51 = vsel %vm1060_vm5, %v1039_v21, %v823_v9 }
  0xe8   : > { %765 = vrot.lane.b32.xlu0 %v3284_v26, %s2738_s7  ;;  %v1113_v32 = vsel %vm1093_vm6, %v1080_v17, %v867_v63 }
  0xe9   : > { %878 = vrot.lane.b32.xlu1 %v3295_v60, %s2739_s10 }
  0xea   : > { %v859_v15 = vpop.permute.xlu0 %858 }
  0xeb   : > { %v900_v12 = vpop.permute.xlu1 %899  ;;  %v1105_v2 = vsel %vm1093_vm6, %v1072_v51, %v859_v15 }
  0xec   : > { %842 = vrot.lane.b32.xlu0 %v811_v58, %s2740_s11  ;;  %v1146_v19 = vsel %vm1126_vm7, %v1113_v32, %v900_v12 }
  0xed   : > { %955 = vrot.lane.b32.xlu1 %v924_v10, %s2742_s13 }
  0xee   : > { %v892_v27 = vpop.permute.xlu0 %891 }
  0xef   : > { %v944_v4 = vpop.permute.xlu1 %943  ;;  %v1138_v23 = vsel %vm1126_vm7, %v1105_v2, %v892_v27 }
  0xf0   : > { %v1188_v20 = vsel %vm1159_vm8, %v1146_v19, %v944_v4  ;;  %911 = vrot.lane.b32.xlu0 %v3271_v34, %s2737_s6 }
  0xf1   : > { %1415 = vmatmul.mubr.bf16.gmra.mxu1 %v1188_v20 }
  0xf2   : > { %2397 = vmatprep.mubr.msk.bf16.mxu1 %vm961_vm2, %v3162_v28  ;;  %v936_v24 = vpop.permute.xlu0 %935 }
  0xf3   : > { %v643_v22 = vpop.permute.xlu1 %642  ;;  %v1176_v25 = vsel %vm1159_vm8, %v1138_v23, %v936_v24 }
  0xf4   : > { %1383 = vmatmul.mubr.bf16.gmra.mxu0 %v1176_v25  ;;  %v983_v28 = vsel %vm961_vm2, %v2882_v53, %v643_v22 }
  0xf5   : > { %2393 = vmatprep.mubr.msk.bf16.mxu0 %vm961_vm2, %v2973_v38 }
  0xf6   : > { %v635_v0 = vpop.permute.xlu0 %634 }
  0xf7   : > { %v756_v29 = vpop.permute.xlu1 %755  ;;  %v975_v8 = vsel %vm961_vm2, %v2989_v48, %v635_v0 }
  0xf8   : > { %v1016_v36 = vsel %vm994_vm3, %v983_v28, %v756_v29 }
  0xfa   : > { %v748_v50 = vpop.permute.xlu0 %747 }
  0xfb   : > { %v789_v30 = vpop.permute.xlu1 %788  ;;  %v1008_v45 = vsel %vm994_vm3, %v975_v8, %v748_v50 }
  0xfc   : > { %v1049_v46 = vsel %vm1027_vm4, %v1016_v36, %v789_v30 }
  0xfe   : > { %v781_v11 = vpop.permute.xlu0 %780 }
  0xff   : > { %v833_v31 = vpop.permute.xlu1 %832  ;;  %v1041_v55 = vsel %vm1027_vm4, %v1008_v45, %v781_v11 }
 0x100   : > { %v1082_v7 = vsel %vm1060_vm5, %v1049_v46, %v833_v31 }
 0x102   : > { %v825_v40 = vpop.permute.xlu0 %824 }
 0x103   : > { %v869_v37 = vpop.permute.xlu1 %868  ;;  %v1074_v56 = vsel %vm1060_vm5, %v1041_v55, %v825_v40 }
 0x104   : > { %v1115_v38 = vsel %vm1093_vm6, %v1082_v7, %v869_v37 }
 0x106   : > { %v861_v14 = vpop.permute.xlu0 %860 }
 0x107   : > { %v902_v43 = vpop.permute.xlu1 %901  ;;  %v1107_v58 = vsel %vm1093_vm6, %v1074_v56, %v861_v14 }
 0x108   : > { %v1148_v1 = vsel %vm1126_vm7, %v1115_v38, %v902_v43 }
 0x10a   : > { %v894_v53 = vpop.permute.xlu0 %893 }
 0x10b   : > { %v946_v47 = vpop.permute.xlu1 %945  ;;  %v1140_v48 = vsel %vm1126_vm7, %v1107_v58, %v894_v53 }
 0x10c   : > { %v1191_v54 = vsel %vm1159_vm8, %v1148_v1, %v946_v47 }
 0x10d   : > { %1423 = vmatmul.mubr.bf16.gmra.mxu1 %v1191_v54 }
 0x10e   : > { %2398 = vmatprep.mubr.msk.bf16.mxu1 %vm961_vm2, %v3221_v41  ;;  %v938_v61 = vpop.permute.xlu0 %937 }
 0x10f   : > { %v645_v59 = vpop.permute.xlu1 %644  ;;  %v1179_v52 = vsel %vm1159_vm8, %v1140_v48, %v938_v61 }
 0x110   : > { %1391 = vmatmul.mubr.bf16.gmra.mxu0 %v1179_v52  ;;  %v985_v41 = vsel %vm961_vm2, %v3027_v13, %v645_v59 }
 0x111   : > { %2394 = vmatprep.mubr.msk.bf16.mxu0 %vm961_vm2, %v2996_v49 }
 0x112   : > { %v637_v3 = vpop.permute.xlu0 %636 }
 0x113   : > { %v758_v63 = vpop.permute.xlu1 %757  ;;  %v977_v62 = vsel %vm961_vm2, %v3036_v16, %v637_v3 }
 0x114   : > { %v1018_v17 = vsel %vm994_vm3, %v985_v41, %v758_v63  ;;  %v958_v41 = vrot.slane %v3271_v34, 1 }
 0x116   : > { %v750_v10 = vpop.permute.xlu0 %749 }
 0x117   : > { %v791_v9 = vpop.permute.xlu1 %790  ;;  %v1010_v21 = vsel %vm994_vm3, %v977_v62, %v750_v10 }
 0x118   : > { %v1051_v5 = vsel %vm1027_vm4, %v1018_v17, %v791_v9 }
 0x11a   : > { %v783_v12 = vpop.permute.xlu0 %782 }
 0x11b   : > { %v835_v33 = vpop.permute.xlu1 %834  ;;  %v1043_v2 = vsel %vm1027_vm4, %v1010_v21, %v783_v12 }
 0x11c   : > { %v1084_v4 = vsel %vm1060_vm5, %v1051_v5, %v835_v33 }
 0x11e   : > { %v827_v15 = vpop.permute.xlu0 %826 }
 0x11f   : > { %v871_v6 = vpop.permute.xlu1 %870  ;;  %v1076_v22 = vsel %vm1060_vm5, %v1043_v2, %v827_v15  ;;  %v959_v15 = vrot.slane %v3280_v42, 1 }
 0x120   : > { %v1117_v49 = vsel %vm1093_vm6, %v1084_v4, %v871_v6 }
 0x121   : > { %v960_v5 = vsel %vm686_vm0, %v958_v41, %v959_v15 }
 0x122   : > { %v863_v19 = vpop.permute.xlu0 %862 }
 0x123   : > { %v904_v32 = vpop.permute.xlu1 %903  ;;  %v1109_v23 = vsel %vm1093_vm6, %v1076_v22, %v863_v19 }
 0x124   : > { %v1150_v27 = vsel %vm1126_vm7, %v1117_v49, %v904_v32 }
 0x126   : > { %v896_v13 = vpop.permute.xlu0 %895 }
 0x127   : > { %v948_v20 = vpop.permute.xlu1 %947  ;;  %v1142_v16 = vsel %vm1126_vm7, %v1109_v23, %v896_v13 }
 0x128   : > { %v1194_v51 = vsel %vm1159_vm8, %v1150_v27, %v948_v20 }
 0x129   : > { %1431 = vmatmul.mubr.bf16.gmra.mxu1 %v1194_v51 }
 0x12a   : > { %2399 = vmatprep.mubr.msk.bf16.mxu1 %vm961_vm2, %v3234_v57  ;;  %v940_v25 = vpop.permute.xlu0 %939 }
 0x12b   : > { %v760_v24 = vpop.permute.xlu1 %759  ;;  %v1182_v29 = vsel %vm1159_vm8, %v1142_v16, %v940_v25 }
 0x12c   : > { %1399 = vmatmul.mubr.bf16.gmra.mxu0 %v1182_v29 }
 0x12e   : > { %v647_v30 = vpop.permute.xlu0 %646 }
 0x12f   : > { %v837_v0 = vpop.permute.xlu1 %836  ;;  %v987_v50 = vsel %vm961_vm2, %v3073_v39, %v647_v30 }
 0x130   : > { %v1020_v11 = vsel %vm994_vm3, %v987_v50, %v760_v24 }
 0x132   : > { %v793_v37 = vpop.permute.xlu0 %792 }
 0x133   : > { %v906_v31 = vpop.permute.xlu1 %905  ;;  %v1053_v57 = vsel %vm1027_vm4, %v1020_v11, %v793_v37 }
 0x134   : > { %v1086_v40 = vsel %vm1060_vm5, %v1053_v57, %v837_v0 }
 0x136   : > { %v873_v36 = vpop.permute.xlu0 %872 }
 0x137   : > { %v649_v28 = vpop.permute.xlu1 %648  ;;  %v1119_v43 = vsel %vm1093_vm6, %v1086_v40, %v873_v36 }
 0x138   : > { %v1152_v14 = vsel %vm1126_vm7, %v1119_v43, %v906_v31  ;;  %v989_v8 = vsel %vm961_vm2, %v3139_v35, %v649_v28 }
 0x13a   : > { %v950_v7 = vpop.permute.xlu0 %949 }
 0x13b   : > { %v795_v46 = vpop.permute.xlu1 %794  ;;  %v1197_v38 = vsel %vm1159_vm8, %v1152_v14, %v950_v7 }
 0x13c   : > { %1439 = vmatmul.mubr.bf16.gmra.mxu1 %v1197_v38 }
 0x13d   : > { %2400 = vmatprep.mubr.msk.bf16.mxu1 %vm961_vm2, %v3284_v26 }
 0x13e   : > { %v762_v1 = vpop.permute.xlu0 %761 }
 0x13f   : > { %v875_v39 = vpop.permute.xlu1 %874  ;;  %v1022_v47 = vsel %vm994_vm3, %v989_v8, %v762_v1 }
 0x140   : > { %v1055_v53 = vsel %vm1027_vm4, %v1022_v47, %v795_v46 }
 0x142   : > { %v839_v54 = vpop.permute.xlu0 %838 }
 0x143   : > { %v952_v45 = vpop.permute.xlu1 %951  ;;  %v1088_v55 = vsel %vm1060_vm5, %v1055_v53, %v839_v54 }
 0x144   : > { %v1121_v58 = vsel %vm1093_vm6, %v1088_v55, %v875_v39 }
 0x146   : > { %v908_v59 = vpop.permute.xlu0 %907 }
 0x147   : > { %v764_v56 = vpop.permute.xlu1 %763  ;;  %v1154_v48 = vsel %vm1126_vm7, %v1121_v58, %v908_v59 }
 0x148   : > { %v1200_v26 = vsel %vm1159_vm8, %v1154_v48, %v952_v45 }
 0x149   : > { %1447 = vmatmul.mubr.bf16.gmra.mxu1 %v1200_v26 }
 0x14a   : > { %v651_v35 = vpop.permute.xlu0 %650  ;;  %2401 = vmatprep.mubr.msk.bf16.mxu1 %vm961_vm2, %v3295_v60 }
 0x14b   : > { %v841_v61 = vpop.permute.xlu1 %840  ;;  %v991_v52 = vsel %vm961_vm2, %v3188_v18, %v651_v35 }
 0x14c   : > { %v1024_v3 = vsel %vm994_vm3, %v991_v52, %v764_v56 }
 0x14e   : > { %v797_v9 = vpop.permute.xlu0 %796 }
 0x14f   : > { %v910_v63 = vpop.permute.xlu1 %909  ;;  %v1057_v10 = vsel %vm1027_vm4, %v1024_v3, %v797_v9 }
 0x150   : > { %v1090_v12 = vsel %vm1060_vm5, %v1057_v10, %v841_v61 }
 0x152   : > { %v877_v6 = vpop.permute.xlu0 %876 }
 0x153   : > { %v653_v33 = vpop.permute.xlu1 %652  ;;  %v1123_v60 = vsel %vm1093_vm6, %v1090_v12, %v877_v6 }
 0x154   : > { %v1156_v32 = vsel %vm1126_vm7, %v1123_v60, %v910_v63  ;;  %v993_v34 = vsel %vm961_vm2, %v3206_v44, %v653_v33 }
 0x156   : > { %v954_v18 = vpop.permute.xlu0 %953 }
 0x157   : > { %v799_v17 = vpop.permute.xlu1 %798  ;;  %v1203_v19 = vsel %vm1159_vm8, %v1156_v32, %v954_v18 }
 0x158   : > { %1455 = vmatmul.mubr.bf16.gmra.mxu1 %v1203_v19 }
 0x159   : > { %2402 = vmatprep.mubr.msk.bf16.mxu1 %vm961_vm2, %v960_v5 }
 0x15a   : > { %v1344_v42 = vpop.f32.mrf.mxu0  ;;  %v766_v4 = vpop.permute.xlu0 %765 }
 0x15b   : > { %v2470_v49 = vpack.c.bf16 %v1344_v42, %v1344_v42  ;;  %v1026_v62 = vsel %vm994_vm3, %v993_v34, %v766_v4  ;;  %v879_v27 = vpop.permute.xlu1 %878  ;;  %v1703_v21 = vmul.f32 %v1344_v42, %v1344_v42  ;;  %v1633_v13 = vsel %vm1632_vm10, %v1344_v42, 0.0 }
 0x15c   : > { %v1346_v20 = vpop.f32.mrf.mxu0  ;;  %v1059_v51 = vsel %vm1027_vm4, %v1026_v62, %v799_v17 }
 0x15d   : > { %1600 = vst.msk [vmem:[%s3400_s29] sm:$0xf] %vm3987_vm9, %v2470_v49  ;;  %v1735_v0 = vsel %vm1632_vm10, %v1703_v21, 0.0 }
 0x15e   : > { %v1347_v2 = vpop.f32.mrf.mxu0  ;;  %v843_v22 = vpop.permute.xlu0 %842 }
 0x15f   : > { %v2471_v44 = vpack.c.bf16 %v1347_v2, %v1347_v2  ;;  %v1634_v23 = vsel %vm1632_vm10, %v1347_v2, 0.0  ;;  %v1704_v24 = vmul.f32 %v1347_v2, %v1347_v2  ;;  %v1092_v16 = vsel %vm1060_vm5, %v1059_v51, %v843_v22  ;;  %v956_v50 = vpop.permute.xlu1 %955 }
 0x160   : > { %v1635_v25 = vadd.f32 %v1634_v23, %v1633_v13  ;;  %v1349_v29 = vpop.f32.mrf.mxu0  ;;  %v1125_v11 = vsel %vm1093_vm6, %v1092_v16, %v879_v27 }
 0x161   : > { %1601 = vst.msk [vmem:[%s3400_s29 + $0x4] sm:$0xf] %vm3987_vm9, %v2471_v44  ;;  %v1736_v30 = vsel %vm1632_vm10, %v1704_v24, 0.0 }
 0x162   : > { %v1737_v31 = vadd.f32 %v1736_v30, %v1735_v0  ;;  %v1352_v37 = vpop.f32.mrf.mxu0  ;;  %v912_v57 = vpop.permute.xlu0 %911 }
 0x163   : > { %v2472_v28 = vpack.c.bf16 %v1352_v37, %v1352_v37  ;;  %v1636_v40 = vsel %vm1632_vm10, %v1352_v37, 0.0  ;;  %v1705_v36 = vmul.f32 %v1352_v37, %v1352_v37  ;;  %v1158_v43 = vsel %vm1126_vm7, %v1125_v11, %v912_v57 }
 0x164   : > { %v1637_v46 = vadd.f32 %v1636_v40, %v1635_v25  ;;  %v1354_v14 = vpop.f32.mrf.mxu0  ;;  %v1206_v7 = vsel %vm1159_vm8, %v1158_v43, %v956_v50 }
 0x165   : > { %1602 = vst.msk [vmem:[%s3400_s29 + $0x8] sm:$0xf] %vm3987_vm9, %v2472_v28  ;;  %v1738_v38 = vsel %vm1632_vm10, %v1705_v36, 0.0  ;;  %1463 = vmatmul.mubr.bf16.gmra.mxu1 %v1206_v7 }
 0x166   : > { %v1739_v39 = vadd.f32 %v1738_v38, %v1737_v31  ;;  %v1355_v8 = vpop.f32.mrf.mxu0 }
 0x167   : > { %v2473_v1 = vpack.c.bf16 %v1355_v8, %v1355_v8  ;;  %v1638_v47 = vsel %vm1632_vm10, %v1355_v8, 0.0  ;;  %v1706_v45 = vmul.f32 %v1355_v8, %v1355_v8 }
 0x168   : > { %v1639_v53 = vadd.f32 %v1638_v47, %v1637_v46  ;;  %v1357_v54 = vpop.f32.mrf.mxu0 }
 0x169   : > { %1603 = vst.msk [vmem:[%s3400_s29 + $0xc] sm:$0xf] %vm3987_vm9, %v2473_v1  ;;  %v1740_v55 = vsel %vm1632_vm10, %v1706_v45, 0.0 }
 0x16a   : > { %v1741_v56 = vadd.f32 %v1740_v55, %v1739_v39 }
 0x170   : > { %v1360_v58 = vpop.f32.mrf.mxu0 }
 0x171   : > { %v2474_v59 = vpack.c.bf16 %v1360_v58, %v1360_v58  ;;  %v1640_v48 = vsel %vm1632_vm10, %v1360_v58, 0.0  ;;  %v1707_v61 = vmul.f32 %v1360_v58, %v1360_v58 }
 0x172   : > { %v1641_v26 = vadd.f32 %v1640_v48, %v1639_v53  ;;  %v1362_v35 = vpop.f32.mrf.mxu0 }
 0x173   : > { %1604 = vst.msk [vmem:[%s3400_s29 + $0x10] sm:$0xf] %vm3987_vm9, %v2474_v59  ;;  %v1742_v52 = vsel %vm1632_vm10, %v1707_v61, 0.0 }
 0x174   : > { %v1363_v63 = vpop.f32.mrf.mxu0  ;;  %v1743_v3 = vadd.f32 %v1742_v52, %v1741_v56 }
 0x175   : > { %v2475_v9 = vpack.c.bf16 %v1363_v63, %v1363_v63  ;;  %v1642_v10 = vsel %vm1632_vm10, %v1363_v63, 0.0  ;;  %v1708_v33 = vmul.f32 %v1363_v63, %v1363_v63 }
 0x176   : > { %v1643_v12 = vadd.f32 %v1642_v10, %v1641_v26  ;;  %v1365_v6 = vpop.f32.mrf.mxu0 }
 0x177   : > { %1605 = vst.msk [vmem:[%s3400_s29 + $0x14] sm:$0xf] %vm3987_vm9, %v2475_v9  ;;  %v1744_v41 = vsel %vm1632_vm10, %v1708_v33, 0.0 }
 0x178   : > { %v1745_v15 = vadd.f32 %v1744_v41, %v1743_v3 }
 0x17d   : > { %v1368_v60 = vpop.f32.mrf.mxu0 }
 0x17e   : > { %v2476_v17 = vpack.c.bf16 %v1368_v60, %v1368_v60  ;;  %v1644_v32 = vsel %vm1632_vm10, %v1368_v60, 0.0  ;;  %v1709_v18 = vmul.f32 %v1368_v60, %v1368_v60 }
 0x17f   : > { %v1645_v5 = vadd.f32 %v1644_v32, %v1643_v12  ;;  %v1370_v19 = vpop.f32.mrf.mxu0 }
 0x180   : > { %1606 = vst.msk [vmem:[%s3400_s29 + $0x18] sm:$0xf] %vm3987_vm9, %v2476_v17  ;;  %v1746_v34 = vsel %vm1632_vm10, %v1709_v18, 0.0 }
 0x181   : > { %v1747_v42 = vadd.f32 %v1746_v34, %v1745_v15  ;;  %v1371_v4 = vpop.f32.mrf.mxu0 }
 0x182   : > { %v2477_v49 = vpack.c.bf16 %v1371_v4, %v1371_v4  ;;  %v1646_v62 = vsel %vm1632_vm10, %v1371_v4, 0.0  ;;  %v1710_v27 = vmul.f32 %v1371_v4, %v1371_v4 }
 0x183   : > { %v1647_v20 = vadd.f32 %v1646_v62, %v1645_v5  ;;  %v1373_v21 = vpop.f32.mrf.mxu0 }
 0x184   : > { %1607 = vst.msk [vmem:[%s3400_s29 + $0x1c] sm:$0xf] %vm3987_vm9, %v2477_v49  ;;  %v1748_v13 = vsel %vm1632_vm10, %v1710_v27, 0.0 }
 0x185   : > { %v1749_v51 = vadd.f32 %v1748_v13, %v1747_v42 }
 0x195   : > { %v3442_v2 = vpop.f32.mrf.mxu1 }
 0x196   : > { %v2486_v22 = vpack.c.bf16 %v3442_v2, %v3442_v2 }
 0x197   : > { %v1410_v44 = vpop.f32.mrf.mxu1 }
 0x198   : > { %1616 = vst.msk [vmem:[%s3400_s29 + $0x40] sm:$0xf] %vm3987_vm9, %v2486_v22  ;;  %v1376_v24 = vpop.f32.mrf.mxu0 }
 0x199   : > { %v3448_v23 = vpop.f32.mrf.mxu1  ;;  %v2478_v25 = vpack.c.bf16 %v1376_v24, %v1376_v24  ;;  %v1648_v29 = vsel %vm1632_vm10, %v1376_v24, 0.0  ;;  %v1711_v0 = vmul.f32 %v1376_v24, %v1376_v24 }
 0x19a   : > { %v2487_v16 = vpack.c.bf16 %v3448_v23, %v3448_v23  ;;  %v1649_v50 = vadd.f32 %v1648_v29, %v1647_v20  ;;  %v1378_v31 = vpop.f32.mrf.mxu0 }
 0x19b   : > { %v1413_v30 = vpop.f32.mrf.mxu1  ;;  %1608 = vst.msk [vmem:[%s3400_s29 + $0x20] sm:$0xf] %vm3987_vm9, %v2478_v25  ;;  %v1750_v11 = vsel %vm1632_vm10, %v1711_v0, 0.0 }
 0x19c   : > { %1617 = vst.msk [vmem:[%s3400_s29 + $0x44] sm:$0xf] %vm3987_vm9, %v2487_v16  ;;  %v1751_v37 = vadd.f32 %v1750_v11, %v1749_v51  ;;  %v1379_v57 = vpop.f32.mrf.mxu0 }
 0x19d   : > { %v2479_v28 = vpack.c.bf16 %v1379_v57, %v1379_v57  ;;  %v1650_v40 = vsel %vm1632_vm10, %v1379_v57, 0.0  ;;  %v1712_v36 = vmul.f32 %v1379_v57, %v1379_v57 }
 0x19e   : > { %v1651_v43 = vadd.f32 %v1650_v40, %v1649_v50  ;;  %v1381_v46 = vpop.f32.mrf.mxu0 }
 0x19f   : > { %1609 = vst.msk [vmem:[%s3400_s29 + $0x24] sm:$0xf] %vm3987_vm9, %v2479_v28  ;;  %v1752_v14 = vsel %vm1632_vm10, %v1712_v36, 0.0 }
 0x1a0   : > { %v1753_v7 = vadd.f32 %v1752_v14, %v1751_v37 }
 0x1b1   : > { %v3462_v38 = vpop.f32.mrf.mxu1 }
 0x1b2   : > { %v2488_v39 = vpack.c.bf16 %v3462_v38, %v3462_v38 }
 0x1b3   : > { %v1418_v8 = vpop.f32.mrf.mxu1 }
 0x1b4   : > { %1618 = vst.msk [vmem:[%s3400_s29 + $0x48] sm:$0xf] %vm3987_vm9, %v2488_v39  ;;  %v1384_v47 = vpop.f32.mrf.mxu0 }
 0x1b5   : > { %v3468_v1 = vpop.f32.mrf.mxu1  ;;  %v2480_v53 = vpack.c.bf16 %v1384_v47, %v1384_v47  ;;  %v1652_v54 = vsel %vm1632_vm10, %v1384_v47, 0.0  ;;  %v1713_v55 = vmul.f32 %v1384_v47, %v1384_v47 }
 0x1b6   : > { %v2489_v45 = vpack.c.bf16 %v3468_v1, %v3468_v1  ;;  %v1653_v58 = vadd.f32 %v1652_v54, %v1651_v43  ;;  %v1386_v59 = vpop.f32.mrf.mxu0  ;;  %v1719_v43 = vmul.f32 %v3442_v2, %v3442_v2 }
 0x1b7   : > { %v1421_v56 = vpop.f32.mrf.mxu1  ;;  %1610 = vst.msk [vmem:[%s3400_s29 + $0x28] sm:$0xf] %vm3987_vm9, %v2480_v53  ;;  %v1754_v48 = vsel %vm1632_vm10, %v1713_v55, 0.0  ;;  %v1720_v53 = vmul.f32 %v3448_v23, %v3448_v23  ;;  %v1666_v59 = vsel %vm1632_vm10, %v3448_v23, 0.0  ;;  %v1670_v23 = vsel %vm1632_vm10, %v3468_v1, 0.0 }
 0x1b8   : > { %1619 = vst.msk [vmem:[%s3400_s29 + $0x4c] sm:$0xf] %vm3987_vm9, %v2489_v45  ;;  %v1755_v26 = vadd.f32 %v1754_v48, %v1753_v7  ;;  %v1387_v61 = vpop.f32.mrf.mxu0  ;;  %v1664_v45 = vsel %vm1632_vm10, %v3442_v2, 0.0  ;;  %v1721_v48 = vmul.f32 %v3462_v38, %v3462_v38 }
 0x1b9   : > { %v2481_v35 = vpack.c.bf16 %v1387_v61, %v1387_v61  ;;  %v1654_v52 = vsel %vm1632_vm10, %v1387_v61, 0.0  ;;  %v1714_v63 = vmul.f32 %v1387_v61, %v1387_v61  ;;  %v1768_v2 = vsel %vm1632_vm10, %v1720_v53, 0.0 }
 0x1ba   : > { %v1655_v3 = vadd.f32 %v1654_v52, %v1653_v58  ;;  %v1389_v9 = vpop.f32.mrf.mxu0  ;;  %v1766_v58 = vsel %vm1632_vm10, %v1719_v43, 0.0  ;;  %v1722_v52 = vmul.f32 %v3468_v1, %v3468_v1 }
 0x1bb   : > { %1611 = vst.msk [vmem:[%s3400_s29 + $0x2c] sm:$0xf] %vm3987_vm9, %v2481_v35  ;;  %v1756_v10 = vsel %vm1632_vm10, %v1714_v63, 0.0  ;;  %v1668_v35 = vsel %vm1632_vm10, %v3462_v38, 0.0  ;;  %v1770_v9 = vsel %vm1632_vm10, %v1721_v48, 0.0 }
 0x1bc   : > { %v1757_v33 = vadd.f32 %v1756_v10, %v1755_v26 }
 0x1cd   : > { %v3482_v12 = vpop.f32.mrf.mxu1 }
 0x1ce   : > { %v2490_v6 = vpack.c.bf16 %v3482_v12, %v3482_v12  ;;  %v1723_v10 = vmul.f32 %v3482_v12, %v3482_v12  ;;  %v1672_v38 = vsel %vm1632_vm10, %v3482_v12, 0.0 }
 0x1cf   : > { %v1426_v41 = vpop.f32.mrf.mxu1 }
 0x1d0   : > { %1620 = vst.msk [vmem:[%s3400_s29 + $0x50] sm:$0xf] %vm3987_vm9, %v2490_v6  ;;  %v1392_v60 = vpop.f32.mrf.mxu0  ;;  %v1772_v41 = vsel %vm1632_vm10, %v1722_v52, 0.0 }
 0x1d1   : > { %v3488_v15 = vpop.f32.mrf.mxu1  ;;  %v2482_v32 = vpack.c.bf16 %v1392_v60, %v1392_v60  ;;  %v1656_v18 = vsel %vm1632_vm10, %v1392_v60, 0.0  ;;  %v1715_v5 = vmul.f32 %v1392_v60, %v1392_v60 }
 0x1d2   : > { %v2491_v17 = vpack.c.bf16 %v3488_v15, %v3488_v15  ;;  %v1657_v34 = vadd.f32 %v1656_v18, %v1655_v3  ;;  %v1394_v42 = vpop.f32.mrf.mxu0  ;;  %v1724_v60 = vmul.f32 %v3488_v15, %v3488_v15  ;;  %v1674_v1 = vsel %vm1632_vm10, %v3488_v15, 0.0 }
 0x1d3   : > { %v1429_v19 = vpop.f32.mrf.mxu1  ;;  %1612 = vst.msk [vmem:[%s3400_s29 + $0x30] sm:$0xf] %vm3987_vm9, %v2482_v32  ;;  %v1758_v4 = vsel %vm1632_vm10, %v1715_v5, 0.0  ;;  %v1774_v5 = vsel %vm1632_vm10, %v1723_v10, 0.0 }
 0x1d4   : > { %1621 = vst.msk [vmem:[%s3400_s29 + $0x54] sm:$0xf] %vm3987_vm9, %v2491_v17  ;;  %v1759_v49 = vadd.f32 %v1758_v4, %v1757_v33  ;;  %v1395_v62 = vpop.f32.mrf.mxu0 }
 0x1d5   : > { %v2483_v27 = vpack.c.bf16 %v1395_v62, %v1395_v62  ;;  %v1658_v20 = vsel %vm1632_vm10, %v1395_v62, 0.0  ;;  %v1716_v21 = vmul.f32 %v1395_v62, %v1395_v62  ;;  %v1776_v62 = vsel %vm1632_vm10, %v1724_v60, 0.0 }
 0x1d6   : > { %v1659_v13 = vadd.f32 %v1658_v20, %v1657_v34  ;;  %v1397_v51 = vpop.f32.mrf.mxu0 }
 0x1d7   : > { %1613 = vst.msk [vmem:[%s3400_s29 + $0x34] sm:$0xf] %vm3987_vm9, %v2483_v27  ;;  %v1760_v22 = vsel %vm1632_vm10, %v1716_v21, 0.0 }
 0x1d8   : > { %v1761_v44 = vadd.f32 %v1760_v22, %v1759_v49 }
 0x1e9   : > { %v1432_v24 = vpop.f32.mrf.mxu1 }
 0x1ea   : > { %v2492_v16 = vpack.c.bf16 %v1432_v24, %v1432_v24  ;;  %v1725_v19 = vmul.f32 %v1432_v24, %v1432_v24  ;;  %v1676_v12 = vsel %vm1632_vm10, %v1432_v24, 0.0 }
 0x1eb   : > { %v1434_v25 = vpop.f32.mrf.mxu1 }
 0x1ec   : > { %1622 = vst.msk [vmem:[%s3400_s29 + $0x58] sm:$0xf] %vm3987_vm9, %v2492_v16  ;;  %v1400_v0 = vpop.f32.mrf.mxu0  ;;  %v1778_v51 = vsel %vm1632_vm10, %v1725_v19, 0.0 }
 0x1ed   : > { %v1435_v29 = vpop.f32.mrf.mxu1  ;;  %v2484_v50 = vpack.c.bf16 %v1400_v0, %v1400_v0  ;;  %v1660_v31 = vsel %vm1632_vm10, %v1400_v0, 0.0  ;;  %v1717_v11 = vmul.f32 %v1400_v0, %v1400_v0 }
 0x1ee   : > { %v2493_v30 = vpack.c.bf16 %v1435_v29, %v1435_v29  ;;  %v1402_v57 = vpop.f32.mrf.mxu0  ;;  %v1661_v40 = vadd.f32 %v1660_v31, %v1659_v13  ;;  %v1726_v27 = vmul.f32 %v1435_v29, %v1435_v29  ;;  %v1678_v15 = vsel %vm1632_vm10, %v1435_v29, 0.0 }
 0x1ef   : > { %v1437_v37 = vpop.f32.mrf.mxu1  ;;  %1614 = vst.msk [vmem:[%s3400_s29 + $0x38] sm:$0xf] %vm3987_vm9, %v2484_v50  ;;  %v1762_v28 = vsel %vm1632_vm10, %v1717_v11, 0.0 }
 0x1f0   : > { %1623 = vst.msk [vmem:[%s3400_s29 + $0x5c] sm:$0xf] %vm3987_vm9, %v2493_v30  ;;  %v1403_v36 = vpop.f32.mrf.mxu0  ;;  %v1763_v39 = vadd.f32 %v1762_v28, %v1761_v44  ;;  %v1780_v30 = vsel %vm1632_vm10, %v1726_v27, 0.0 }
 0x1f1   : > { %v2485_v46 = vpack.c.bf16 %v1403_v36, %v1403_v36  ;;  %v1662_v14 = vsel %vm1632_vm10, %v1403_v36, 0.0  ;;  %v1718_v7 = vmul.f32 %v1403_v36, %v1403_v36 }
 0x1f2   : > { %v1663_v8 = vadd.f32 %v1662_v14, %v1661_v40  ;;  %v1405_v47 = vpop.f32.mrf.mxu0 }
 0x1f3   : > { %1615 = vst.msk [vmem:[%s3400_s29 + $0x3c] sm:$0xf] %vm3987_vm9, %v2485_v46  ;;  %v1764_v54 = vsel %vm1632_vm10, %v1718_v7, 0.0 }
 0x1f4   : > { %v1665_v55 = vadd.f32 %v1664_v45, %v1663_v8  ;;  %v1765_v56 = vadd.f32 %v1764_v54, %v1763_v39 }
 0x1f6   : > { %v1667_v26 = vadd.f32 %v1666_v59, %v1665_v55  ;;  %v1767_v61 = vadd.f32 %v1766_v58, %v1765_v56 }
 0x1f8   : > { %v1669_v63 = vadd.f32 %v1668_v35, %v1667_v26  ;;  %v1769_v3 = vadd.f32 %v1768_v2, %v1767_v61 }
 0x1fa   : > { %v1671_v33 = vadd.f32 %v1670_v23, %v1669_v63  ;;  %v1771_v6 = vadd.f32 %v1770_v9, %v1769_v3 }
 0x1fc   : > { %v1773_v17 = vadd.f32 %v1772_v41, %v1771_v6  ;;  %v1440_v32 = vpop.f32.mrf.mxu1  ;;  %v1673_v18 = vadd.f32 %v1672_v38, %v1671_v33 }
 0x1fd   : > { %v2494_v34 = vpack.c.bf16 %v1440_v32, %v1440_v32  ;;  %v1727_v22 = vmul.f32 %v1440_v32, %v1440_v32  ;;  %v1680_v24 = vsel %vm1632_vm10, %v1440_v32, 0.0 }
 0x1fe   : > { %v1675_v42 = vadd.f32 %v1674_v1, %v1673_v18  ;;  %v1775_v4 = vadd.f32 %v1774_v5, %v1773_v17  ;;  %v1442_v49 = vpop.f32.mrf.mxu1 }
 0x1ff   : > { %1624 = vst.msk [vmem:[%s3400_s29 + $0x60] sm:$0xf] %vm3987_vm9, %v2494_v34  ;;  %v1782_v11 = vsel %vm1632_vm10, %v1727_v22, 0.0 }
 0x200   : > { %v1677_v20 = vadd.f32 %v1676_v12, %v1675_v42  ;;  %v1777_v21 = vadd.f32 %v1776_v62, %v1775_v4  ;;  %v1443_v13 = vpop.f32.mrf.mxu1 }
 0x201   : > { %v2495_v44 = vpack.c.bf16 %v1443_v13, %v1443_v13  ;;  %v1728_v39 = vmul.f32 %v1443_v13, %v1443_v13  ;;  %v1682_v53 = vsel %vm1632_vm10, %v1443_v13, 0.0 }
 0x202   : > { %v1679_v16 = vadd.f32 %v1678_v15, %v1677_v20  ;;  %v1779_v25 = vadd.f32 %v1778_v51, %v1777_v21  ;;  %v1445_v0 = vpop.f32.mrf.mxu1 }
 0x203   : > { %1625 = vst.msk [vmem:[%s3400_s29 + $0x64] sm:$0xf] %vm3987_vm9, %v2495_v44  ;;  %v1784_v59 = vsel %vm1632_vm10, %v1728_v39, 0.0  ;;  %v2598_v39 = vld [vmem:[%s3400_s29 + $0x8] sm:$0xff]  }
 0x204   : > { %v1681_v50 = vadd.f32 %v1680_v24, %v1679_v16  ;;  %v1781_v31 = vadd.f32 %v1780_v30, %v1779_v25 }
 0x206   : > { %v1783_v37 = vadd.f32 %v1782_v11, %v1781_v31  ;;  %v1683_v58 = vadd.f32 %v1682_v53, %v1681_v50  ;;  %v3587_v53 = vld [vmem:[%s3400_s29 + $0x40] sm:$0xff]  }
 0x208   : > { %v1785_v2 = vadd.f32 %v1784_v59, %v1783_v37  ;;  %v2540_v59 = vunpack.c.l.bf16 %v2598_v39 }
 0x209   : > { %v1448_v29 = vpop.f32.mrf.mxu1 }
 0x20a   : > { %v2496_v57 = vpack.c.bf16 %v1448_v29, %v1448_v29  ;;  %v1729_v8 = vmul.f32 %v1448_v29, %v1448_v29  ;;  %v1684_v54 = vsel %vm1632_vm10, %v1448_v29, 0.0 }
 0x20b   : > { %v1450_v28 = vpop.f32.mrf.mxu1  ;;  %v1685_v35 = vadd.f32 %v1684_v54, %v1683_v58  ;;  %v3591_v58 = vld [vmem:[%s3400_s29 + $0x48] sm:$0xff]  }
 0x20c   : > { %1626 = vst.msk [vmem:[%s3400_s29 + $0x68] sm:$0xf] %vm3987_vm9, %v2496_v57  ;;  %v1786_v48 = vsel %vm1632_vm10, %v1729_v8, 0.0  ;;  %v2599_v8 = vld [vmem:[%s3400_s29 + $0x10] sm:$0xff]  }
 0x20d   : > { %v1451_v40 = vpop.f32.mrf.mxu1  ;;  %v1787_v9 = vadd.f32 %v1786_v48, %v1785_v2  ;;  %v2541_v48 = vunpack.c.h.bf16 %v2598_v39  ;;  %v2602_v2 = vld [vmem:[%s3400_s29 + $0x28] sm:$0xff]  }
 0x20e   : > { %v2497_v36 = vpack.c.bf16 %v1451_v40, %v1451_v40  ;;  %v1730_v55 = vmul.f32 %v1451_v40, %v1451_v40  ;;  %v1686_v26 = vsel %vm1632_vm10, %v1451_v40, 0.0 }
 0x20f   : > { %v1453_v43 = vpop.f32.mrf.mxu1  ;;  %v1687_v23 = vadd.f32 %v1686_v26, %v1685_v35  ;;  %v2544_v26 = vunpack.c.l.bf16 %v2599_v8  ;;  %v1811_v35 = vld [vmem:[%s3984_s2] sm:$0x1] }
 0x210   : > { %1627 = vst.msk [vmem:[%s3400_s29 + $0x6c] sm:$0xf] %vm3987_vm9, %v2497_v36  ;;  %v1788_v52 = vsel %vm1632_vm10, %v1730_v55, 0.0 }
 0x211   : > { %v1789_v6 = vadd.f32 %v1788_v52, %v1787_v9  ;;  %v2607_v9 = vld [vmem:[%s3400_s29 + $0x50] sm:$0xff]  }
 0x218   : > { %v1456_v46 = vpop.f32.mrf.mxu1 }
 0x219   : > { %v2498_v14 = vpack.c.bf16 %v1456_v46, %v1456_v46  ;;  %v1731_v61 = vmul.f32 %v1456_v46, %v1456_v46  ;;  %v1688_v63 = vsel %vm1632_vm10, %v1456_v46, 0.0 }
 0x21a   : > { %v1458_v7 = vpop.f32.mrf.mxu1  ;;  %v1689_v41 = vadd.f32 %v1688_v63, %v1687_v23  ;;  %v2603_v23 = vld [vmem:[%s3400_s29 + $0x30] sm:$0xff]  }
 0x21b   : > { %1628 = vst.msk [vmem:[%s3400_s29 + $0x70] sm:$0xf] %vm3987_vm9, %v2498_v14  ;;  %v1790_v10 = vsel %vm1632_vm10, %v1731_v61, 0.0  ;;  %v1883_v14 = vlaneseq  ;;  %v2535_v7 = vld [vmem:[%s3400_s29] sm:$0xff]   ;;  %v2545_v61 = vunpack.c.h.bf16 %v2599_v8 }
 0x21c   : > { %v1459_v47 = vpop.f32.mrf.mxu1  ;;  %v1791_v5 = vadd.f32 %v1790_v10, %v1789_v6  ;;  %v2536_v54 = vunpack.c.l.bf16 %v2535_v7  ;;  %v2537_v55 = vunpack.c.h.bf16 %v2535_v7  ;;  %v2569_v6 = vunpack.c.h.bf16 %v3587_v53 }
 0x21d   : > { %v2499_v45 = vpack.c.bf16 %v1459_v47, %v1459_v47  ;;  %v1732_v3 = vmul.f32 %v1459_v47, %v1459_v47  ;;  %v1690_v33 = vsel %vm1632_vm10, %v1459_v47, 0.0  ;;  %v3583_v47 = vshrl.u32 %v1883_v14, 7 }
 0x21e   : > { %v1461_v56 = vpop.f32.mrf.mxu1  ;;  %v1691_v1 = vadd.f32 %v1690_v33, %v1689_v41 }
 0x21f   : > { %1629 = vst.msk [vmem:[%s3400_s29 + $0x74] sm:$0xf] %vm3987_vm9, %v2499_v45  ;;  %v1792_v60 = vsel %vm1632_vm10, %v1732_v3, 0.0  ;;  %v2600_v45 = vld [vmem:[%s3400_s29 + $0x18] sm:$0xff]   ;;  %v2601_v56 = vld [vmem:[%s3400_s29 + $0x20] sm:$0xff]   ;;  %v2568_v3 = vunpack.c.l.bf16 %v3587_v53  ;;  %v1885_v10 = vsub.s32 0, %v3583_v47 }
 0x220   : > { %v1793_v42 = vadd.f32 %v1792_v60, %v1791_v5  ;;  %v2548_v52 = vunpack.c.l.bf16 %v2600_v45  ;;  %v2549_v63 = vunpack.c.h.bf16 %v2600_v45  ;;  %v2552_v41 = vunpack.c.l.bf16 %v2601_v56 }
 0x221   : > { %v2572_v60 = vunpack.c.l.bf16 %v3591_v58  ;;  %v2557_v5 = vunpack.c.h.bf16 %v2602_v2 }
 0x225   : > { %v1464_v38 = vpop.f32.mrf.mxu1 }
 0x226   : > { %v2500_v17 = vpack.c.bf16 %v1464_v38, %v1464_v38  ;;  %v1692_v32 = vsel %vm1632_vm10, %v1464_v38, 0.0  ;;  %v1733_v18 = vmul.f32 %v1464_v38, %v1464_v38  ;;  %v2553_v38 = vunpack.c.h.bf16 %v2601_v56 }
 0x227   : > { %v1466_v19 = vpop.f32.mrf.mxu1  ;;  %v1693_v4 = vadd.f32 %v1692_v32, %v1691_v1  ;;  %v2573_v32 = vunpack.c.h.bf16 %v3591_v58  ;;  %v2604_v1 = vld [vmem:[%s3400_s29 + $0x38] sm:$0xff]  }
 0x228   : > { %1630 = vst.msk [vmem:[%s3400_s29 + $0x78] sm:$0xf] %vm3987_vm9, %v2500_v17  ;;  %v1794_v34 = vsel %vm1632_vm10, %v1733_v18, 0.0  ;;  %v2608_v17 = vld [vmem:[%s3400_s29 + $0x58] sm:$0xff]   ;;  %v2556_v18 = vunpack.c.l.bf16 %v2602_v2  ;;  %v2609_v19 = vld [vmem:[%s3400_s29 + $0x60] sm:$0xff]  }
 0x229   : > { %v1467_v49 = vpop.f32.mrf.mxu1  ;;  %v1795_v20 = vadd.f32 %v1794_v34, %v1793_v42  ;;  %v2576_v42 = vunpack.c.l.bf16 %v2607_v9 }
 0x22a   : > { %v2501_v62 = vpack.c.bf16 %v1467_v49, %v1467_v49  ;;  %v1694_v12 = vsel %vm1632_vm10, %v1467_v49, 0.0  ;;  %v1734_v27 = vmul.f32 %v1467_v49, %v1467_v49  ;;  %v2560_v49 = vunpack.c.l.bf16 %v2603_v23 }
 0x22b   : > { %v1695_v21 = vadd.f32 %v1694_v12, %v1693_v4  ;;  %v1469_v13 = vpop.f32.mrf.mxu1  ;;  %v2577_v4 = vunpack.c.h.bf16 %v2607_v9  ;;  %v2610_v12 = vld [vmem:[%s3400_s29 + $0x68] sm:$0xff]  }
 0x22c   : > { %1631 = vst.msk [vmem:[%s3400_s29 + $0x7c] sm:$0xf] %vm3987_vm9, %v2501_v62  ;;  %v1796_v51 = vsel %vm1632_vm10, %v1734_v27, 0.0  ;;  %v2561_v62 = vunpack.c.h.bf16 %v2603_v23  ;;  %v2611_v27 = vld [vmem:[%s3400_s29 + $0x70] sm:$0xff]   ;;  %v1815_v13 = vld [vmem:[%s3985_s3] sm:$0x1] }
 0x22d   : > { %v1696_v15 = vrot.slane %v1695_v21, 4  ;;  %v1797_v22 = vadd.f32 %v1796_v51, %v1795_v20  ;;  %v2580_v20 = vunpack.c.l.bf16 %v2608_v17 }
 0x22f   : > { %v1697_v44 = vadd.f32 %v1696_v15, %v1695_v21  ;;  %v1798_v16 = vrot.slane %v1797_v22, 4  ;;  %v2581_v21 = vunpack.c.h.bf16 %v2608_v17 }
 0x231   : > { %v1698_v25 = vrot.slane %v1697_v44, 2  ;;  %v1799_v0 = vadd.f32 %v1798_v16, %v1797_v22  ;;  %v2565_v16 = vunpack.c.h.bf16 %v2604_v1 }
 0x233   : > { %v1699_v30 = vadd.f32 %v1698_v25, %v1697_v44  ;;  %v1800_v24 = vrot.slane %v1799_v0, 2  ;;  %v2612_v15 = vld [vmem:[%s3400_s29 + $0x78] sm:$0xff]   ;;  %v2564_v44 = vunpack.c.l.bf16 %v2604_v1  ;;  %v2584_v25 = vunpack.c.l.bf16 %v2609_v19 }
 0x235   : > { %v1700_v50 = vrot.slane %v1699_v30, 1  ;;  %v1801_v31 = vadd.f32 %v1800_v24, %v1799_v0  ;;  %v2585_v0 = vunpack.c.h.bf16 %v2609_v19  ;;  %v2589_v24 = vunpack.c.h.bf16 %v2610_v12 }
 0x237   : > { %v1701_v11 = vadd.f32 %v1700_v50, %v1699_v30  ;;  %v1802_v37 = vrot.slane %v1801_v31, 1  ;;  %v2588_v30 = vunpack.c.l.bf16 %v2610_v12  ;;  %v2592_v50 = vunpack.c.l.bf16 %v2611_v27 }
 0x239   : > { %v1803_v29 = vadd.f32 %v1802_v37, %v1801_v31  ;;  %v1806_v57 = vmul.f32 0.00390625, %v1701_v11  ;;  %v2593_v31 = vunpack.c.h.bf16 %v2611_v27  ;;  %v2596_v37 = vunpack.c.l.bf16 %v2612_v15 }
 0x23b   : > { %v1807_v28 = vmul.f32 0.00390625, %v1803_v29  ;;  %v1808_v40 = vmul.f32 %v1806_v57, %v1806_v57  ;;  %v2597_v29 = vunpack.c.h.bf16 %v2612_v15 }
 0x23d   : > { %v1809_v36 = vsub.f32 %v1807_v28, %v1808_v40 }
 0x23f   : > { %v1810_v43 = vmax.f32 %v1809_v36, 0.0 }
 0x241   : > { %v1812_v46 = vadd.f32 1e-05, %v1810_v43 }
 0x243   : > { %2709 = vrsqrt.f32 %v1812_v46 }
 0x250   : > { %v2710_v33 = vpop.eup %2709 }
 0x251   : > { %v1814_v34 = vmul.f32 %v2710_v33, %v1811_v35 }
 0x253   : > { %v1816_v51 = vmul.f32 %v1814_v34, %v1806_v57  ;;  %v1886_v22 = vrot.slane %v1814_v34, %v1885_v10 }
 0x255   : > { %v1817_v11 = vsub.f32 %v1815_v13, %v1816_v51  ;;  %v1888_v28 = vmul.f32 %v2536_v54, %v1886_v22  ;;  %v1889_v40 = vmul.f32 %v2537_v55, %v1886_v22  ;;  %v1890_v36 = vmul.f32 %v2540_v59, %v1886_v22 }
 0x256   : > { %v1891_v43 = vmul.f32 %v2541_v48, %v1886_v22  ;;  %v1892_v57 = vmul.f32 %v2544_v26, %v1886_v22  ;;  %v1893_v46 = vmul.f32 %v2545_v61, %v1886_v22  ;;  %v1894_v14 = vmul.f32 %v2548_v52, %v1886_v22 }
 0x257   : > { %v1895_v7 = vmul.f32 %v2549_v63, %v1886_v22  ;;  %v1896_v39 = vmul.f32 %v2552_v41, %v1886_v22  ;;  %v1897_v8 = vmul.f32 %v2553_v38, %v1886_v22  ;;  %v1898_v45 = vmul.f32 %v2556_v18, %v1886_v22 }
 0x258   : > { %v1899_v53 = vmul.f32 %v2557_v5, %v1886_v22  ;;  %v1900_v56 = vmul.f32 %v2560_v49, %v1886_v22  ;;  %v1901_v58 = vmul.f32 %v2561_v62, %v1886_v22  ;;  %v1902_v2 = vmul.f32 %v2564_v44, %v1886_v22 }
 0x259   : > { %v1903_v35 = vmul.f32 %v2565_v16, %v1886_v22  ;;  %v1904_v9 = vmul.f32 %v2568_v3, %v1886_v22  ;;  %v1905_v23 = vmul.f32 %v2569_v6, %v1886_v22  ;;  %v1906_v33 = vmul.f32 %v2572_v60, %v1886_v22 }
 0x25a   : > { %v1907_v17 = vmul.f32 %v2573_v32, %v1886_v22  ;;  %v1908_v54 = vmul.f32 %v2576_v42, %v1886_v22  ;;  %v1909_v55 = vmul.f32 %v2577_v4, %v1886_v22  ;;  %v1910_v59 = vmul.f32 %v2580_v20, %v1886_v22 }
 0x25b   : > { %v1911_v48 = vmul.f32 %v2581_v21, %v1886_v22  ;;  %v1912_v26 = vmul.f32 %v2584_v25, %v1886_v22  ;;  %v1913_v61 = vmul.f32 %v2585_v0, %v1886_v22  ;;  %v1914_v52 = vmul.f32 %v2588_v30, %v1886_v22 }
 0x25c   : > { %v1915_v63 = vmul.f32 %v2589_v24, %v1886_v22  ;;  %v1924_v41 = vrot.slane %v1817_v11, %v1885_v10  ;;  %v1916_v38 = vmul.f32 %v2592_v50, %v1886_v22  ;;  %v1917_v18 = vmul.f32 %v2593_v31, %v1886_v22 }
 0x25d   : > { %v1918_v5 = vmul.f32 %v2596_v37, %v1886_v22  ;;  %v1919_v1 = vmul.f32 %v2597_v29, %v1886_v22 }
 0x25e   : > { %v3617_v19 = vadd.f32 %v1924_v41, %v1888_v28  ;;  %v3619_v3 = vadd.f32 %v1924_v41, %v1889_v40  ;;  %v3621_v6 = vadd.f32 %v1924_v41, %v1890_v36  ;;  %v3623_v60 = vadd.f32 %v1924_v41, %v1891_v43 }
 0x25f   : > { %v3625_v32 = vadd.f32 %v1924_v41, %v1892_v57  ;;  %v3627_v34 = vadd.f32 %v1924_v41, %v1893_v46  ;;  %v3629_v42 = vadd.f32 %v1924_v41, %v1894_v14  ;;  %v3631_v47 = vadd.f32 %v1924_v41, %v1895_v7 }
 0x260   : > { %v3633_v10 = vadd.f32 %v1924_v41, %v1896_v39  ;;  %v3635_v4 = vadd.f32 %v1924_v41, %v1897_v8  ;;  %v3637_v49 = vadd.f32 %v1924_v41, %v1898_v45  ;;  %v3639_v62 = vadd.f32 %v1924_v41, %v1899_v53 }
 0x261   : > { %v3641_v12 = vadd.f32 %v1924_v41, %v1900_v56  ;;  %v3643_v27 = vadd.f32 %v1924_v41, %v1901_v58  ;;  %v3645_v20 = vadd.f32 %v1924_v41, %v1902_v2  ;;  %v3647_v21 = vadd.f32 %v1924_v41, %v1903_v35 }
 0x262   : > { %v3649_v13 = vadd.f32 %v1924_v41, %v1904_v9  ;;  %v3651_v51 = vadd.f32 %v1924_v41, %v1905_v23  ;;  %v3653_v15 = vadd.f32 %v1924_v41, %v1906_v33  ;;  %v3655_v22 = vadd.f32 %v1924_v41, %v1907_v17 }
 0x263   : > { %v3657_v44 = vadd.f32 %v1924_v41, %v1908_v54  ;;  %v3659_v16 = vadd.f32 %v1924_v41, %v1909_v55  ;;  %v3661_v25 = vadd.f32 %v1924_v41, %v1910_v59  ;;  %v3663_v0 = vadd.f32 %v1924_v41, %v1911_v48 }
 0x264   : > { %v3665_v30 = vadd.f32 %v1924_v41, %v1912_v26  ;;  %v3667_v24 = vadd.f32 %v1924_v41, %v1913_v61  ;;  %v3669_v50 = vadd.f32 %v1924_v41, %v1914_v52  ;;  %v3671_v31 = vadd.f32 %v1924_v41, %v1915_v63 }
 0x265   : > { %v3673_v11 = vadd.f32 %v1924_v41, %v1916_v38  ;;  %v3675_v37 = vadd.f32 %v1924_v41, %v1917_v18  ;;  %v3677_v29 = vadd.f32 %v1924_v41, %v1918_v5  ;;  %v3679_v28 = vadd.f32 %v1924_v41, %v1919_v1 }
 0x266   : > { %vm1958_vm11 = vcmp.ge.f32.partialorder %v3617_v19, 0.0  ;;  %vm1959_vm12 = vcmp.ge.f32.partialorder %v3619_v3, 0.0  ;;  %vm1960_vm13 = vcmp.ge.f32.partialorder %v3621_v6, 0.0  ;;  %vm1961_vm14 = vcmp.ge.f32.partialorder %v3623_v60, 0.0 }
 0x267   : > { %vm1962_vm15 = vcmp.ge.f32.partialorder %v3625_v32, 0.0  ;;  %vm1963_vm0 = vcmp.ge.f32.partialorder %v3627_v34, 0.0  ;;  %vm1964_vm1 = vcmp.ge.f32.partialorder %v3629_v42, 0.0  ;;  %vm1965_vm2 = vcmp.ge.f32.partialorder %v3631_v47, 0.0 }
 0x268   : > { %vm1966_vm3 = vcmp.ge.f32.partialorder %v3633_v10, 0.0  ;;  %v1990_v40 = vmul.f32 0.2, %v3617_v19  ;;  %v1991_v36 = vmul.f32 0.2, %v3619_v3  ;;  %vm1973_vm9 = vcmp.ge.f32.partialorder %v3647_v21, 0.0 }
 0x269   : > { %v1992_v43 = vmul.f32 0.2, %v3621_v6  ;;  %vm1974_vm4 = vcmp.ge.f32.partialorder %v3649_v13, 0.0  ;;  %v1993_v57 = vmul.f32 0.2, %v3623_v60  ;;  %vm1979_vm10 = vcmp.ge.f32.partialorder %v3659_v16, 0.0 }
 0x26a   : > { %v1994_v46 = vmul.f32 0.2, %v3625_v32  ;;  %v1995_v14 = vmul.f32 0.2, %v3627_v34  ;;  %v1996_v7 = vmul.f32 0.2, %v3629_v42  ;;  %v3715_v45 = vsel %vm1958_vm11, %v3617_v19, %v1990_v40 }
 0x26b   : > { %v1997_v39 = vmul.f32 0.2, %v3631_v47  ;;  %v1998_v8 = vmul.f32 0.2, %v3633_v10  ;;  %vm1983_vm6 = vcmp.ge.f32.partialorder %v3667_v24, 0.0  ;;  %v3727_v2 = vsel %vm1959_vm12, %v3619_v3, %v1991_v36 }
 0x26c   : > { %v1999_v53 = vmul.f32 0.2, %v3635_v4  ;;  %v2000_v56 = vmul.f32 0.2, %v3637_v49  ;;  %v2001_v58 = vmul.f32 0.2, %v3639_v62  ;;  %v3739_v33 = vsel %vm1960_vm13, %v3621_v6, %v1992_v43 }
 0x26d   : > { %vm1985_vm5 = vcmp.ge.f32.partialorder %v3671_v31, 0.0  ;;  %vm1986_vm8 = vcmp.ge.f32.partialorder %v3673_v11, 0.0  ;;  %vm1987_vm7 = vcmp.ge.f32.partialorder %v3675_v37, 0.0  ;;  %v2002_v35 = vmul.f32 0.2, %v3641_v12 }
 0x26e   : > { %v2003_v9 = vmul.f32 0.2, %v3643_v27  ;;  %v2004_v23 = vmul.f32 0.2, %v3645_v20  ;;  %vm1988_vm12 = vcmp.ge.f32.partialorder %v3677_v29, 0.0  ;;  %vm1989_vm11 = vcmp.ge.f32.partialorder %v3679_v28, 0.0 }
 0x26f   : > { %v2005_v17 = vmul.f32 0.2, %v3647_v21  ;;  %v2006_v54 = vmul.f32 0.2, %v3649_v13  ;;  %v2007_v55 = vmul.f32 0.2, %v3651_v51  ;;  %v2025_v59 = vsel %vm1961_vm14, %v3623_v60, %v1993_v57 }
 0x270   : > { %v2008_v48 = vmul.f32 0.2, %v3653_v15  ;;  %v2009_v26 = vmul.f32 0.2, %v3655_v22  ;;  %v2010_v61 = vmul.f32 0.2, %v3657_v44  ;;  %v2026_v52 = vsel %vm1962_vm15, %v3625_v32, %v1994_v46 }
 0x271   : > { %v2011_v63 = vmul.f32 0.2, %v3659_v16  ;;  %v2012_v41 = vmul.f32 0.2, %v3661_v25  ;;  %v2013_v38 = vmul.f32 0.2, %v3663_v0  ;;  %v2027_v18 = vsel %vm1963_vm0, %v3627_v34, %v1995_v14 }
 0x272   : > { %v2014_v5 = vmul.f32 0.2, %v3665_v30  ;;  %v2015_v1 = vmul.f32 0.2, %v3667_v24  ;;  %v2016_v19 = vmul.f32 0.2, %v3669_v50  ;;  %v2028_v3 = vsel %vm1964_vm1, %v3629_v42, %v1996_v7 }
 0x273   : > { %v2017_v6 = vmul.f32 0.2, %v3671_v31  ;;  %v2018_v60 = vmul.f32 0.2, %v3673_v11  ;;  %v2019_v32 = vmul.f32 0.2, %v3675_v37  ;;  %v2029_v34 = vsel %vm1965_vm2, %v3631_v47, %v1997_v39 }
 0x274   : > { %v2020_v40 = vmul.f32 0.2, %v3677_v29  ;;  %v2021_v36 = vmul.f32 0.2, %v3679_v28  ;;  %v2030_v43 = vsel %vm1966_vm3, %v3633_v10, %v1998_v8  ;;  %vm3988_vm13 = vcmp.ge.f32.partialorder %v3635_v4, 0.0 }
 0x275   : > { %v2031_v42 = vsel %vm3988_vm13, %v3635_v4, %v1999_v53  ;;  %vm3989_vm14 = vcmp.ge.f32.partialorder %v3637_v49, 0.0  ;;  %vm3990_vm15 = vcmp.ge.f32.partialorder %v3639_v62, 0.0  ;;  %vm3991_vm0 = vcmp.ge.f32.partialorder %v3641_v12, 0.0 }
 0x276   : > { %v2032_v57 = vsel %vm3989_vm14, %v3637_v49, %v2000_v56  ;;  %v2033_v47 = vsel %vm3990_vm15, %v3639_v62, %v2001_v58  ;;  %v2034_v46 = vsel %vm3991_vm0, %v3641_v12, %v2002_v35  ;;  %vm3992_vm1 = vcmp.ge.f32.partialorder %v3643_v27, 0.0 }
 0x277   : > { %v2035_v10 = vsel %vm3992_vm1, %v3643_v27, %v2003_v9  ;;  %vm3993_vm2 = vcmp.ge.f32.partialorder %v3645_v20, 0.0  ;;  %v2037_v49 = vsel %vm1973_vm9, %v3647_v21, %v2005_v17  ;;  %v2038_v62 = vsel %vm1974_vm4, %v3649_v13, %v2006_v54 }
 0x278   : > { %v2036_v4 = vsel %vm3993_vm2, %v3645_v20, %v2004_v23  ;;  %vm3994_vm3 = vcmp.ge.f32.partialorder %v3651_v51, 0.0  ;;  %vm3995_vm13 = vcmp.ge.f32.partialorder %v3653_v15, 0.0  ;;  %vm3996_vm14 = vcmp.ge.f32.partialorder %v3655_v22, 0.0 }
 0x279   : > { %v2039_v12 = vsel %vm3994_vm3, %v3651_v51, %v2007_v55  ;;  %v3808_v27 = vsel %vm3995_vm13, %v3653_v15, %v2008_v48  ;;  %v3813_v20 = vsel %vm3996_vm14, %v3655_v22, %v2009_v26  ;;  %vm3997_vm9 = vcmp.ge.f32.partialorder %v3657_v44, 0.0 }
 0x27a   : > { %v3818_v21 = vsel %vm3997_vm9, %v3657_v44, %v2010_v61  ;;  %v3823_v13 = vsel %vm1979_vm10, %v3659_v16, %v2011_v63  ;;  %vm3998_vm4 = vcmp.ge.f32.partialorder %v3661_v25, 0.0  ;;  %vm3999_vm15 = vcmp.ge.f32.partialorder %v3663_v0, 0.0 }
 0x27b   : > { %v3828_v51 = vsel %vm3998_vm4, %v3661_v25, %v2012_v41  ;;  %v3833_v15 = vsel %vm3999_vm15, %v3663_v0, %v2013_v38  ;;  %vm4000_vm0 = vcmp.ge.f32.partialorder %v3665_v30, 0.0  ;;  %v3843_v44 = vsel %vm1983_vm6, %v3667_v24, %v2015_v1 }
 0x27c   : > { %v3838_v22 = vsel %vm4000_vm0, %v3665_v30, %v2014_v5  ;;  %vm4001_vm10 = vcmp.ge.f32.partialorder %v3669_v50, 0.0  ;;  %v3853_v25 = vsel %vm1985_vm5, %v3671_v31, %v2017_v6  ;;  %v3858_v0 = vsel %vm1986_vm8, %v3673_v11, %v2018_v60 }
 0x27d   : > { %v3848_v16 = vsel %vm4001_vm10, %v3669_v50, %v2016_v19  ;;  %v3863_v30 = vsel %vm1987_vm7, %v3675_v37, %v2019_v32  ;;  %v3868_v24 = vsel %vm1988_vm12, %v3677_v29, %v2020_v40  ;;  %v3873_v50 = vsel %vm1989_vm11, %v3679_v28, %v2021_v36 }
 0x27e   : > { %v2502_v31 = vpack.c.bf16 %v3715_v45, %v3715_v45  ;;  %v2503_v11 = vpack.c.bf16 %v3727_v2, %v3727_v2  ;;  %v2504_v37 = vpack.c.bf16 %v3739_v33, %v3739_v33  ;;  %v2505_v14 = vpack.c.bf16 %v2025_v59, %v2025_v59 }
 0x27f   : > { %v2506_v29 = vpack.c.bf16 %v2026_v52, %v2026_v52  ;;  %v2507_v7 = vpack.c.bf16 %v2027_v18, %v2027_v18  ;;  %v2508_v39 = vpack.c.bf16 %v2028_v3, %v2028_v3  ;;  %v2509_v8 = vpack.c.bf16 %v2029_v34, %v2029_v34 }
 0x280   : > { %v2510_v28 = vpack.c.bf16 %v2030_v43, %v2030_v43  ;;  %v2511_v53 = vpack.c.bf16 %v2031_v42, %v2031_v42  ;;  %vm4002_vm5 = vcmask 60416   ;;  %v2512_v45 = vpack.c.bf16 %v2032_v57, %v2032_v57 }
 0x281   : > { %2182 = vst.msk [vmem:[%s3400_s29] sm:$0xf] %vm4002_vm5, %v2502_v31  ;;  %vm4003_vm6 = vmmov %vm4002_vm5  ;;  %v2513_v56 = vpack.c.bf16 %v2033_v47, %v2033_v47  ;;  %v2514_v58 = vpack.c.bf16 %v2034_v46, %v2034_v46  ;;  %v2515_v2 = vpack.c.bf16 %v2035_v10, %v2035_v10  ;;  %v2516_v35 = vpack.c.bf16 %v2036_v4, %v2036_v4 }
 0x282   : > { %2183 = vst.msk [vmem:[%s3400_s29 + $0x4] sm:$0xf] %vm4003_vm6, %v2503_v11  ;;  %vm4004_vm7 = vmmov %vm4002_vm5  ;;  %v2517_v9 = vpack.c.bf16 %v2037_v49, %v2037_v49  ;;  %v2518_v23 = vpack.c.bf16 %v2038_v62, %v2038_v62  ;;  %v2519_v33 = vpack.c.bf16 %v2039_v12, %v2039_v12  ;;  %v2520_v17 = vpack.c.bf16 %v3808_v27, %v3808_v27 }
 0x283   : > { %2184 = vst.msk [vmem:[%s3400_s29 + $0x8] sm:$0xf] %vm4004_vm7, %v2504_v37  ;;  %vm4005_vm8 = vmmov %vm4002_vm5  ;;  %v2521_v54 = vpack.c.bf16 %v3813_v20, %v3813_v20  ;;  %v2522_v55 = vpack.c.bf16 %v3818_v21, %v3818_v21  ;;  %v2523_v59 = vpack.c.bf16 %v3823_v13, %v3823_v13  ;;  %v2524_v48 = vpack.c.bf16 %v3828_v51, %v3828_v51 }
 0x284   : > { %2185 = vst.msk [vmem:[%s3400_s29 + $0xc] sm:$0xf] %vm4005_vm8, %v2505_v14  ;;  %vm4006_vm11 = vmmov %vm4002_vm5  ;;  %v2525_v26 = vpack.c.bf16 %v3833_v15, %v3833_v15  ;;  %v2526_v61 = vpack.c.bf16 %v3838_v22, %v3838_v22  ;;  %v2527_v52 = vpack.c.bf16 %v3843_v44, %v3843_v44  ;;  %v2528_v63 = vpack.c.bf16 %v3848_v16, %v3848_v16 }
 0x285   : > { %2186 = vst.msk [vmem:[%s3400_s29 + $0x10] sm:$0xf] %vm4006_vm11, %v2506_v29  ;;  %vm4007_vm12 = vmmov %vm4002_vm5  ;;  %v2529_v41 = vpack.c.bf16 %v3853_v25, %v3853_v25  ;;  %v2530_v38 = vpack.c.bf16 %v3858_v0, %v3858_v0  ;;  %v2531_v18 = vpack.c.bf16 %v3863_v30, %v3863_v30  ;;  %v2532_v5 = vpack.c.bf16 %v3868_v24, %v3868_v24 }
 0x286   : > { %2187 = vst.msk [vmem:[%s3400_s29 + $0x14] sm:$0xf] %vm4007_vm12, %v2507_v7  ;;  %vm4008_vm1 = vmmov %vm4002_vm5  ;;  %v2533_v1 = vpack.c.bf16 %v3873_v50, %v3873_v50 }
 0x287   : > { %2188 = vst.msk [vmem:[%s3400_s29 + $0x18] sm:$0xf] %vm4008_vm1, %v2508_v39  ;;  %vm4009_vm2 = vmmov %vm4008_vm1 }
 0x288   : > { %2189 = vst.msk [vmem:[%s3400_s29 + $0x1c] sm:$0xf] %vm4009_vm2, %v2509_v8  ;;  %vm4010_vm3 = vmmov %vm4008_vm1 }
 0x289   : > { %2190 = vst.msk [vmem:[%s3400_s29 + $0x20] sm:$0xf] %vm4010_vm3, %v2510_v28  ;;  %vm4011_vm13 = vmmov %vm4008_vm1 }
 0x28a   : > { %2191 = vst.msk [vmem:[%s3400_s29 + $0x24] sm:$0xf] %vm4011_vm13, %v2511_v53  ;;  %vm4012_vm14 = vmmov %vm4008_vm1 }
 0x28b   : > { %2192 = vst.msk [vmem:[%s3400_s29 + $0x28] sm:$0xf] %vm4012_vm14, %v2512_v45  ;;  %vm4013_vm9 = vmmov %vm4008_vm1 }
 0x28c   : > { %2193 = vst.msk [vmem:[%s3400_s29 + $0x2c] sm:$0xf] %vm4013_vm9, %v2513_v56  ;;  %vm4014_vm4 = vmmov %vm4008_vm1 }
 0x28d   : > { %2194 = vst.msk [vmem:[%s3400_s29 + $0x30] sm:$0xf] %vm4014_vm4, %v2514_v58  ;;  %vm4015_vm15 = vmmov %vm4008_vm1 }
 0x28e   : > { %2195 = vst.msk [vmem:[%s3400_s29 + $0x34] sm:$0xf] %vm4015_vm15, %v2515_v2  ;;  %vm4016_vm0 = vmmov %vm4008_vm1 }
 0x28f   : > { %2196 = vst.msk [vmem:[%s3400_s29 + $0x38] sm:$0xf] %vm4016_vm0, %v2516_v35  ;;  %vm4017_vm10 = vmmov %vm4016_vm0 }
 0x290   : > { %2197 = vst.msk [vmem:[%s3400_s29 + $0x3c] sm:$0xf] %vm4017_vm10, %v2517_v9  ;;  %vm4018_vm5 = vmmov %vm4016_vm0 }
 0x291   : > { %2198 = vst.msk [vmem:[%s3400_s29 + $0x40] sm:$0xf] %vm4018_vm5, %v2518_v23  ;;  %vm4019_vm6 = vmmov %vm4016_vm0 }
 0x292   : > { %2199 = vst.msk [vmem:[%s3400_s29 + $0x44] sm:$0xf] %vm4019_vm6, %v2519_v33  ;;  %vm4020_vm7 = vmmov %vm4016_vm0 }
 0x293   : > { %2200 = vst.msk [vmem:[%s3400_s29 + $0x48] sm:$0xf] %vm4020_vm7, %v2520_v17  ;;  %vm4021_vm8 = vmmov %vm4016_vm0 }
 0x294   : > { %2201 = vst.msk [vmem:[%s3400_s29 + $0x4c] sm:$0xf] %vm4021_vm8, %v2521_v54  ;;  %vm4022_vm11 = vmmov %vm4016_vm0 }
 0x295   : > { %2202 = vst.msk [vmem:[%s3400_s29 + $0x50] sm:$0xf] %vm4022_vm11, %v2522_v55  ;;  %vm4023_vm12 = vmmov %vm4016_vm0 }
 0x296   : > { %2203 = vst.msk [vmem:[%s3400_s29 + $0x54] sm:$0xf] %vm4023_vm12, %v2523_v59  ;;  %vm4024_vm1 = vmmov %vm4016_vm0 }
 0x297   : > { %2204 = vst.msk [vmem:[%s3400_s29 + $0x58] sm:$0xf] %vm4024_vm1, %v2524_v48  ;;  %vm4025_vm2 = vmmov %vm4016_vm0 }
 0x298   : > { %2205 = vst.msk [vmem:[%s3400_s29 + $0x5c] sm:$0xf] %vm4025_vm2, %v2525_v26  ;;  %vm4026_vm3 = vmmov %vm4016_vm0 }
 0x299   : > { %2206 = vst.msk [vmem:[%s3400_s29 + $0x60] sm:$0xf] %vm4026_vm3, %v2526_v61  ;;  %vm4027_vm13 = vmmov %vm4016_vm0 }
 0x29a   : > { %2207 = vst.msk [vmem:[%s3400_s29 + $0x64] sm:$0xf] %vm4027_vm13, %v2527_v52  ;;  %vm4028_vm14 = vmmov %vm4016_vm0 }
 0x29b   : > { %2208 = vst.msk [vmem:[%s3400_s29 + $0x68] sm:$0xf] %vm4028_vm14, %v2528_v63  ;;  %vm4029_vm9 = vmmov %vm4016_vm0 }
 0x29c   : > { %2209 = vst.msk [vmem:[%s3400_s29 + $0x6c] sm:$0xf] %vm4029_vm9, %v2529_v41  ;;  %vm4030_vm4 = vmmov %vm4016_vm0 }
 0x29d   : > { %2210 = vst.msk [vmem:[%s3400_s29 + $0x70] sm:$0xf] %vm4030_vm4, %v2530_v38  ;;  %vm4031_vm15 = vmmov %vm4016_vm0 }
 0x29e   : > { %2211 = vst.msk [vmem:[%s3400_s29 + $0x74] sm:$0xf] %vm4031_vm15, %v2531_v18  ;;  %vm4032_vm10 = vmmov %vm4016_vm0 }
 0x29f   : > { %2212 = vst.msk [vmem:[%s3400_s29 + $0x78] sm:$0xf] %vm4016_vm0, %v2532_v5 }
 0x2a0   : > { %2213 = vst.msk [vmem:[%s3400_s29 + $0x7c] sm:$0xf] %vm4032_vm10, %v2533_v1 }
 0x2a1 PF: > { %s14_s17 = sadd.s32 1, %s2733_s17   ;;  %s4033_s15 = smov %s2729_s16 }
 0x2a2   : > { %p11_p5 = scmp.ge.s32.totalorder %s14_s17, 4   ;;  %s4034_s16 = smov %s4036_s18 }
 0x2a4   :  { %13 = sbr.rel (!%p11_p5) target bundleno = 2 (0x2), region = 76 }

</bundles_post_ra>
